<compile_context>
chip_gen: v6e
topology: v6e:2x2x1
jax: 0.10.0
libtpu: 0.0.40
codegen_flags: <defaults>
</compile_context>

<pallas_src>
import functools
import numpy as np
import jax
import jax.numpy as jnp
from jax import lax
from jax.experimental import pallas as pl
from jax.experimental.pallas import tpu as pltpu

_DOT_DTYPE = jnp.bfloat16            # MXU-native input dtype (f32 accumulation)
_STREAM_DTYPE = jnp.bfloat16         # residual-stream / inter-kernel activation dtype
_LN_EPS = 1e-5


def _select_tiling():
    """Generation-aware tile / VMEM sizing (v5e/v6e: 128 MiB VMEM, v7x: 64 MiB)."""
    vmem = None
    try:
        info = pltpu.get_tpu_info()
        for attr in ("vmem_capacity_bytes", "vmem_bytes", "vmem_size_bytes"):
            v = getattr(info, attr, None)
            if isinstance(v, (int, np.integer)) and int(v) > 0:
                vmem = int(v)
                break
    except Exception:
        vmem = None
    if vmem is None:
        vmem = 64 * 1024 * 1024                       # conservative: assume v7x
    if vmem >= 100 * 1024 * 1024:                     # v5e / v6e (128 MiB VMEM)
        return 512, min(96 * 1024 * 1024, (vmem * 3) // 4), 24 * 1024 * 1024
    # v7x (64 MiB VMEM) or unknown
    return 256, min(48 * 1024 * 1024, (vmem * 3) // 4), 8 * 1024 * 1024


_MAX_ROW_TILE, _VMEM_LIMIT, _MAX_W_BYTES = _select_tiling()


def _cparams(n_axes):
    return pltpu.CompilerParams(
        dimension_semantics=("parallel",) * n_axes,
        vmem_limit_bytes=_VMEM_LIMIT)


def _row_tile(m):
    return m if m <= _MAX_ROW_TILE else _MAX_ROW_TILE


def _col_tile(k, n):
    # keep the whole (K, N) weight resident unless it is too big; 512 is a
    # 128-multiple so partial edge blocks stay legal.
    return n if (k * n * 2) <= _MAX_W_BYTES else 512


def _head_group(num_heads, dh):
    # group heads so a group's lane width (G*Dh) is a multiple of 128 (or the full C):
    # Dh=64 -> pairs of heads, Dh>=128 -> single heads, otherwise all heads together.
    if dh % 128 == 0:
        return 1
    if 128 % dh == 0 and num_heads % (128 // dh) == 0:
        return 128 // dh
    return num_heads


# ----------------------- in-kernel math helpers -----------------------

def _layernorm(x, g, b, eps):
    mean = jnp.mean(x, axis=-1, keepdims=True)
    var = jnp.mean(jnp.square(x - mean), axis=-1, keepdims=True)   # biased, torch LN
    return (x - mean) * lax.rsqrt(var + eps) * g + b


def _erf_f32(x):
    # f32 erf via the rational polynomial used by XLA/Eigen, built only from
    # mul/add/div so it always lowers in Mosaic.
    x = jnp.clip(x, -4.0, 4.0)
    x2 = x * x
    a = jnp.float32(-2.72614225801306e-10)
    a = a * x2 + jnp.float32(2.77068142495902e-08)
    a = a * x2 + jnp.float32(-2.10102402082508e-06)
    a = a * x2 + jnp.float32(-5.69250639462346e-05)
    a = a * x2 + jnp.float32(-7.34990630326855e-04)
    a = a * x2 + jnp.float32(-2.95459980854025e-03)
    a = a * x2 + jnp.float32(-1.60960333262415e-02)
    bta = jnp.float32(-1.45660718464996e-05)
    bta = bta * x2 + jnp.float32(-2.13374055278905e-04)
    bta = bta * x2 + jnp.float32(-1.68282697438203e-03)
    bta = bta * x2 + jnp.float32(-7.37332916720468e-03)
    bta = bta * x2 + jnp.float32(-1.42647390514189e-02)
    return x * a / bta


def _gelu_exact(x):
    # torch nn.GELU (exact erf formulation)
    return 0.5 * x * (1.0 + _erf_f32(x * 0.7071067811865476))


# ----------------------- Pallas kernels -----------------------

def _linear_kernel(x_ref, w_ref, b_ref, o_ref):
    acc = jnp.dot(x_ref[...].astype(_DOT_DTYPE), w_ref[...],
                  preferred_element_type=jnp.float32)
    o_ref[...] = (acc + b_ref[...]).astype(o_ref.dtype)


def _linear_residual_kernel(x_ref, w_ref, b_ref, r_ref, o_ref):
    acc = jnp.dot(x_ref[...].astype(_DOT_DTYPE), w_ref[...],
                  preferred_element_type=jnp.float32)
    o_ref[...] = (acc + b_ref[...] + r_ref[...].astype(jnp.float32)).astype(o_ref.dtype)


def _ln_linear_kernel(x_ref, g_ref, b_ref, w_ref, bias_ref, o_ref, *, eps):
    xn = _layernorm(x_ref[...].astype(jnp.float32), g_ref[...], b_ref[...], eps)
    acc = jnp.dot(xn.astype(_DOT_DTYPE), w_ref[...],
                  preferred_element_type=jnp.float32)
    o_ref[...] = (acc + bias_ref[...]).astype(o_ref.dtype)


def _ln_qkv_kernel(x_ref, g_ref, b_ref, w_ref, bias_ref, q_ref, k_ref, v_ref,
                   *, ng, gdh, eps):
    # fused LayerNorm + qkv projection; q/k/v written head-group-major so the
    # downstream attention kernel never has to re-slice heads across lane tiles.
    xn = _layernorm(x_ref[...].astype(jnp.float32), g_ref[...], b_ref[...], eps)
    acc = jnp.dot(xn.astype(_DOT_DTYPE), w_ref[...],
                  preferred_element_type=jnp.float32)
    qkv = (acc + bias_ref[...]).astype(q_ref.dtype)            # (tm, 3*ng*gdh) bf16
    c = ng * gdh
    for gi in range(ng):                                       # 128-aligned lane slices
        q_ref[gi] = qkv[:, gi * gdh:(gi + 1) * gdh]
        k_ref[gi] = qkv[:, c + gi * gdh:c + (gi + 1) * gdh]
        v_ref[gi] = qkv[:, 2 * c + gi * gdh:2 * c + (gi + 1) * gdh]


def _mhsa_kernel(q_ref, k_ref, v_ref, o_ref, *, heads_per_group, dh):
    # one (batch, head-group) step: q/k/v arrive bf16 with the attention scale
    # already folded into q; no f32 upcast, no concatenate, lane-dense output block.
    q = q_ref[0, 0]                                            # (T, G*Dh) bf16
    k = k_ref[0, 0]
    v = v_ref[0, 0]
    for h in range(heads_per_group):
        lo, hi = h * dh, (h + 1) * dh
        s = lax.dot_general(q[:, lo:hi], k[:, lo:hi], (((1,), (1,)), ((), ())),
                            preferred_element_type=jnp.float32)          # (T, T)
        s = s - jnp.max(s, axis=-1, keepdims=True)
        p = jnp.exp(s)
        inv = pl.reciprocal(jnp.sum(p, axis=-1, keepdims=True), approx=True)
        p = (p * inv).astype(_DOT_DTYPE)
        o = jnp.dot(p, v[:, lo:hi], preferred_element_type=jnp.float32)  # (T, Dh)
        o_ref[0, :, lo:hi] = o.astype(o_ref.dtype)


def _ln_mlp_residual_kernel(x_ref, g_ref, b_ref, w1_ref, b1_ref, w2_ref, b2_ref,
                            o_ref, *, eps):
    x = x_ref[...].astype(jnp.float32)
    xn = _layernorm(x, g_ref[...], b_ref[...], eps)
    h = jnp.dot(xn.astype(_DOT_DTYPE), w1_ref[...],
                preferred_element_type=jnp.float32) + b1_ref[...]
    h = _gelu_exact(h)                                     # in-kernel exact GELU
    y = jnp.dot(h.astype(_DOT_DTYPE), w2_ref[...],
                preferred_element_type=jnp.float32) + b2_ref[...]
    o_ref[...] = (x + y).astype(o_ref.dtype)


def _performer_kernel(kqv_ref, w_ref, pw_ref, pb_ref, o_ref, *, eps):
    # Token_performer.single_attn (+ out-proj + v skip) for one batch element.
    kqv = kqv_ref[0]                         # (T, 3E) bf16 — no whole-tensor f32 upcast
    e = kqv.shape[1] // 3
    k = kqv[:, 0:e]
    q = kqv[:, e:2 * e]
    v = kqv[:, 2 * e:3 * e]
    w = w_ref[...]                           # (m, E) bf16, single copy
    m = w.shape[0]
    inv_sqrt_m = 1.0 / float(np.sqrt(m))

    kd = 0.5 * jnp.sum(jnp.square(k.astype(jnp.float32)), axis=-1)[None, :]   # (1, T)
    qd = 0.5 * jnp.sum(jnp.square(q.astype(jnp.float32)), axis=-1,
                       keepdims=True)                                          # (T, 1)
    # phi(k)^T laid out (m, T): all contractions are over last dims -> no transpose.
    kp_t = jnp.exp(lax.dot_general(w, k, (((1,), (1,)), ((), ())),
                                   preferred_element_type=jnp.float32) - kd) * inv_sqrt_m
    qp = jnp.exp(lax.dot_general(q, w, (((1,), (1,)), ((), ())),
                                 preferred_element_type=jnp.float32) - qd) * inv_sqrt_m
    ksum = jnp.sum(kp_t, axis=-1, keepdims=True)                    # (m, 1)
    d = jnp.dot(qp, ksum, preferred_element_type=jnp.float32)       # (T, 1)
    kptv = jnp.dot(kp_t.astype(_DOT_DTYPE), v,
                   preferred_element_type=jnp.float32)              # (m, E)
    y = jnp.dot(qp.astype(_DOT_DTYPE), kptv.astype(_DOT_DTYPE),
                preferred_element_type=jnp.float32)                 # (T, E)
    y = y * pl.reciprocal(d + eps, approx=True)
    # output projection + skip connection on v (y = v + proj(attn))
    proj = jnp.dot(y.astype(_DOT_DTYPE), pw_ref[...],
                   preferred_element_type=jnp.float32) + pb_ref[...]
    o_ref[0] = (v.astype(jnp.float32) + proj).astype(o_ref.dtype)


# ----------------------- kernel wrappers -----------------------

def linear(x, w, b, *, out_dtype=_STREAM_DTYPE):
    *lead, K = x.shape
    N = w.shape[1]
    x2 = x.reshape(-1, K)
    M = x2.shape[0]
    tm, tn = _row_tile(M), _col_tile(K, N)
    grid = (pl.cdiv(N, tn), pl.cdiv(M, tm))   # N outer -> weight tile resident over rows
    out = pl.pallas_call(
        _linear_kernel,
        grid=grid,
        in_specs=[pl.BlockSpec((tm, K), lambda j, i: (i, 0)),
                  pl.BlockSpec((K, tn), lambda j, i: (0, j)),
                  pl.BlockSpec((1, tn), lambda j, i: (0, j))],
        out_specs=pl.BlockSpec((tm, tn), lambda j, i: (i, j)),
        out_shape=jax.ShapeDtypeStruct((M, N), out_dtype),
        compiler_params=_cparams(2),
    )(x2, w, b.reshape(1, N))
    return out.reshape(*lead, N)


def linear_residual(x, w, b, res, *, out_dtype=_STREAM_DTYPE):
    *lead, K = x.shape
    N = w.shape[1]
    x2 = x.reshape(-1, K)
    r2 = res.reshape(-1, N)
    M = x2.shape[0]
    tm, tn = _row_tile(M), _col_tile(K, N)
    grid = (pl.cdiv(N, tn), pl.cdiv(M, tm))
    out = pl.pallas_call(
        _linear_residual_kernel,
        grid=grid,
        in_specs=[pl.BlockSpec((tm, K), lambda j, i: (i, 0)),
                  pl.BlockSpec((K, tn), lambda j, i: (0, j)),
                  pl.BlockSpec((1, tn), lambda j, i: (0, j)),
                  pl.BlockSpec((tm, tn), lambda j, i: (i, j))],
        out_specs=pl.BlockSpec((tm, tn), lambda j, i: (i, j)),
        out_shape=jax.ShapeDtypeStruct((M, N), out_dtype),
        compiler_params=_cparams(2),
    )(x2, w, b.reshape(1, N), r2)
    return out.reshape(*lead, N)


def ln_linear(x, g, b, w, bias, *, eps=_LN_EPS, out_dtype=_STREAM_DTYPE):
    *lead, K = x.shape
    N = w.shape[1]
    x2 = x.reshape(-1, K)
    M = x2.shape[0]
    tm, tn = _row_tile(M), _col_tile(K, N)
    grid = (pl.cdiv(N, tn), pl.cdiv(M, tm))
    out = pl.pallas_call(
        functools.partial(_ln_linear_kernel, eps=eps),
        grid=grid,
        in_specs=[pl.BlockSpec((tm, K), lambda j, i: (i, 0)),
                  pl.BlockSpec((1, K), lambda j, i: (0, 0)),
                  pl.BlockSpec((1, K), lambda j, i: (0, 0)),
                  pl.BlockSpec((K, tn), lambda j, i: (0, j)),
                  pl.BlockSpec((1, tn), lambda j, i: (0, j))],
        out_specs=pl.BlockSpec((tm, tn), lambda j, i: (i, j)),
        out_shape=jax.ShapeDtypeStruct((M, N), out_dtype),
        compiler_params=_cparams(2),
    )(x2, g.reshape(1, K), b.reshape(1, K), w, bias.reshape(1, N))
    return out.reshape(*lead, N)


def ln_qkv(x, g, b, w, bias, *, num_heads, scale, eps=_LN_EPS,
           out_dtype=_STREAM_DTYPE):
    """Fused LayerNorm + qkv projection.

    Returns q, k, v each shaped (num_groups, B*T, group_heads*Dh) in bf16, with the
    attention scale folded into q (wrapper-time fold on the weight/bias only).
    """
    B, T, D = x.shape
    C3 = w.shape[1]
    C = C3 // 3
    dh = C // num_heads
    G = _head_group(num_heads, dh)
    ng = num_heads // G
    gdh = G * dh
    # fold the attention scale into the q third of the weight/bias (cheap: weights only)
    wq = (w[:, :C].astype(jnp.float32) * scale).astype(w.dtype)
    w_s = jnp.concatenate([wq, w[:, C:]], axis=1)
    b_s = jnp.concatenate([bias[:C].astype(jnp.float32) * scale,
                           bias[C:].astype(jnp.float32)])
    x2 = x.reshape(-1, D)
    M = x2.shape[0]
    tm = _row_tile(M)
    q, k, v = pl.pallas_call(
        functools.partial(_ln_qkv_kernel, ng=ng, gdh=gdh, eps=eps),
        grid=(pl.cdiv(M, tm),),
        in_specs=[pl.BlockSpec((tm, D), lambda i: (i, 0)),
                  pl.BlockSpec((1, D), lambda i: (0, 0)),
                  pl.BlockSpec((1, D), lambda i: (0, 0)),
                  pl.BlockSpec((D, C3), lambda i: (0, 0)),
                  pl.BlockSpec((1, C3), lambda i: (0, 0))],
        out_specs=[pl.BlockSpec((ng, tm, gdh), lambda i: (0, i, 0))] * 3,
        out_shape=[jax.ShapeDtypeStruct((ng, M, gdh), out_dtype)] * 3,
        compiler_params=_cparams(1),
    )(x2, g.reshape(1, D), b.reshape(1, D), w_s, b_s.reshape(1, C3))
    return q, k, v


def mhsa_grouped(q, k, v, *, batch, seq, num_heads, out_dtype=_STREAM_DTYPE):
    """Multi-head softmax attention from head-group-major q/k/v.

    q, k, v: (ng, B*T, G*Dh) bf16 (scale already folded into q).
    Output: lane-dense (B, T, C) in out_dtype.
    """
    ng, M, gdh = q.shape
    G = num_heads // ng
    dh = gdh // G
    C = num_heads * dh
    q4 = q.reshape(ng, batch, seq, gdh)
    k4 = k.reshape(ng, batch, seq, gdh)
    v4 = v.reshape(ng, batch, seq, gdh)
    spec_in = pl.BlockSpec((1, 1, seq, gdh), lambda bi, gi: (gi, bi, 0, 0))
    return pl.pallas_call(
        functools.partial(_mhsa_kernel, heads_per_group=G, dh=dh),
        grid=(batch, ng),
        in_specs=[spec_in, spec_in, spec_in],
        out_specs=pl.BlockSpec((1, seq, gdh), lambda bi, gi: (bi, 0, gi)),
        out_shape=jax.ShapeDtypeStruct((batch, seq, C), out_dtype),
        compiler_params=_cparams(2),
    )(q4, k4, v4)


def ln_mlp_residual(x, ln_g, ln_b, w1, b1, w2, b2, *, eps=_LN_EPS,
                    out_dtype=_STREAM_DTYPE):
    *lead, D = x.shape
    H = w1.shape[1]
    x2 = x.reshape(-1, D)                    # keep stream dtype (bf16); LN/GELU in f32
    M = x2.shape[0]
    tm = _row_tile(M)
    out = pl.pallas_call(
        functools.partial(_ln_mlp_residual_kernel, eps=eps),
        grid=(pl.cdiv(M, tm),),
        in_specs=[pl.BlockSpec((tm, D), lambda i: (i, 0)),
                  pl.BlockSpec((1, D), lambda i: (0, 0)),
                  pl.BlockSpec((1, D), lambda i: (0, 0)),
                  pl.BlockSpec((D, H), lambda i: (0, 0)),
                  pl.BlockSpec((1, H), lambda i: (0, 0)),
                  pl.BlockSpec((H, D), lambda i: (0, 0)),
                  pl.BlockSpec((1, D), lambda i: (0, 0))],
        out_specs=pl.BlockSpec((tm, D), lambda i: (i, 0)),
        out_shape=jax.ShapeDtypeStruct((M, D), out_dtype),
        compiler_params=_cparams(1),
    )(x2, ln_g.reshape(1, D), ln_b.reshape(1, D), w1, b1.reshape(1, H),
      w2, b2.reshape(1, D))
    return out.reshape(*lead, D)


def performer_attn(kqv, w_prm, proj_w, proj_b, *, eps=1e-8, out_dtype=_STREAM_DTYPE):
    # TODO(synk): optionally add a query-token grid axis for very large stage-1 token
    # counts on v7x (k/v kept whole per batch element).
    B, T, E3 = kqv.shape
    E = E3 // 3
    m = w_prm.shape[0]
    return pl.pallas_call(
        functools.partial(_performer_kernel, eps=eps),
        grid=(B,),
        in_specs=[pl.BlockSpec((1, T, E3), lambda i: (i, 0, 0)),
                  pl.BlockSpec((m, E), lambda i: (0, 0)),
                  pl.BlockSpec((E, E), lambda i: (0, 0)),
                  pl.BlockSpec((1, E), lambda i: (0, 0))],
        out_specs=pl.BlockSpec((1, T, E), lambda i: (i, 0, 0)),
        out_shape=jax.ShapeDtypeStruct((B, T, E), out_dtype),
        compiler_params=_cparams(1),
    )(kqv, w_prm.astype(_DOT_DTYPE), proj_w, proj_b.reshape(1, E))


# ----------------------- JAX glue (im2col, params, wiring) -----------------------

def unfold_3x3_s2_p1_tokens(x):
    # nn.Unfold(kernel_size=3, stride=2, padding=1) on NCHW input, emitted directly in
    # token-major (B, L, C*9) layout (torch channel ordering c*9 + ki*3 + kj).
    # TODO(synk): fold this gather into the following projection kernel (scalar-prefetched
    # row indices) to avoid materializing the 9x-expanded activation in HBM.
    B, C, H, W = x.shape
    xp = jnp.pad(x, ((0, 0), (0, 0), (1, 1), (1, 1)))
    Ho = (H + 2 - 3) // 2 + 1
    Wo = (W + 2 - 3) // 2 + 1
    cols = []
    for i in range(3):
        for j in range(3):
            cols.append(xp[:, :, i:i + 2 * Ho - 1:2, j:j + 2 * Wo - 1:2])  # (B,C,Ho,Wo)
    col = jnp.stack(cols, axis=2)                       # (B, C, 9, Ho, Wo)
    col = jnp.transpose(col, (0, 3, 4, 1, 2))           # (B, Ho, Wo, C, 9)
    return col.reshape(B, Ho * Wo, C * 9)               # (B, L, C*9)


def get_sinusoid_encoding(n_position, d_hid):
    pos = np.arange(n_position)[:, None].astype(np.float64)
    hid = np.arange(d_hid)[None, :]
    angle = pos / np.power(10000, 2 * (hid // 2) / d_hid)
    table = np.zeros((n_position, d_hid))
    table[:, 0::2] = np.sin(angle[:, 0::2])
    table[:, 1::2] = np.cos(angle[:, 1::2])
    return jnp.asarray(table[None], dtype=jnp.float32)   # (1, n_position, d_hid)


def trunc_normal_init(key, shape, std=0.02):
    return std * jax.random.truncated_normal(key, -2.0, 2.0, shape, jnp.float32)


def init_params(key, in_chans, token_dim, embed_dim, depth, num_heads,
                mlp_ratio, num_classes, num_patches):
    keys = iter(jax.random.split(key, 64))

    def lin(kin, kout, wdtype=_DOT_DTYPE):
        return {'w': trunc_normal_init(next(keys), (kin, kout)).astype(wdtype),
                'b': jnp.zeros((kout,), jnp.float32)}

    def ln(d):
        return {'g': jnp.ones((d,), jnp.float32), 'b': jnp.zeros((d,), jnp.float32)}

    dim_t = in_chans * 9
    m = int(token_dim * 0.5)
    # Token_performer w: orthogonal rows * sqrt(m) (matches the reference init).
    w_prm = (jax.nn.initializers.orthogonal()(next(keys), (m, token_dim), jnp.float32)
             * float(np.sqrt(m)))
    params = {
        't2t': {
            'norm1': ln(dim_t),
            'kqv': lin(dim_t, 3 * token_dim),
            'proj': lin(token_dim, token_dim),
            'norm2': ln(token_dim),
            'mlp_fc1': lin(token_dim, token_dim),
            'mlp_fc2': lin(token_dim, token_dim),
            'w_prm': w_prm,
            'project': lin(token_dim * 9, embed_dim),
        },
        'cls_token': trunc_normal_init(next(keys), (1, 1, embed_dim)),
        'pos_embed': get_sinusoid_encoding(num_patches + 1, embed_dim),
        'blocks': [],
        'norm': ln(embed_dim),
        'head': lin(embed_dim, num_classes, wdtype=jnp.float32),   # tiny: stays in XLA
    }
    hidden = int(embed_dim * mlp_ratio)
    for _ in range(depth):
        params['blocks'].append({
            'norm1': ln(embed_dim),
            # qkv_bias=False -> zero bias (mathematically identical)
            'qkv': lin(embed_dim, 3 * embed_dim),
            'proj': lin(embed_dim, embed_dim),
            'norm2': ln(embed_dim),
            'fc1': lin(embed_dim, hidden),
            'fc2': lin(hidden, embed_dim),
        })
    return params


def token_performer(x, p):
    # Token_performer.forward (eval mode: dropouts are identity).
    kqv = ln_linear(x, p['norm1']['g'], p['norm1']['b'],
                    p['kqv']['w'], p['kqv']['b'])                    # fused LN + kqv (bf16)
    y = performer_attn(kqv, p['w_prm'], p['proj']['w'], p['proj']['b'])  # attn+proj+v-skip
    return ln_mlp_residual(y, p['norm2']['g'], p['norm2']['b'],
                           p['mlp_fc1']['w'], p['mlp_fc1']['b'],
                           p['mlp_fc2']['w'], p['mlp_fc2']['b'])     # fused LN+MLP+res


def t2t_module(x, p):
    # soft_split1 (Unfold k3 s2 p1) -> performer -> soft_split2 -> project
    x = unfold_3x3_s2_p1_tokens(x)                # (B, L1, C*9)
    x = token_performer(x, p)                     # (B, L1, token_dim) bf16
    B, L1, C = x.shape
    side = int(np.sqrt(L1))
    x = jnp.transpose(x, (0, 2, 1)).reshape(B, C, side, side)
    x = unfold_3x3_s2_p1_tokens(x)                # (B, L2, token_dim*9)
    x = linear(x, p['project']['w'], p['project']['b'])   # (B, L2, embed_dim) bf16
    return x


def block_forward(x, p, num_heads):
    B, T, C = x.shape
    scale = (C // num_heads) ** -0.5
    q, k, v = ln_qkv(x, p['norm1']['g'], p['norm1']['b'],
                     p['qkv']['w'], p['qkv']['b'],
                     num_heads=num_heads, scale=scale)       # LN + qkv, head-group-major
    attn = mhsa_grouped(q, k, v, batch=B, seq=T, num_heads=num_heads)  # (B,T,C) bf16
    x = linear_residual(attn, p['proj']['w'], p['proj']['b'], x)       # proj + residual
    x = ln_mlp_residual(x, p['norm2']['g'], p['norm2']['b'],
                        p['fc1']['w'], p['fc1']['b'],
                        p['fc2']['w'], p['fc2']['b'])        # fused LN+fc1+GELU+fc2+res
    return x


def t2t_vit_forward(x, params, num_heads):
    B = x.shape[0]
    x = t2t_module(x, params['t2t'])                           # (B, num_patches, D) bf16
    D = x.shape[-1]
    cls = jnp.broadcast_to(params['cls_token'], (B, 1, D)).astype(jnp.float32)
    x = jnp.concatenate([cls, x.astype(jnp.float32)], axis=1)  # (B, num_patches+1, D)
    x = (x + params['pos_embed']).astype(_STREAM_DTYPE)        # pos_drop p=0 -> identity
    for bp in params['blocks']:
        x = block_forward(x, bp, num_heads)
    # Only the cls token feeds the head: slice first, then do the tiny LayerNorm +
    # head projection in plain XLA (not worth a Pallas launch at (B, D)).
    cls_tok = x[:, 0].astype(jnp.float32)                      # (B, D)
    mean = jnp.mean(cls_tok, axis=-1, keepdims=True)
    var = jnp.mean(jnp.square(cls_tok - mean), axis=-1, keepdims=True)
    cls_n = (cls_tok - mean) * lax.rsqrt(var + _LN_EPS) * params['norm']['g'] \
            + params['norm']['b']
    return cls_n @ params['head']['w'] + params['head']['b']   # (B, num_classes)


if __name__ == "__main__":
    key = jax.random.PRNGKey(0)
    k_params, k_x = jax.random.split(key)

    # small synthetic config: a 16x16 input gives num_patches=(16//4)**2=16 after the
    # two stride-2 unfolds (same structure as img_size=224 -> 112x112 -> 56x56).
    B, C, H, W = 2, 3, 16, 16
    token_dim, embed_dim, depth, num_heads = 16, 32, 2, 4
    mlp_ratio, num_classes = 4.0, 10
    num_patches = (H // 4) * (W // 4)   # 16

    params = init_params(k_params, in_chans=C, token_dim=token_dim,
                         embed_dim=embed_dim, depth=depth, num_heads=num_heads,
                         mlp_ratio=mlp_ratio, num_classes=num_classes,
                         num_patches=num_patches)

    x = jax.random.normal(k_x, (B, C, H, W), jnp.float32)

    fwd = jax.jit(functools.partial(t2t_vit_forward, num_heads=num_heads))
    out = fwd(x, params)
    out = jax.block_until_ready(out)
    assert out.shape == (B, num_classes), out.shape
    assert bool(jnp.all(jnp.isfinite(out)))
    print("KERNEL_OK")
</pallas_src>

<mosaic_0001>
module attributes {stable_mosaic.version = 11 : i64} {
  func.func @_ln_linear_kernel(%arg0: i32, %arg1: i32, %arg2: memref<128x27xf32, #tpu.memory_space<vmem>>, %arg3: memref<1x27xf32, #tpu.memory_space<vmem>>, %arg4: memref<1x27xf32, #tpu.memory_space<vmem>>, %arg5: memref<27x48xbf16, #tpu.memory_space<vmem>>, %arg6: memref<1x48xf32, #tpu.memory_space<vmem>>, %arg7: memref<128x48xbf16, #tpu.memory_space<vmem>>) attributes {dimension_semantics = [#tpu.dimension_semantics<parallel>, #tpu.dimension_semantics<parallel>], iteration_bounds = array<i64: 1, 1>, scalar_prefetch = 0 : i64, scratch_operands = 0 : i64, tpu.core_type = #tpu.core_type<tc>, window_params = [{transform_indices = @transform_0, window_bounds = array<i64: 128, 27>}, {pipeline_mode = #tpu.pipeline_mode<synchronous>, transform_indices = @transform_1, window_bounds = array<i64: 1, 27>}, {pipeline_mode = #tpu.pipeline_mode<synchronous>, transform_indices = @transform_2, window_bounds = array<i64: 1, 27>}, {transform_indices = @transform_3, window_bounds = array<i64: 27, 48>}, {transform_indices = @transform_4, window_bounds = array<i64: 1, 48>}, {transform_indices = @transform_5, window_bounds = array<i64: 128, 48>}]} {
    %c0 = arith.constant 0 : index
    %c0_0 = arith.constant 0 : index
    %0 = vector.load %arg2[%c0, %c0_0] : memref<128x27xf32, #tpu.memory_space<vmem>>, vector<128x27xf32>
    %c0_1 = arith.constant 0 : index
    %c0_2 = arith.constant 0 : index
    %1 = vector.load %arg3[%c0_1, %c0_2] : memref<1x27xf32, #tpu.memory_space<vmem>>, vector<1x27xf32>
    %c0_3 = arith.constant 0 : index
    %c0_4 = arith.constant 0 : index
    %2 = vector.load %arg4[%c0_3, %c0_4] : memref<1x27xf32, #tpu.memory_space<vmem>>, vector<1x27xf32>
    %cst = arith.constant dense<0.000000e+00> : vector<128xf32>
    %3 = vector.multi_reduction <add>, %0, %cst [1] : vector<128x27xf32> to vector<128xf32>
    %4 = vector.shape_cast %3 : vector<128xf32> to vector<128x1xf32>
    %cst_5 = arith.constant 2.700000e+01 : f32
    %5 = vector.broadcast %cst_5 : f32 to vector<128x1xf32>
    %6 = arith.divf %4, %5 : vector<128x1xf32>
    %7 = vector.broadcast %6 : vector<128x1xf32> to vector<128x27xf32>
    %8 = arith.subf %0, %7 : vector<128x27xf32>
    %9 = arith.mulf %8, %8 : vector<128x27xf32>
    %cst_6 = arith.constant dense<0.000000e+00> : vector<128xf32>
    %10 = vector.multi_reduction <add>, %9, %cst_6 [1] : vector<128x27xf32> to vector<128xf32>
    %11 = vector.shape_cast %10 : vector<128xf32> to vector<128x1xf32>
    %cst_7 = arith.constant 2.700000e+01 : f32
    %12 = vector.broadcast %cst_7 : f32 to vector<128x1xf32>
    %13 = arith.divf %11, %12 : vector<128x1xf32>
    %14 = vector.broadcast %6 : vector<128x1xf32> to vector<128x27xf32>
    %15 = arith.subf %0, %14 : vector<128x27xf32>
    %cst_8 = arith.constant 9.99999974E-6 : f32
    %16 = vector.broadcast %cst_8 : f32 to vector<128x1xf32>
    %17 = arith.addf %13, %16 : vector<128x1xf32>
    %18 = math.rsqrt %17 : vector<128x1xf32>
    %19 = vector.broadcast %18 : vector<128x1xf32> to vector<128x27xf32>
    %20 = arith.mulf %15, %19 : vector<128x27xf32>
    %21 = vector.broadcast %1 : vector<1x27xf32> to vector<128x27xf32>
    %22 = arith.mulf %20, %21 : vector<128x27xf32>
    %23 = vector.broadcast %2 : vector<1x27xf32> to vector<128x27xf32>
    %24 = arith.addf %22, %23 : vector<128x27xf32>
    %25 = arith.truncf %24 : vector<128x27xf32> to vector<128x27xbf16>
    %c0_9 = arith.constant 0 : index
    %c0_10 = arith.constant 0 : index
    %26 = vector.load %arg5[%c0_9, %c0_10] : memref<27x48xbf16, #tpu.memory_space<vmem>>, vector<27x48xbf16>
    %cst_11 = arith.constant dense<0.000000e+00> : vector<128x48xf32>
    %27 = tpu.matmul %25, %26, %cst_11 {dimension_numbers = #tpu.dot_dimension_numbers<[1], [0], [0], [1], [0, 0, 1, 1], [], []>} : vector<128x27xbf16>, vector<27x48xbf16>, vector<128x48xf32> -> vector<128x48xf32>
    %c0_12 = arith.constant 0 : index
    %c0_13 = arith.constant 0 : index
    %28 = vector.load %arg6[%c0_12, %c0_13] : memref<1x48xf32, #tpu.memory_space<vmem>>, vector<1x48xf32>
    %29 = vector.broadcast %28 : vector<1x48xf32> to vector<128x48xf32>
    %30 = arith.addf %27, %29 : vector<128x48xf32>
    %31 = arith.truncf %30 : vector<128x48xf32> to vector<128x48xbf16>
    %c0_14 = arith.constant 0 : index
    %c0_15 = arith.constant 0 : index
    %32 = vector.load %arg7[%c0_14, %c0_15] : memref<128x48xbf16, #tpu.memory_space<vmem>>, vector<128x48xbf16>
    tpu.vector_store %arg7[%c0_14, %c0_15], %31 {strides = array<i32>} : memref<128x48xbf16, #tpu.memory_space<vmem>>, vector<128x48xbf16>,
    return
  }
  func.func @transform_0(%arg0: i32, %arg1: i32) -> (i32, i32) {
    %c0_i32 = arith.constant 0 : i32
    %c0_i32_0 = arith.constant 0 : i32
    return %arg1, %c0_i32 : i32, i32
  }
  func.func @transform_1(%arg0: i32, %arg1: i32) -> (i32, i32) {
    %c0_i32 = arith.constant 0 : i32
    %c0_i32_0 = arith.constant 0 : i32
    %c0_i32_1 = arith.constant 0 : i32
    return %c0_i32, %c0_i32_0 : i32, i32
  }
  func.func @transform_2(%arg0: i32, %arg1: i32) -> (i32, i32) {
    %c0_i32 = arith.constant 0 : i32
    %c0_i32_0 = arith.constant 0 : i32
    %c0_i32_1 = arith.constant 0 : i32
    return %c0_i32, %c0_i32_0 : i32, i32
  }
  func.func @transform_3(%arg0: i32, %arg1: i32) -> (i32, i32) {
    %c0_i32 = arith.constant 0 : i32
    %c0_i32_0 = arith.constant 0 : i32
    return %c0_i32, %arg0 : i32, i32
  }
  func.func @transform_4(%arg0: i32, %arg1: i32) -> (i32, i32) {
    %c0_i32 = arith.constant 0 : i32
    %c0_i32_0 = arith.constant 0 : i32
    return %c0_i32, %arg0 : i32, i32
  }
  func.func @transform_5(%arg0: i32, %arg1: i32) -> (i32, i32) {
    %c0_i32 = arith.constant 0 : i32
    return %arg1, %arg0 : i32, i32
  }
}

module attributes {stable_mosaic.version = 11 : i64} {
  func.func @_ln_mlp_residual_kernel(%arg0: i32, %arg1: memref<128x16xbf16, #tpu.memory_space<vmem>>, %arg2: memref<1x16xf32, #tpu.memory_space<vmem>>, %arg3: memref<1x16xf32, #tpu.memory_space<vmem>>, %arg4: memref<16x16xbf16, #tpu.memory_space<vmem>>, %arg5: memref<1x16xf32, #tpu.memory_space<vmem>>, %arg6: memref<16x16xbf16, #tpu.memory_space<vmem>>, %arg7: memref<1x16xf32, #tpu.memory_space<vmem>>, %arg8: memref<128x16xbf16, #tpu.memory_space<vmem>>) attributes {dimension_semantics = [#tpu.dimension_semantics<parallel>], iteration_bounds = array<i64: 1>, scalar_prefetch = 0 : i64, scratch_operands = 0 : i64, tpu.core_type = #tpu.core_type<tc>, window_params = [{transform_indices = @transform_0, window_bounds = array<i64: 128, 16>}, {pipeline_mode = #tpu.pipeline_mode<synchronous>, transform_indices = @transform_1, window_bounds = array<i64: 1, 16>}, {pipeline_mode = #tpu.pipeline_mode<synchronous>, transform_indices = @transform_2, window_bounds = array<i64: 1, 16>}, {pipeline_mode = #tpu.pipeline_mode<synchronous>, transform_indices = @transform_3, window_bounds = array<i64: 16, 16>}, {pipeline_mode = #tpu.pipeline_mode<synchronous>, transform_indices = @transform_4, window_bounds = array<i64: 1, 16>}, {pipeline_mode = #tpu.pipeline_mode<synchronous>, transform_indices = @transform_5, window_bounds = array<i64: 16, 16>}, {pipeline_mode = #tpu.pipeline_mode<synchronous>, transform_indices = @transform_6, window_bounds = array<i64: 1, 16>}, {transform_indices = @transform_7, window_bounds = array<i64: 128, 16>}]} {
    %c0 = arith.constant 0 : index
    %c0_0 = arith.constant 0 : index
    %0 = vector.load %arg1[%c0, %c0_0] : memref<128x16xbf16, #tpu.memory_space<vmem>>, vector<128x16xbf16>
    %1 = arith.extf %0 : vector<128x16xbf16> to vector<128x16xf32>
    %c0_1 = arith.constant 0 : index
    %c0_2 = arith.constant 0 : index
    %2 = vector.load %arg2[%c0_1, %c0_2] : memref<1x16xf32, #tpu.memory_space<vmem>>, vector<1x16xf32>
    %c0_3 = arith.constant 0 : index
    %c0_4 = arith.constant 0 : index
    %3 = vector.load %arg3[%c0_3, %c0_4] : memref<1x16xf32, #tpu.memory_space<vmem>>, vector<1x16xf32>
    %cst = arith.constant dense<0.000000e+00> : vector<128xf32>
    %4 = vector.multi_reduction <add>, %1, %cst [1] : vector<128x16xf32> to vector<128xf32>
    %5 = vector.shape_cast %4 : vector<128xf32> to vector<128x1xf32>
    %cst_5 = arith.constant 1.600000e+01 : f32
    %6 = vector.broadcast %cst_5 : f32 to vector<128x1xf32>
    %7 = arith.divf %5, %6 : vector<128x1xf32>
    %8 = vector.broadcast %7 : vector<128x1xf32> to vector<128x16xf32>
    %9 = arith.subf %1, %8 : vector<128x16xf32>
    %10 = arith.mulf %9, %9 : vector<128x16xf32>
    %cst_6 = arith.constant dense<0.000000e+00> : vector<128xf32>
    %11 = vector.multi_reduction <add>, %10, %cst_6 [1] : vector<128x16xf32> to vector<128xf32>
    %12 = vector.shape_cast %11 : vector<128xf32> to vector<128x1xf32>
    %cst_7 = arith.constant 1.600000e+01 : f32
    %13 = vector.broadcast %cst_7 : f32 to vector<128x1xf32>
    %14 = arith.divf %12, %13 : vector<128x1xf32>
    %15 = vector.broadcast %7 : vector<128x1xf32> to vector<128x16xf32>
    %16 = arith.subf %1, %15 : vector<128x16xf32>
    %cst_8 = arith.constant 9.99999974E-6 : f32
    %17 = vector.broadcast %cst_8 : f32 to vector<128x1xf32>
    %18 = arith.addf %14, %17 : vector<128x1xf32>
    %19 = math.rsqrt %18 : vector<128x1xf32>
    %20 = vector.broadcast %19 : vector<128x1xf32> to vector<128x16xf32>
    %21 = arith.mulf %16, %20 : vector<128x16xf32>
    %22 = vector.broadcast %2 : vector<1x16xf32> to vector<128x16xf32>
    %23 = arith.mulf %21, %22 : vector<128x16xf32>
    %24 = vector.broadcast %3 : vector<1x16xf32> to vector<128x16xf32>
    %25 = arith.addf %23, %24 : vector<128x16xf32>
    %26 = arith.truncf %25 : vector<128x16xf32> to vector<128x16xbf16>
    %c0_9 = arith.constant 0 : index
    %c0_10 = arith.constant 0 : index
    %27 = vector.load %arg4[%c0_9, %c0_10] : memref<16x16xbf16, #tpu.memory_space<vmem>>, vector<16x16xbf16>
    %cst_11 = arith.constant dense<0.000000e+00> : vector<128x16xf32>
    %28 = tpu.matmul %26, %27, %cst_11 {dimension_numbers = #tpu.dot_dimension_numbers<[1], [0], [0], [1], [0, 0, 1, 1], [], []>} : vector<128x16xbf16>, vector<16x16xbf16>, vector<128x16xf32> -> vector<128x16xf32>
    %c0_12 = arith.constant 0 : index
    %c0_13 = arith.constant 0 : index
    %29 = vector.load %arg5[%c0_12, %c0_13] : memref<1x16xf32, #tpu.memory_space<vmem>>, vector<1x16xf32>
    %30 = vector.broadcast %29 : vector<1x16xf32> to vector<128x16xf32>
    %31 = arith.addf %28, %30 : vector<128x16xf32>
    %cst_14 = arith.constant 5.000000e-01 : f32
    %32 = vector.broadcast %cst_14 : f32 to vector<128x16xf32>
    %33 = arith.mulf %32, %31 : vector<128x16xf32>
    %cst_15 = arith.constant 0.707106769 : f32
    %34 = vector.broadcast %cst_15 : f32 to vector<128x16xf32>
    %35 = arith.mulf %31, %34 : vector<128x16xf32>
    %cst_16 = arith.constant -4.000000e+00 : f32
    %cst_17 = arith.constant 4.000000e+00 : f32
    %36 = vector.broadcast %cst_16 : f32 to vector<128x16xf32>
    %37 = arith.maximumf %36, %35 : vector<128x16xf32>
    %38 = vector.broadcast %cst_17 : f32 to vector<128x16xf32>
    %39 = arith.minimumf %38, %37 : vector<128x16xf32>
    %40 = arith.mulf %39, %39 : vector<128x16xf32>
    %cst_18 = arith.constant -2.72614237E-10 : f32
    %41 = vector.broadcast %cst_18 : f32 to vector<128x16xf32>
    %42 = arith.mulf %41, %40 : vector<128x16xf32>
    %cst_19 = arith.constant 2.77068146E-8 : f32
    %43 = vector.broadcast %cst_19 : f32 to vector<128x16xf32>
    %44 = arith.addf %42, %43 : vector<128x16xf32>
    %45 = arith.mulf %44, %40 : vector<128x16xf32>
    %cst_20 = arith.constant -2.10102394E-6 : f32
    %46 = vector.broadcast %cst_20 : f32 to vector<128x16xf32>
    %47 = arith.addf %45, %46 : vector<128x16xf32>
    %48 = arith.mulf %47, %40 : vector<128x16xf32>
    %cst_21 = arith.constant -5.69250624E-5 : f32
    %49 = vector.broadcast %cst_21 : f32 to vector<128x16xf32>
    %50 = arith.addf %48, %49 : vector<128x16xf32>
    %51 = arith.mulf %50, %40 : vector<128x16xf32>
    %cst_22 = arith.constant -7.34990637E-4 : f32
    %52 = vector.broadcast %cst_22 : f32 to vector<128x16xf32>
    %53 = arith.addf %51, %52 : vector<128x16xf32>
    %54 = arith.mulf %53, %40 : vector<128x16xf32>
    %cst_23 = arith.constant -2.954600e-03 : f32
    %55 = vector.broadcast %cst_23 : f32 to vector<128x16xf32>
    %56 = arith.addf %54, %55 : vector<128x16xf32>
    %57 = arith.mulf %56, %40 : vector<128x16xf32>
    %cst_24 = arith.constant -0.0160960332 : f32
    %58 = vector.broadcast %cst_24 : f32 to vector<128x16xf32>
    %59 = arith.addf %57, %58 : vector<128x16xf32>
    %cst_25 = arith.constant -1.45660715E-5 : f32
    %60 = vector.broadcast %cst_25 : f32 to vector<128x16xf32>
    %61 = arith.mulf %60, %40 : vector<128x16xf32>
    %cst_26 = arith.constant -2.13374049E-4 : f32
    %62 = vector.broadcast %cst_26 : f32 to vector<128x16xf32>
    %63 = arith.addf %61, %62 : vector<128x16xf32>
    %64 = arith.mulf %63, %40 : vector<128x16xf32>
    %cst_27 = arith.constant -0.00168282702 : f32
    %65 = vector.broadcast %cst_27 : f32 to vector<128x16xf32>
    %66 = arith.addf %64, %65 : vector<128x16xf32>
    %67 = arith.mulf %66, %40 : vector<128x16xf32>
    %cst_28 = arith.constant -0.00737332925 : f32
    %68 = vector.broadcast %cst_28 : f32 to vector<128x16xf32>
    %69 = arith.addf %67, %68 : vector<128x16xf32>
    %70 = arith.mulf %69, %40 : vector<128x16xf32>
    %cst_29 = arith.constant -0.0142647391 : f32
    %71 = vector.broadcast %cst_29 : f32 to vector<128x16xf32>
    %72 = arith.addf %70, %71 : vector<128x16xf32>
    %73 = arith.mulf %39, %59 : vector<128x16xf32>
    %74 = arith.divf %73, %72 : vector<128x16xf32>
    %cst_30 = arith.constant 1.000000e+00 : f32
    %75 = vector.broadcast %cst_30 : f32 to vector<128x16xf32>
    %76 = arith.addf %75, %74 : vector<128x16xf32>
    %77 = arith.mulf %33, %76 : vector<128x16xf32>
    %78 = arith.truncf %77 : vector<128x16xf32> to vector<128x16xbf16>
    %c0_31 = arith.constant 0 : index
    %c0_32 = arith.constant 0 : index
    %79 = vector.load %arg6[%c0_31, %c0_32] : memref<16x16xbf16, #tpu.memory_space<vmem>>, vector<16x16xbf16>
    %cst_33 = arith.constant dense<0.000000e+00> : vector<128x16xf32>
    %80 = tpu.matmul %78, %79, %cst_33 {dimension_numbers = #tpu.dot_dimension_numbers<[1], [0], [0], [1], [0, 0, 1, 1], [], []>} : vector<128x16xbf16>, vector<16x16xbf16>, vector<128x16xf32> -> vector<128x16xf32>
    %c0_34 = arith.constant 0 : index
    %c0_35 = arith.constant 0 : index
    %81 = vector.load %arg7[%c0_34, %c0_35] : memref<1x16xf32, #tpu.memory_space<vmem>>, vector<1x16xf32>
    %82 = vector.broadcast %81 : vector<1x16xf32> to vector<128x16xf32>
    %83 = arith.addf %80, %82 : vector<128x16xf32>
    %84 = arith.addf %1, %83 : vector<128x16xf32>
    %85 = arith.truncf %84 : vector<128x16xf32> to vector<128x16xbf16>
    %c0_36 = arith.constant 0 : index
    %c0_37 = arith.constant 0 : index
    %86 = vector.load %arg8[%c0_36, %c0_37] : memref<128x16xbf16, #tpu.memory_space<vmem>>, vector<128x16xbf16>
    tpu.vector_store %arg8[%c0_36, %c0_37], %85 {strides = array<i32>} : memref<128x16xbf16, #tpu.memory_space<vmem>>, vector<128x16xbf16>,
    return
  }
  func.func @transform_0(%arg0: i32) -> (i32, i32) {
    %c0_i32 = arith.constant 0 : i32
    %c0_i32_0 = arith.constant 0 : i32
    return %arg0, %c0_i32 : i32, i32
  }
  func.func @transform_1(%arg0: i32) -> (i32, i32) {
    %c0_i32 = arith.constant 0 : i32
    %c0_i32_0 = arith.constant 0 : i32
    %c0_i32_1 = arith.constant 0 : i32
    return %c0_i32, %c0_i32_0 : i32, i32
  }
  func.func @transform_2(%arg0: i32) -> (i32, i32) {
    %c0_i32 = arith.constant 0 : i32
    %c0_i32_0 = arith.constant 0 : i32
    %c0_i32_1 = arith.constant 0 : i32
    return %c0_i32, %c0_i32_0 : i32, i32
  }
  func.func @transform_3(%arg0: i32) -> (i32, i32) {
    %c0_i32 = arith.constant 0 : i32
    %c0_i32_0 = arith.constant 0 : i32
    %c0_i32_1 = arith.constant 0 : i32
    return %c0_i32, %c0_i32_0 : i32, i32
  }
  func.func @transform_4(%arg0: i32) -> (i32, i32) {
    %c0_i32 = arith.constant 0 : i32
    %c0_i32_0 = arith.constant 0 : i32
    %c0_i32_1 = arith.constant 0 : i32
    return %c0_i32, %c0_i32_0 : i32, i32
  }
  func.func @transform_5(%arg0: i32) -> (i32, i32) {
    %c0_i32 = arith.constant 0 : i32
    %c0_i32_0 = arith.constant 0 : i32
    %c0_i32_1 = arith.constant 0 : i32
    return %c0_i32, %c0_i32_0 : i32, i32
  }
  func.func @transform_6(%arg0: i32) -> (i32, i32) {
    %c0_i32 = arith.constant 0 : i32
    %c0_i32_0 = arith.constant 0 : i32
    %c0_i32_1 = arith.constant 0 : i32
    return %c0_i32, %c0_i32_0 : i32, i32
  }
  func.func @transform_7(%arg0: i32) -> (i32, i32) {
    %c0_i32 = arith.constant 0 : i32
    %c0_i32_0 = arith.constant 0 : i32
    return %arg0, %c0_i32 : i32, i32
  }
}

module attributes {stable_mosaic.version = 11 : i64} {
  func.func @_performer_kernel(%arg0: i32, %arg1: memref<1x64x48xbf16, #tpu.memory_space<vmem>>, %arg2: memref<8x16xbf16, #tpu.memory_space<vmem>>, %arg3: memref<16x16xbf16, #tpu.memory_space<vmem>>, %arg4: memref<1x16xf32, #tpu.memory_space<vmem>>, %arg5: memref<1x64x16xbf16, #tpu.memory_space<vmem>>) attributes {dimension_semantics = [#tpu.dimension_semantics<parallel>], iteration_bounds = array<i64: 2>, scalar_prefetch = 0 : i64, scratch_operands = 0 : i64, tpu.core_type = #tpu.core_type<tc>, window_params = [{transform_indices = @transform_0, window_bounds = array<i64: 1, 64, 48>}, {pipeline_mode = #tpu.pipeline_mode<synchronous>, transform_indices = @transform_1, window_bounds = array<i64: 8, 16>}, {pipeline_mode = #tpu.pipeline_mode<synchronous>, transform_indices = @transform_2, window_bounds = array<i64: 16, 16>}, {pipeline_mode = #tpu.pipeline_mode<synchronous>, transform_indices = @transform_3, window_bounds = array<i64: 1, 16>}, {transform_indices = @transform_4, window_bounds = array<i64: 1, 64, 16>}]} {
    %c0 = arith.constant 0 : index
    %c0_0 = arith.constant 0 : index
    %c0_1 = arith.constant 0 : index
    %0 = vector.load %arg1[%c0, %c0_0, %c0_1] : memref<1x64x48xbf16, #tpu.memory_space<vmem>>, vector<1x64x48xbf16>
    %1 = vector.shape_cast %0 : vector<1x64x48xbf16> to vector<64x48xbf16>
    %2 = vector.extract_strided_slice %1 {offsets = [0, 0], sizes = [64, 16], strides = [1, 1]} : vector<64x48xbf16> to vector<64x16xbf16>
    %3 = vector.extract_strided_slice %1 {offsets = [0, 16], sizes = [64, 16], strides = [1, 1]} : vector<64x48xbf16> to vector<64x16xbf16>
    %4 = vector.extract_strided_slice %1 {offsets = [0, 32], sizes = [64, 16], strides = [1, 1]} : vector<64x48xbf16> to vector<64x16xbf16>
    %c0_2 = arith.constant 0 : index
    %c0_3 = arith.constant 0 : index
    %5 = vector.load %arg2[%c0_2, %c0_3] : memref<8x16xbf16, #tpu.memory_space<vmem>>, vector<8x16xbf16>
    %6 = arith.extf %2 : vector<64x16xbf16> to vector<64x16xf32>
    %7 = arith.mulf %6, %6 : vector<64x16xf32>
    %cst = arith.constant dense<0.000000e+00> : vector<64xf32>
    %8 = vector.multi_reduction <add>, %7, %cst [1] : vector<64x16xf32> to vector<64xf32>
    %9 = vector.shape_cast %8 : vector<64xf32> to vector<1x64xf32>
    %cst_4 = arith.constant 5.000000e-01 : f32
    %10 = vector.broadcast %cst_4 : f32 to vector<1x64xf32>
    %11 = arith.mulf %10, %9 : vector<1x64xf32>
    %12 = arith.extf %3 : vector<64x16xbf16> to vector<64x16xf32>
    %13 = arith.mulf %12, %12 : vector<64x16xf32>
    %cst_5 = arith.constant dense<0.000000e+00> : vector<64xf32>
    %14 = vector.multi_reduction <add>, %13, %cst_5 [1] : vector<64x16xf32> to vector<64xf32>
    %15 = vector.shape_cast %14 : vector<64xf32> to vector<64x1xf32>
    %cst_6 = arith.constant 5.000000e-01 : f32
    %16 = vector.broadcast %cst_6 : f32 to vector<64x1xf32>
    %17 = arith.mulf %16, %15 : vector<64x1xf32>
    %cst_7 = arith.constant dense<0.000000e+00> : vector<8x64xf32>
    %18 = tpu.matmul %5, %2, %cst_7 {dimension_numbers = #tpu.dot_dimension_numbers<[1], [1], [0], [0], [0, 0, 1, 0], [], []>} : vector<8x16xbf16>, vector<64x16xbf16>, vector<8x64xf32> -> vector<8x64xf32>
    %19 = vector.broadcast %11 : vector<1x64xf32> to vector<8x64xf32>
    %20 = arith.subf %18, %19 : vector<8x64xf32>
    %21 = math.exp %20 : vector<8x64xf32>
    %cst_8 = arith.constant 0.353553385 : f32
    %22 = vector.broadcast %cst_8 : f32 to vector<8x64xf32>
    %23 = arith.mulf %21, %22 : vector<8x64xf32>
    %cst_9 = arith.constant dense<0.000000e+00> : vector<64x8xf32>
    %24 = tpu.matmul %3, %5, %cst_9 {dimension_numbers = #tpu.dot_dimension_numbers<[1], [1], [0], [0], [0, 0, 1, 0], [], []>} : vector<64x16xbf16>, vector<8x16xbf16>, vector<64x8xf32> -> vector<64x8xf32>
    %25 = vector.broadcast %17 : vector<64x1xf32> to vector<64x8xf32>
    %26 = arith.subf %24, %25 : vector<64x8xf32>
    %27 = math.exp %26 : vector<64x8xf32>
    %cst_10 = arith.constant 0.353553385 : f32
    %28 = vector.broadcast %cst_10 : f32 to vector<64x8xf32>
    %29 = arith.mulf %27, %28 : vector<64x8xf32>
    %cst_11 = arith.constant dense<0.000000e+00> : vector<8xf32>
    %30 = vector.multi_reduction <add>, %23, %cst_11 [1] : vector<8x64xf32> to vector<8xf32>
    %31 = vector.shape_cast %30 : vector<8xf32> to vector<8x1xf32>
    %cst_12 = arith.constant dense<0.000000e+00> : vector<64x1xf32>
    %32 = tpu.matmul %29, %31, %cst_12 {dimension_numbers = #tpu.dot_dimension_numbers<[1], [0], [0], [1], [0, 0, 1, 1], [], []>} : vector<64x8xf32>, vector<8x1xf32>, vector<64x1xf32> -> vector<64x1xf32>
    %33 = arith.truncf %23 : vector<8x64xf32> to vector<8x64xbf16>
    %cst_13 = arith.constant dense<0.000000e+00> : vector<8x16xf32>
    %34 = tpu.matmul %33, %4, %cst_13 {dimension_numbers = #tpu.dot_dimension_numbers<[1], [0], [0], [1], [0, 0, 1, 1], [], []>} : vector<8x64xbf16>, vector<64x16xbf16>, vector<8x16xf32> -> vector<8x16xf32>
    %35 = arith.truncf %29 : vector<64x8xf32> to vector<64x8xbf16>
    %36 = arith.truncf %34 : vector<8x16xf32> to vector<8x16xbf16>
    %cst_14 = arith.constant dense<0.000000e+00> : vector<64x16xf32>
    %37 = tpu.matmul %35, %36, %cst_14 {dimension_numbers = #tpu.dot_dimension_numbers<[1], [0], [0], [1], [0, 0, 1, 1], [], []>} : vector<64x8xbf16>, vector<8x16xbf16>, vector<64x16xf32> -> vector<64x16xf32>
    %cst_15 = arith.constant 9.99999993E-9 : f32
    %38 = vector.broadcast %cst_15 : f32 to vector<64x1xf32>
    %39 = arith.addf %32, %38 : vector<64x1xf32>
    %40 = tpu.reciprocal %39 {approx = true} : vector<64x1xf32> -> vector<64x1xf32>
    %41 = vector.broadcast %40 : vector<64x1xf32> to vector<64x16xf32>
    %42 = arith.mulf %37, %41 : vector<64x16xf32>
    %43 = arith.truncf %42 : vector<64x16xf32> to vector<64x16xbf16>
    %c0_16 = arith.constant 0 : index
    %c0_17 = arith.constant 0 : index
    %44 = vector.load %arg3[%c0_16, %c0_17] : memref<16x16xbf16, #tpu.memory_space<vmem>>, vector<16x16xbf16>
    %cst_18 = arith.constant dense<0.000000e+00> : vector<64x16xf32>
    %45 = tpu.matmul %43, %44, %cst_18 {dimension_numbers = #tpu.dot_dimension_numbers<[1], [0], [0], [1], [0, 0, 1, 1], [], []>} : vector<64x16xbf16>, vector<16x16xbf16>, vector<64x16xf32> -> vector<64x16xf32>
    %c0_19 = arith.constant 0 : index
    %c0_20 = arith.constant 0 : index
    %46 = vector.load %arg4[%c0_19, %c0_20] : memref<1x16xf32, #tpu.memory_space<vmem>>, vector<1x16xf32>
    %47 = vector.broadcast %46 : vector<1x16xf32> to vector<64x16xf32>
    %48 = arith.addf %45, %47 : vector<64x16xf32>
    %49 = arith.extf %4 : vector<64x16xbf16> to vector<64x16xf32>
    %50 = arith.addf %49, %48 : vector<64x16xf32>
    %51 = arith.truncf %50 : vector<64x16xf32> to vector<64x16xbf16>
    %c0_21 = arith.constant 0 : index
    %c0_22 = arith.constant 0 : index
    %c0_23 = arith.constant 0 : index
    %52 = vector.load %arg5[%c0_21, %c0_22, %c0_23] : memref<1x64x16xbf16, #tpu.memory_space<vmem>>, vector<1x64x16xbf16>
    %53 = vector.shape_cast %52 : vector<1x64x16xbf16> to vector<64x16xbf16>
    %54 = vector.shape_cast %51 : vector<64x16xbf16> to vector<1x64x16xbf16>
    tpu.vector_store %arg5[%c0_21, %c0_22, %c0_23], %54 {strides = array<i32>} : memref<1x64x16xbf16, #tpu.memory_space<vmem>>, vector<1x64x16xbf16>,
    return
  }
  func.func @transform_0(%arg0: i32) -> (i32, i32, i32) {
    %c0_i32 = arith.constant 0 : i32
    %c0_i32_0 = arith.constant 0 : i32
    %c0_i32_1 = arith.constant 0 : i32
    return %arg0, %c0_i32, %c0_i32_0 : i32, i32, i32
  }
  func.func @transform_1(%arg0: i32) -> (i32, i32) {
    %c0_i32 = arith.constant 0 : i32
    %c0_i32_0 = arith.constant 0 : i32
    %c0_i32_1 = arith.constant 0 : i32
    return %c0_i32, %c0_i32_0 : i32, i32
  }
  func.func @transform_2(%arg0: i32) -> (i32, i32) {
    %c0_i32 = arith.constant 0 : i32
    %c0_i32_0 = arith.constant 0 : i32
    %c0_i32_1 = arith.constant 0 : i32
    return %c0_i32, %c0_i32_0 : i32, i32
  }
  func.func @transform_3(%arg0: i32) -> (i32, i32) {
    %c0_i32 = arith.constant 0 : i32
    %c0_i32_0 = arith.constant 0 : i32
    %c0_i32_1 = arith.constant 0 : i32
    return %c0_i32, %c0_i32_0 : i32, i32
  }
  func.func @transform_4(%arg0: i32) -> (i32, i32, i32) {
    %c0_i32 = arith.constant 0 : i32
    %c0_i32_0 = arith.constant 0 : i32
    %c0_i32_1 = arith.constant 0 : i32
    return %arg0, %c0_i32, %c0_i32_0 : i32, i32, i32
  }
}

module attributes {stable_mosaic.version = 11 : i64} {
  func.func @_linear_kernel(%arg0: i32, %arg1: i32, %arg2: memref<32x144xbf16, #tpu.memory_space<vmem>>, %arg3: memref<144x32xbf16, #tpu.memory_space<vmem>>, %arg4: memref<1x32xf32, #tpu.memory_space<vmem>>, %arg5: memref<32x32xbf16, #tpu.memory_space<vmem>>) attributes {dimension_semantics = [#tpu.dimension_semantics<parallel>, #tpu.dimension_semantics<parallel>], iteration_bounds = array<i64: 1, 1>, scalar_prefetch = 0 : i64, scratch_operands = 0 : i64, tpu.core_type = #tpu.core_type<tc>, window_params = [{transform_indices = @transform_0, window_bounds = array<i64: 32, 144>}, {transform_indices = @transform_1, window_bounds = array<i64: 144, 32>}, {transform_indices = @transform_2, window_bounds = array<i64: 1, 32>}, {transform_indices = @transform_3, window_bounds = array<i64: 32, 32>}]} {
    %c0 = arith.constant 0 : index
    %c0_0 = arith.constant 0 : index
    %0 = vector.load %arg2[%c0, %c0_0] : memref<32x144xbf16, #tpu.memory_space<vmem>>, vector<32x144xbf16>
    %c0_1 = arith.constant 0 : index
    %c0_2 = arith.constant 0 : index
    %1 = vector.load %arg3[%c0_1, %c0_2] : memref<144x32xbf16, #tpu.memory_space<vmem>>, vector<144x32xbf16>
    %cst = arith.constant dense<0.000000e+00> : vector<32x32xf32>
    %2 = tpu.matmul %0, %1, %cst {dimension_numbers = #tpu.dot_dimension_numbers<[1], [0], [0], [1], [0, 0, 1, 1], [], []>} : vector<32x144xbf16>, vector<144x32xbf16>, vector<32x32xf32> -> vector<32x32xf32>
    %c0_3 = arith.constant 0 : index
    %c0_4 = arith.constant 0 : index
    %3 = vector.load %arg4[%c0_3, %c0_4] : memref<1x32xf32, #tpu.memory_space<vmem>>, vector<1x32xf32>
    %4 = vector.broadcast %3 : vector<1x32xf32> to vector<32x32xf32>
    %5 = arith.addf %2, %4 : vector<32x32xf32>
    %6 = arith.truncf %5 : vector<32x32xf32> to vector<32x32xbf16>
    %c0_5 = arith.constant 0 : index
    %c0_6 = arith.constant 0 : index
    %7 = vector.load %arg5[%c0_5, %c0_6] : memref<32x32xbf16, #tpu.memory_space<vmem>>, vector<32x32xbf16>
    tpu.vector_store %arg5[%c0_5, %c0_6], %6 {strides = array<i32>} : memref<32x32xbf16, #tpu.memory_space<vmem>>, vector<32x32xbf16>,
    return
  }
  func.func @transform_0(%arg0: i32, %arg1: i32) -> (i32, i32) {
    %c0_i32 = arith.constant 0 : i32
    %c0_i32_0 = arith.constant 0 : i32
    return %arg1, %c0_i32 : i32, i32
  }
  func.func @transform_1(%arg0: i32, %arg1: i32) -> (i32, i32) {
    %c0_i32 = arith.constant 0 : i32
    %c0_i32_0 = arith.constant 0 : i32
    return %c0_i32, %arg0 : i32, i32
  }
  func.func @transform_2(%arg0: i32, %arg1: i32) -> (i32, i32) {
    %c0_i32 = arith.constant 0 : i32
    %c0_i32_0 = arith.constant 0 : i32
    return %c0_i32, %arg0 : i32, i32
  }
  func.func @transform_3(%arg0: i32, %arg1: i32) -> (i32, i32) {
    %c0_i32 = arith.constant 0 : i32
    return %arg1, %arg0 : i32, i32
  }
}

module attributes {stable_mosaic.version = 11 : i64} {
  func.func @_ln_qkv_kernel(%arg0: i32, %arg1: memref<34x32xbf16, #tpu.memory_space<vmem>>, %arg2: memref<1x32xf32, #tpu.memory_space<vmem>>, %arg3: memref<1x32xf32, #tpu.memory_space<vmem>>, %arg4: memref<32x96xbf16, #tpu.memory_space<vmem>>, %arg5: memref<1x96xf32, #tpu.memory_space<vmem>>, %arg6: memref<1x34x32xbf16, #tpu.memory_space<vmem>>, %arg7: memref<1x34x32xbf16, #tpu.memory_space<vmem>>, %arg8: memref<1x34x32xbf16, #tpu.memory_space<vmem>>) attributes {dimension_semantics = [#tpu.dimension_semantics<parallel>], iteration_bounds = array<i64: 1>, scalar_prefetch = 0 : i64, scratch_operands = 0 : i64, tpu.core_type = #tpu.core_type<tc>, window_params = [{transform_indices = @transform_0, window_bounds = array<i64: 34, 32>}, {pipeline_mode = #tpu.pipeline_mode<synchronous>, transform_indices = @transform_1, window_bounds = array<i64: 1, 32>}, {pipeline_mode = #tpu.pipeline_mode<synchronous>, transform_indices = @transform_2, window_bounds = array<i64: 1, 32>}, {pipeline_mode = #tpu.pipeline_mode<synchronous>, transform_indices = @transform_3, window_bounds = array<i64: 32, 96>}, {pipeline_mode = #tpu.pipeline_mode<synchronous>, transform_indices = @transform_4, window_bounds = array<i64: 1, 96>}, {transform_indices = @transform_5, window_bounds = array<i64: 1, 34, 32>}, {transform_indices = @transform_6, window_bounds = array<i64: 1, 34, 32>}, {transform_indices = @transform_7, window_bounds = array<i64: 1, 34, 32>}]} {
    %c0 = arith.constant 0 : index
    %c0_0 = arith.constant 0 : index
    %0 = vector.load %arg1[%c0, %c0_0] : memref<34x32xbf16, #tpu.memory_space<vmem>>, vector<34x32xbf16>
    %1 = arith.extf %0 : vector<34x32xbf16> to vector<34x32xf32>
    %c0_1 = arith.constant 0 : index
    %c0_2 = arith.constant 0 : index
    %2 = vector.load %arg2[%c0_1, %c0_2] : memref<1x32xf32, #tpu.memory_space<vmem>>, vector<1x32xf32>
    %c0_3 = arith.constant 0 : index
    %c0_4 = arith.constant 0 : index
    %3 = vector.load %arg3[%c0_3, %c0_4] : memref<1x32xf32, #tpu.memory_space<vmem>>, vector<1x32xf32>
    %cst = arith.constant dense<0.000000e+00> : vector<34xf32>
    %4 = vector.multi_reduction <add>, %1, %cst [1] : vector<34x32xf32> to vector<34xf32>
    %5 = vector.shape_cast %4 : vector<34xf32> to vector<34x1xf32>
    %cst_5 = arith.constant 3.200000e+01 : f32
    %6 = vector.broadcast %cst_5 : f32 to vector<34x1xf32>
    %7 = arith.divf %5, %6 : vector<34x1xf32>
    %8 = vector.broadcast %7 : vector<34x1xf32> to vector<34x32xf32>
    %9 = arith.subf %1, %8 : vector<34x32xf32>
    %10 = arith.mulf %9, %9 : vector<34x32xf32>
    %cst_6 = arith.constant dense<0.000000e+00> : vector<34xf32>
    %11 = vector.multi_reduction <add>, %10, %cst_6 [1] : vector<34x32xf32> to vector<34xf32>
    %12 = vector.shape_cast %11 : vector<34xf32> to vector<34x1xf32>
    %cst_7 = arith.constant 3.200000e+01 : f32
    %13 = vector.broadcast %cst_7 : f32 to vector<34x1xf32>
    %14 = arith.divf %12, %13 : vector<34x1xf32>
    %15 = vector.broadcast %7 : vector<34x1xf32> to vector<34x32xf32>
    %16 = arith.subf %1, %15 : vector<34x32xf32>
    %cst_8 = arith.constant 9.99999974E-6 : f32
    %17 = vector.broadcast %cst_8 : f32 to vector<34x1xf32>
    %18 = arith.addf %14, %17 : vector<34x1xf32>
    %19 = math.rsqrt %18 : vector<34x1xf32>
    %20 = vector.broadcast %19 : vector<34x1xf32> to vector<34x32xf32>
    %21 = arith.mulf %16, %20 : vector<34x32xf32>
    %22 = vector.broadcast %2 : vector<1x32xf32> to vector<34x32xf32>
    %23 = arith.mulf %21, %22 : vector<34x32xf32>
    %24 = vector.broadcast %3 : vector<1x32xf32> to vector<34x32xf32>
    %25 = arith.addf %23, %24 : vector<34x32xf32>
    %26 = arith.truncf %25 : vector<34x32xf32> to vector<34x32xbf16>
    %c0_9 = arith.constant 0 : index
    %c0_10 = arith.constant 0 : index
    %27 = vector.load %arg4[%c0_9, %c0_10] : memref<32x96xbf16, #tpu.memory_space<vmem>>, vector<32x96xbf16>
    %cst_11 = arith.constant dense<0.000000e+00> : vector<34x96xf32>
    %28 = tpu.matmul %26, %27, %cst_11 {dimension_numbers = #tpu.dot_dimension_numbers<[1], [0], [0], [1], [0, 0, 1, 1], [], []>} : vector<34x32xbf16>, vector<32x96xbf16>, vector<34x96xf32> -> vector<34x96xf32>
    %c0_12 = arith.constant 0 : index
    %c0_13 = arith.constant 0 : index
    %29 = vector.load %arg5[%c0_12, %c0_13] : memref<1x96xf32, #tpu.memory_space<vmem>>, vector<1x96xf32>
    %30 = vector.broadcast %29 : vector<1x96xf32> to vector<34x96xf32>
    %31 = arith.addf %28, %30 : vector<34x96xf32>
    %32 = arith.truncf %31 : vector<34x96xf32> to vector<34x96xbf16>
    %33 = vector.extract_strided_slice %32 {offsets = [0, 0], sizes = [34, 32], strides = [1, 1]} : vector<34x96xbf16> to vector<34x32xbf16>
    %c0_14 = arith.constant 0 : index
    %c0_15 = arith.constant 0 : index
    %c0_16 = arith.constant 0 : index
    %34 = vector.load %arg6[%c0_14, %c0_15, %c0_16] : memref<1x34x32xbf16, #tpu.memory_space<vmem>>, vector<1x34x32xbf16>
    %35 = vector.shape_cast %34 : vector<1x34x32xbf16> to vector<34x32xbf16>
    %36 = vector.shape_cast %33 : vector<34x32xbf16> to vector<1x34x32xbf16>
    tpu.vector_store %arg6[%c0_14, %c0_15, %c0_16], %36 {strides = array<i32>} : memref<1x34x32xbf16, #tpu.memory_space<vmem>>, vector<1x34x32xbf16>,
    %37 = vector.extract_strided_slice %32 {offsets = [0, 32], sizes = [34, 32], strides = [1, 1]} : vector<34x96xbf16> to vector<34x32xbf16>
    %c0_17 = arith.constant 0 : index
    %c0_18 = arith.constant 0 : index
    %c0_19 = arith.constant 0 : index
    %38 = vector.load %arg7[%c0_17, %c0_18, %c0_19] : memref<1x34x32xbf16, #tpu.memory_space<vmem>>, vector<1x34x32xbf16>
    %39 = vector.shape_cast %38 : vector<1x34x32xbf16> to vector<34x32xbf16>
    %40 = vector.shape_cast %37 : vector<34x32xbf16> to vector<1x34x32xbf16>
    tpu.vector_store %arg7[%c0_17, %c0_18, %c0_19], %40 {strides = array<i32>} : memref<1x34x32xbf16, #tpu.memory_space<vmem>>, vector<1x34x32xbf16>,
    %41 = vector.extract_strided_slice %32 {offsets = [0, 64], sizes = [34, 32], strides = [1, 1]} : vector<34x96xbf16> to vector<34x32xbf16>
    %c0_20 = arith.constant 0 : index
    %c0_21 = arith.constant 0 : index
    %c0_22 = arith.constant 0 : index
    %42 = vector.load %arg8[%c0_20, %c0_21, %c0_22] : memref<1x34x32xbf16, #tpu.memory_space<vmem>>, vector<1x34x32xbf16>
    %43 = vector.shape_cast %42 : vector<1x34x32xbf16> to vector<34x32xbf16>
    %44 = vector.shape_cast %41 : vector<34x32xbf16> to vector<1x34x32xbf16>
    tpu.vector_store %arg8[%c0_20, %c0_21, %c0_22], %44 {strides = array<i32>} : memref<1x34x32xbf16, #tpu.memory_space<vmem>>, vector<1x34x32xbf16>,
    return
  }
  func.func @transform_0(%arg0: i32) -> (i32, i32) {
    %c0_i32 = arith.constant 0 : i32
    %c0_i32_0 = arith.constant 0 : i32
    return %arg0, %c0_i32 : i32, i32
  }
  func.func @transform_1(%arg0: i32) -> (i32, i32) {
    %c0_i32 = arith.constant 0 : i32
    %c0_i32_0 = arith.constant 0 : i32
    %c0_i32_1 = arith.constant 0 : i32
    return %c0_i32, %c0_i32_0 : i32, i32
  }
  func.func @transform_2(%arg0: i32) -> (i32, i32) {
    %c0_i32 = arith.constant 0 : i32
    %c0_i32_0 = arith.constant 0 : i32
    %c0_i32_1 = arith.constant 0 : i32
    return %c0_i32, %c0_i32_0 : i32, i32
  }
  func.func @transform_3(%arg0: i32) -> (i32, i32) {
    %c0_i32 = arith.constant 0 : i32
    %c0_i32_0 = arith.constant 0 : i32
    %c0_i32_1 = arith.constant 0 : i32
    return %c0_i32, %c0_i32_0 : i32, i32
  }
  func.func @transform_4(%arg0: i32) -> (i32, i32) {
    %c0_i32 = arith.constant 0 : i32
    %c0_i32_0 = arith.constant 0 : i32
    %c0_i32_1 = arith.constant 0 : i32
    return %c0_i32, %c0_i32_0 : i32, i32
  }
  func.func @transform_5(%arg0: i32) -> (i32, i32, i32) {
    %c0_i32 = arith.constant 0 : i32
    %c0_i32_0 = arith.constant 0 : i32
    %c0_i32_1 = arith.constant 0 : i32
    return %c0_i32, %arg0, %c0_i32_0 : i32, i32, i32
  }
  func.func @transform_6(%arg0: i32) -> (i32, i32, i32) {
    %c0_i32 = arith.constant 0 : i32
    %c0_i32_0 = arith.constant 0 : i32
    %c0_i32_1 = arith.constant 0 : i32
    return %c0_i32, %arg0, %c0_i32_0 : i32, i32, i32
  }
  func.func @transform_7(%arg0: i32) -> (i32, i32, i32) {
    %c0_i32 = arith.constant 0 : i32
    %c0_i32_0 = arith.constant 0 : i32
    %c0_i32_1 = arith.constant 0 : i32
    return %c0_i32, %arg0, %c0_i32_0 : i32, i32, i32
  }
}

module attributes {stable_mosaic.version = 11 : i64} {
  func.func @_mhsa_kernel(%arg0: i32, %arg1: i32, %arg2: memref<1x1x17x32xbf16, #tpu.memory_space<vmem>>, %arg3: memref<1x1x17x32xbf16, #tpu.memory_space<vmem>>, %arg4: memref<1x1x17x32xbf16, #tpu.memory_space<vmem>>, %arg5: memref<1x17x32xbf16, #tpu.memory_space<vmem>>) attributes {dimension_semantics = [#tpu.dimension_semantics<parallel>, #tpu.dimension_semantics<parallel>], iteration_bounds = array<i64: 2, 1>, scalar_prefetch = 0 : i64, scratch_operands = 0 : i64, tpu.core_type = #tpu.core_type<tc>, window_params = [{transform_indices = @transform_0, window_bounds = array<i64: 1, 1, 17, 32>}, {transform_indices = @transform_1, window_bounds = array<i64: 1, 1, 17, 32>}, {transform_indices = @transform_2, window_bounds = array<i64: 1, 1, 17, 32>}, {transform_indices = @transform_3, window_bounds = array<i64: 1, 17, 32>}]} {
    %c0 = arith.constant 0 : index
    %c0_0 = arith.constant 0 : index
    %c0_1 = arith.constant 0 : index
    %c0_2 = arith.constant 0 : index
    %0 = vector.load %arg2[%c0, %c0_0, %c0_1, %c0_2] : memref<1x1x17x32xbf16, #tpu.memory_space<vmem>>, vector<1x1x17x32xbf16>
    %1 = vector.shape_cast %0 : vector<1x1x17x32xbf16> to vector<17x32xbf16>
    %c0_3 = arith.constant 0 : index
    %c0_4 = arith.constant 0 : index
    %c0_5 = arith.constant 0 : index
    %c0_6 = arith.constant 0 : index
    %2 = vector.load %arg3[%c0_3, %c0_4, %c0_5, %c0_6] : memref<1x1x17x32xbf16, #tpu.memory_space<vmem>>, vector<1x1x17x32xbf16>
    %3 = vector.shape_cast %2 : vector<1x1x17x32xbf16> to vector<17x32xbf16>
    %c0_7 = arith.constant 0 : index
    %c0_8 = arith.constant 0 : index
    %c0_9 = arith.constant 0 : index
    %c0_10 = arith.constant 0 : index
    %4 = vector.load %arg4[%c0_7, %c0_8, %c0_9, %c0_10] : memref<1x1x17x32xbf16, #tpu.memory_space<vmem>>, vector<1x1x17x32xbf16>
    %5 = vector.shape_cast %4 : vector<1x1x17x32xbf16> to vector<17x32xbf16>
    %6 = vector.extract_strided_slice %1 {offsets = [0, 0], sizes = [17, 8], strides = [1, 1]} : vector<17x32xbf16> to vector<17x8xbf16>
    %7 = vector.extract_strided_slice %3 {offsets = [0, 0], sizes = [17, 8], strides = [1, 1]} : vector<17x32xbf16> to vector<17x8xbf16>
    %cst = arith.constant dense<0.000000e+00> : vector<17x17xf32>
    %8 = tpu.matmul %6, %7, %cst {dimension_numbers = #tpu.dot_dimension_numbers<[1], [1], [0], [0], [0, 0, 1, 0], [], []>} : vector<17x8xbf16>, vector<17x8xbf16>, vector<17x17xf32> -> vector<17x17xf32>
    %cst_11 = arith.constant dense<0xFF800000> : vector<17xf32>
    %9 = vector.multi_reduction <maximumf>, %8, %cst_11 [1] : vector<17x17xf32> to vector<17xf32>
    %10 = vector.shape_cast %9 : vector<17xf32> to vector<17x1xf32>
    %11 = vector.broadcast %10 : vector<17x1xf32> to vector<17x17xf32>
    %12 = arith.subf %8, %11 : vector<17x17xf32>
    %13 = math.exp %12 : vector<17x17xf32>
    %cst_12 = arith.constant dense<0.000000e+00> : vector<17xf32>
    %14 = vector.multi_reduction <add>, %13, %cst_12 [1] : vector<17x17xf32> to vector<17xf32>
    %15 = vector.shape_cast %14 : vector<17xf32> to vector<17x1xf32>
    %16 = tpu.reciprocal %15 {approx = true} : vector<17x1xf32> -> vector<17x1xf32>
    %17 = vector.broadcast %16 : vector<17x1xf32> to vector<17x17xf32>
    %18 = arith.mulf %13, %17 : vector<17x17xf32>
    %19 = arith.truncf %18 : vector<17x17xf32> to vector<17x17xbf16>
    %20 = vector.extract_strided_slice %5 {offsets = [0, 0], sizes = [17, 8], strides = [1, 1]} : vector<17x32xbf16> to vector<17x8xbf16>
    %cst_13 = arith.constant dense<0.000000e+00> : vector<17x8xf32>
    %21 = tpu.matmul %19, %20, %cst_13 {dimension_numbers = #tpu.dot_dimension_numbers<[1], [0], [0], [1], [0, 0, 1, 1], [], []>} : vector<17x17xbf16>, vector<17x8xbf16>, vector<17x8xf32> -> vector<17x8xf32>
    %22 = arith.truncf %21 : vector<17x8xf32> to vector<17x8xbf16>
    %c0_14 = arith.constant 0 : index
    %c0_15 = arith.constant 0 : index
    %c0_16 = arith.constant 0 : index
    %23 = vector.load %arg5[%c0_14, %c0_15, %c0_16] : memref<1x17x32xbf16, #tpu.memory_space<vmem>>, vector<1x17x8xbf16>
    %24 = vector.shape_cast %23 : vector<1x17x8xbf16> to vector<17x8xbf16>
    %25 = vector.shape_cast %22 : vector<17x8xbf16> to vector<1x17x8xbf16>
    tpu.vector_store %arg5[%c0_14, %c0_15, %c0_16], %25 {strides = array<i32>} : memref<1x17x32xbf16, #tpu.memory_space<vmem>>, vector<1x17x8xbf16>,
    %26 = vector.extract_strided_slice %1 {offsets = [0, 8], sizes = [17, 8], strides = [1, 1]} : vector<17x32xbf16> to vector<17x8xbf16>
    %27 = vector.extract_strided_slice %3 {offsets = [0, 8], sizes = [17, 8], strides = [1, 1]} : vector<17x32xbf16> to vector<17x8xbf16>
    %cst_17 = arith.constant dense<0.000000e+00> : vector<17x17xf32>
    %28 = tpu.matmul %26, %27, %cst_17 {dimension_numbers = #tpu.dot_dimension_numbers<[1], [1], [0], [0], [0, 0, 1, 0], [], []>} : vector<17x8xbf16>, vector<17x8xbf16>, vector<17x17xf32> -> vector<17x17xf32>
    %cst_18 = arith.constant dense<0xFF800000> : vector<17xf32>
    %29 = vector.multi_reduction <maximumf>, %28, %cst_18 [1] : vector<17x17xf32> to vector<17xf32>
    %30 = vector.shape_cast %29 : vector<17xf32> to vector<17x1xf32>
    %31 = vector.broadcast %30 : vector<17x1xf32> to vector<17x17xf32>
    %32 = arith.subf %28, %31 : vector<17x17xf32>
    %33 = math.exp %32 : vector<17x17xf32>
    %cst_19 = arith.constant dense<0.000000e+00> : vector<17xf32>
    %34 = vector.multi_reduction <add>, %33, %cst_19 [1] : vector<17x17xf32> to vector<17xf32>
    %35 = vector.shape_cast %34 : vector<17xf32> to vector<17x1xf32>
    %36 = tpu.reciprocal %35 {approx = true} : vector<17x1xf32> -> vector<17x1xf32>
    %37 = vector.broadcast %36 : vector<17x1xf32> to vector<17x17xf32>
    %38 = arith.mulf %33, %37 : vector<17x17xf32>
    %39 = arith.truncf %38 : vector<17x17xf32> to vector<17x17xbf16>
    %40 = vector.extract_strided_slice %5 {offsets = [0, 8], sizes = [17, 8], strides = [1, 1]} : vector<17x32xbf16> to vector<17x8xbf16>
    %cst_20 = arith.constant dense<0.000000e+00> : vector<17x8xf32>
    %41 = tpu.matmul %39, %40, %cst_20 {dimension_numbers = #tpu.dot_dimension_numbers<[1], [0], [0], [1], [0, 0, 1, 1], [], []>} : vector<17x17xbf16>, vector<17x8xbf16>, vector<17x8xf32> -> vector<17x8xf32>
    %42 = arith.truncf %41 : vector<17x8xf32> to vector<17x8xbf16>
    %c0_21 = arith.constant 0 : index
    %c0_22 = arith.constant 0 : index
    %c8 = arith.constant 8 : index
    %43 = vector.load %arg5[%c0_21, %c0_22, %c8] : memref<1x17x32xbf16, #tpu.memory_space<vmem>>, vector<1x17x8xbf16>
    %44 = vector.shape_cast %43 : vector<1x17x8xbf16> to vector<17x8xbf16>
    %45 = vector.shape_cast %42 : vector<17x8xbf16> to vector<1x17x8xbf16>
    tpu.vector_store %arg5[%c0_21, %c0_22, %c8], %45 {strides = array<i32>} : memref<1x17x32xbf16, #tpu.memory_space<vmem>>, vector<1x17x8xbf16>,
    %46 = vector.extract_strided_slice %1 {offsets = [0, 16], sizes = [17, 8], strides = [1, 1]} : vector<17x32xbf16> to vector<17x8xbf16>
    %47 = vector.extract_strided_slice %3 {offsets = [0, 16], sizes = [17, 8], strides = [1, 1]} : vector<17x32xbf16> to vector<17x8xbf16>
    %cst_23 = arith.constant dense<0.000000e+00> : vector<17x17xf32>
    %48 = tpu.matmul %46, %47, %cst_23 {dimension_numbers = #tpu.dot_dimension_numbers<[1], [1], [0], [0], [0, 0, 1, 0], [], []>} : vector<17x8xbf16>, vector<17x8xbf16>, vector<17x17xf32> -> vector<17x17xf32>
    %cst_24 = arith.constant dense<0xFF800000> : vector<17xf32>
    %49 = vector.multi_reduction <maximumf>, %48, %cst_24 [1] : vector<17x17xf32> to vector<17xf32>
    %50 = vector.shape_cast %49 : vector<17xf32> to vector<17x1xf32>
    %51 = vector.broadcast %50 : vector<17x1xf32> to vector<17x17xf32>
    %52 = arith.subf %48, %51 : vector<17x17xf32>
    %53 = math.exp %52 : vector<17x17xf32>
    %cst_25 = arith.constant dense<0.000000e+00> : vector<17xf32>
    %54 = vector.multi_reduction <add>, %53, %cst_25 [1] : vector<17x17xf32> to vector<17xf32>
    %55 = vector.shape_cast %54 : vector<17xf32> to vector<17x1xf32>
    %56 = tpu.reciprocal %55 {approx = true} : vector<17x1xf32> -> vector<17x1xf32>
    %57 = vector.broadcast %56 : vector<17x1xf32> to vector<17x17xf32>
    %58 = arith.mulf %53, %57 : vector<17x17xf32>
    %59 = arith.truncf %58 : vector<17x17xf32> to vector<17x17xbf16>
    %60 = vector.extract_strided_slice %5 {offsets = [0, 16], sizes = [17, 8], strides = [1, 1]} : vector<17x32xbf16> to vector<17x8xbf16>
    %cst_26 = arith.constant dense<0.000000e+00> : vector<17x8xf32>
    %61 = tpu.matmul %59, %60, %cst_26 {dimension_numbers = #tpu.dot_dimension_numbers<[1], [0], [0], [1], [0, 0, 1, 1], [], []>} : vector<17x17xbf16>, vector<17x8xbf16>, vector<17x8xf32> -> vector<17x8xf32>
    %62 = arith.truncf %61 : vector<17x8xf32> to vector<17x8xbf16>
    %c0_27 = arith.constant 0 : index
    %c0_28 = arith.constant 0 : index
    %c16 = arith.constant 16 : index
    %63 = vector.load %arg5[%c0_27, %c0_28, %c16] : memref<1x17x32xbf16, #tpu.memory_space<vmem>>, vector<1x17x8xbf16>
    %64 = vector.shape_cast %63 : vector<1x17x8xbf16> to vector<17x8xbf16>
    %65 = vector.shape_cast %62 : vector<17x8xbf16> to vector<1x17x8xbf16>
    tpu.vector_store %arg5[%c0_27, %c0_28, %c16], %65 {strides = array<i32>} : memref<1x17x32xbf16, #tpu.memory_space<vmem>>, vector<1x17x8xbf16>,
    %66 = vector.extract_strided_slice %1 {offsets = [0, 24], sizes = [17, 8], strides = [1, 1]} : vector<17x32xbf16> to vector<17x8xbf16>
    %67 = vector.extract_strided_slice %3 {offsets = [0, 24], sizes = [17, 8], strides = [1, 1]} : vector<17x32xbf16> to vector<17x8xbf16>
    %cst_29 = arith.constant dense<0.000000e+00> : vector<17x17xf32>
    %68 = tpu.matmul %66, %67, %cst_29 {dimension_numbers = #tpu.dot_dimension_numbers<[1], [1], [0], [0], [0, 0, 1, 0], [], []>} : vector<17x8xbf16>, vector<17x8xbf16>, vector<17x17xf32> -> vector<17x17xf32>
    %cst_30 = arith.constant dense<0xFF800000> : vector<17xf32>
    %69 = vector.multi_reduction <maximumf>, %68, %cst_30 [1] : vector<17x17xf32> to vector<17xf32>
    %70 = vector.shape_cast %69 : vector<17xf32> to vector<17x1xf32>
    %71 = vector.broadcast %70 : vector<17x1xf32> to vector<17x17xf32>
    %72 = arith.subf %68, %71 : vector<17x17xf32>
    %73 = math.exp %72 : vector<17x17xf32>
    %cst_31 = arith.constant dense<0.000000e+00> : vector<17xf32>
    %74 = vector.multi_reduction <add>, %73, %cst_31 [1] : vector<17x17xf32> to vector<17xf32>
    %75 = vector.shape_cast %74 : vector<17xf32> to vector<17x1xf32>
    %76 = tpu.reciprocal %75 {approx = true} : vector<17x1xf32> -> vector<17x1xf32>
    %77 = vector.broadcast %76 : vector<17x1xf32> to vector<17x17xf32>
    %78 = arith.mulf %73, %77 : vector<17x17xf32>
    %79 = arith.truncf %78 : vector<17x17xf32> to vector<17x17xbf16>
    %80 = vector.extract_strided_slice %5 {offsets = [0, 24], sizes = [17, 8], strides = [1, 1]} : vector<17x32xbf16> to vector<17x8xbf16>
    %cst_32 = arith.constant dense<0.000000e+00> : vector<17x8xf32>
    %81 = tpu.matmul %79, %80, %cst_32 {dimension_numbers = #tpu.dot_dimension_numbers<[1], [0], [0], [1], [0, 0, 1, 1], [], []>} : vector<17x17xbf16>, vector<17x8xbf16>, vector<17x8xf32> -> vector<17x8xf32>
    %82 = arith.truncf %81 : vector<17x8xf32> to vector<17x8xbf16>
    %c0_33 = arith.constant 0 : index
    %c0_34 = arith.constant 0 : index
    %c24 = arith.constant 24 : index
    %83 = vector.load %arg5[%c0_33, %c0_34, %c24] : memref<1x17x32xbf16, #tpu.memory_space<vmem>>, vector<1x17x8xbf16>
    %84 = vector.shape_cast %83 : vector<1x17x8xbf16> to vector<17x8xbf16>
    %85 = vector.shape_cast %82 : vector<17x8xbf16> to vector<1x17x8xbf16>
    tpu.vector_store %arg5[%c0_33, %c0_34, %c24], %85 {strides = array<i32>} : memref<1x17x32xbf16, #tpu.memory_space<vmem>>, vector<1x17x8xbf16>,
    return
  }
  func.func @transform_0(%arg0: i32, %arg1: i32) -> (i32, i32, i32, i32) {
    %c0_i32 = arith.constant 0 : i32
    %c0_i32_0 = arith.constant 0 : i32
    %c0_i32_1 = arith.constant 0 : i32
    return %arg1, %arg0, %c0_i32, %c0_i32_0 : i32, i32, i32, i32
  }
  func.func @transform_1(%arg0: i32, %arg1: i32) -> (i32, i32, i32, i32) {
    %c0_i32 = arith.constant 0 : i32
    %c0_i32_0 = arith.constant 0 : i32
    %c0_i32_1 = arith.constant 0 : i32
    return %arg1, %arg0, %c0_i32, %c0_i32_0 : i32, i32, i32, i32
  }
  func.func @transform_2(%arg0: i32, %arg1: i32) -> (i32, i32, i32, i32) {
    %c0_i32 = arith.constant 0 : i32
    %c0_i32_0 = arith.constant 0 : i32
    %c0_i32_1 = arith.constant 0 : i32
    return %arg1, %arg0, %c0_i32, %c0_i32_0 : i32, i32, i32, i32
  }
  func.func @transform_3(%arg0: i32, %arg1: i32) -> (i32, i32, i32) {
    %c0_i32 = arith.constant 0 : i32
    %c0_i32_0 = arith.constant 0 : i32
    return %arg0, %c0_i32, %arg1 : i32, i32, i32
  }
}

module attributes {stable_mosaic.version = 11 : i64} {
  func.func @_linear_residual_kernel(%arg0: i32, %arg1: i32, %arg2: memref<34x32xbf16, #tpu.memory_space<vmem>>, %arg3: memref<32x32xbf16, #tpu.memory_space<vmem>>, %arg4: memref<1x32xf32, #tpu.memory_space<vmem>>, %arg5: memref<34x32xbf16, #tpu.memory_space<vmem>>, %arg6: memref<34x32xbf16, #tpu.memory_space<vmem>>) attributes {dimension_semantics = [#tpu.dimension_semantics<parallel>, #tpu.dimension_semantics<parallel>], iteration_bounds = array<i64: 1, 1>, scalar_prefetch = 0 : i64, scratch_operands = 0 : i64, tpu.core_type = #tpu.core_type<tc>, window_params = [{transform_indices = @transform_0, window_bounds = array<i64: 34, 32>}, {transform_indices = @transform_1, window_bounds = array<i64: 32, 32>}, {transform_indices = @transform_2, window_bounds = array<i64: 1, 32>}, {transform_indices = @transform_3, window_bounds = array<i64: 34, 32>}, {transform_indices = @transform_4, window_bounds = array<i64: 34, 32>}]} {
    %c0 = arith.constant 0 : index
    %c0_0 = arith.constant 0 : index
    %0 = vector.load %arg2[%c0, %c0_0] : memref<34x32xbf16, #tpu.memory_space<vmem>>, vector<34x32xbf16>
    %c0_1 = arith.constant 0 : index
    %c0_2 = arith.constant 0 : index
    %1 = vector.load %arg3[%c0_1, %c0_2] : memref<32x32xbf16, #tpu.memory_space<vmem>>, vector<32x32xbf16>
    %cst = arith.constant dense<0.000000e+00> : vector<34x32xf32>
    %2 = tpu.matmul %0, %1, %cst {dimension_numbers = #tpu.dot_dimension_numbers<[1], [0], [0], [1], [0, 0, 1, 1], [], []>} : vector<34x32xbf16>, vector<32x32xbf16>, vector<34x32xf32> -> vector<34x32xf32>
    %c0_3 = arith.constant 0 : index
    %c0_4 = arith.constant 0 : index
    %3 = vector.load %arg4[%c0_3, %c0_4] : memref<1x32xf32, #tpu.memory_space<vmem>>, vector<1x32xf32>
    %4 = vector.broadcast %3 : vector<1x32xf32> to vector<34x32xf32>
    %5 = arith.addf %2, %4 : vector<34x32xf32>
    %c0_5 = arith.constant 0 : index
    %c0_6 = arith.constant 0 : index
    %6 = vector.load %arg5[%c0_5, %c0_6] : memref<34x32xbf16, #tpu.memory_space<vmem>>, vector<34x32xbf16>
    %7 = arith.extf %6 : vector<34x32xbf16> to vector<34x32xf32>
    %8 = arith.addf %5, %7 : vector<34x32xf32>
    %9 = arith.truncf %8 : vector<34x32xf32> to vector<34x32xbf16>
    %c0_7 = arith.constant 0 : index
    %c0_8 = arith.constant 0 : index
    %10 = vector.load %arg6[%c0_7, %c0_8] : memref<34x32xbf16, #tpu.memory_space<vmem>>, vector<34x32xbf16>
    tpu.vector_store %arg6[%c0_7, %c0_8], %9 {strides = array<i32>} : memref<34x32xbf16, #tpu.memory_space<vmem>>, vector<34x32xbf16>,
    return
  }
  func.func @transform_0(%arg0: i32, %arg1: i32) -> (i32, i32) {
    %c0_i32 = arith.constant 0 : i32
    %c0_i32_0 = arith.constant 0 : i32
    return %arg1, %c0_i32 : i32, i32
  }
  func.func @transform_1(%arg0: i32, %arg1: i32) -> (i32, i32) {
    %c0_i32 = arith.constant 0 : i32
    %c0_i32_0 = arith.constant 0 : i32
    return %c0_i32, %arg0 : i32, i32
  }
  func.func @transform_2(%arg0: i32, %arg1: i32) -> (i32, i32) {
    %c0_i32 = arith.constant 0 : i32
    %c0_i32_0 = arith.constant 0 : i32
    return %c0_i32, %arg0 : i32, i32
  }
  func.func @transform_3(%arg0: i32, %arg1: i32) -> (i32, i32) {
    %c0_i32 = arith.constant 0 : i32
    return %arg1, %arg0 : i32, i32
  }
  func.func @transform_4(%arg0: i32, %arg1: i32) -> (i32, i32) {
    %c0_i32 = arith.constant 0 : i32
    return %arg1, %arg0 : i32, i32
  }
}

module attributes {stable_mosaic.version = 11 : i64} {
  func.func @_ln_mlp_residual_kernel(%arg0: i32, %arg1: memref<34x32xbf16, #tpu.memory_space<vmem>>, %arg2: memref<1x32xf32, #tpu.memory_space<vmem>>, %arg3: memref<1x32xf32, #tpu.memory_space<vmem>>, %arg4: memref<32x128xbf16, #tpu.memory_space<vmem>>, %arg5: memref<1x128xf32, #tpu.memory_space<vmem>>, %arg6: memref<128x32xbf16, #tpu.memory_space<vmem>>, %arg7: memref<1x32xf32, #tpu.memory_space<vmem>>, %arg8: memref<34x32xbf16, #tpu.memory_space<vmem>>) attributes {dimension_semantics = [#tpu.dimension_semantics<parallel>], iteration_bounds = array<i64: 1>, scalar_prefetch = 0 : i64, scratch_operands = 0 : i64, tpu.core_type = #tpu.core_type<tc>, window_params = [{transform_indices = @transform_0, window_bounds = array<i64: 34, 32>}, {pipeline_mode = #tpu.pipeline_mode<synchronous>, transform_indices = @transform_1, window_bounds = array<i64: 1, 32>}, {pipeline_mode = #tpu.pipeline_mode<synchronous>, transform_indices = @transform_2, window_bounds = array<i64: 1, 32>}, {pipeline_mode = #tpu.pipeline_mode<synchronous>, transform_indices = @transform_3, window_bounds = array<i64: 32, 128>}, {pipeline_mode = #tpu.pipeline_mode<synchronous>, transform_indices = @transform_4, window_bounds = array<i64: 1, 128>}, {pipeline_mode = #tpu.pipeline_mode<synchronous>, transform_indices = @transform_5, window_bounds = array<i64: 128, 32>}, {pipeline_mode = #tpu.pipeline_mode<synchronous>, transform_indices = @transform_6, window_bounds = array<i64: 1, 32>}, {transform_indices = @transform_7, window_bounds = array<i64: 34, 32>}]} {
    %c0 = arith.constant 0 : index
    %c0_0 = arith.constant 0 : index
    %0 = vector.load %arg1[%c0, %c0_0] : memref<34x32xbf16, #tpu.memory_space<vmem>>, vector<34x32xbf16>
    %1 = arith.extf %0 : vector<34x32xbf16> to vector<34x32xf32>
    %c0_1 = arith.constant 0 : index
    %c0_2 = arith.constant 0 : index
    %2 = vector.load %arg2[%c0_1, %c0_2] : memref<1x32xf32, #tpu.memory_space<vmem>>, vector<1x32xf32>
    %c0_3 = arith.constant 0 : index
    %c0_4 = arith.constant 0 : index
    %3 = vector.load %arg3[%c0_3, %c0_4] : memref<1x32xf32, #tpu.memory_space<vmem>>, vector<1x32xf32>
    %cst = arith.constant dense<0.000000e+00> : vector<34xf32>
    %4 = vector.multi_reduction <add>, %1, %cst [1] : vector<34x32xf32> to vector<34xf32>
    %5 = vector.shape_cast %4 : vector<34xf32> to vector<34x1xf32>
    %cst_5 = arith.constant 3.200000e+01 : f32
    %6 = vector.broadcast %cst_5 : f32 to vector<34x1xf32>
    %7 = arith.divf %5, %6 : vector<34x1xf32>
    %8 = vector.broadcast %7 : vector<34x1xf32> to vector<34x32xf32>
    %9 = arith.subf %1, %8 : vector<34x32xf32>
    %10 = arith.mulf %9, %9 : vector<34x32xf32>
    %cst_6 = arith.constant dense<0.000000e+00> : vector<34xf32>
    %11 = vector.multi_reduction <add>, %10, %cst_6 [1] : vector<34x32xf32> to vector<34xf32>
    %12 = vector.shape_cast %11 : vector<34xf32> to vector<34x1xf32>
    %cst_7 = arith.constant 3.200000e+01 : f32
    %13 = vector.broadcast %cst_7 : f32 to vector<34x1xf32>
    %14 = arith.divf %12, %13 : vector<34x1xf32>
    %15 = vector.broadcast %7 : vector<34x1xf32> to vector<34x32xf32>
    %16 = arith.subf %1, %15 : vector<34x32xf32>
    %cst_8 = arith.constant 9.99999974E-6 : f32
    %17 = vector.broadcast %cst_8 : f32 to vector<34x1xf32>
    %18 = arith.addf %14, %17 : vector<34x1xf32>
    %19 = math.rsqrt %18 : vector<34x1xf32>
    %20 = vector.broadcast %19 : vector<34x1xf32> to vector<34x32xf32>
    %21 = arith.mulf %16, %20 : vector<34x32xf32>
    %22 = vector.broadcast %2 : vector<1x32xf32> to vector<34x32xf32>
    %23 = arith.mulf %21, %22 : vector<34x32xf32>
    %24 = vector.broadcast %3 : vector<1x32xf32> to vector<34x32xf32>
    %25 = arith.addf %23, %24 : vector<34x32xf32>
    %26 = arith.truncf %25 : vector<34x32xf32> to vector<34x32xbf16>
    %c0_9 = arith.constant 0 : index
    %c0_10 = arith.constant 0 : index
    %27 = vector.load %arg4[%c0_9, %c0_10] : memref<32x128xbf16, #tpu.memory_space<vmem>>, vector<32x128xbf16>
    %cst_11 = arith.constant dense<0.000000e+00> : vector<34x128xf32>
    %28 = tpu.matmul %26, %27, %cst_11 {dimension_numbers = #tpu.dot_dimension_numbers<[1], [0], [0], [1], [0, 0, 1, 1], [], []>} : vector<34x32xbf16>, vector<32x128xbf16>, vector<34x128xf32> -> vector<34x128xf32>
    %c0_12 = arith.constant 0 : index
    %c0_13 = arith.constant 0 : index
    %29 = vector.load %arg5[%c0_12, %c0_13] : memref<1x128xf32, #tpu.memory_space<vmem>>, vector<1x128xf32>
    %30 = vector.broadcast %29 : vector<1x128xf32> to vector<34x128xf32>
    %31 = arith.addf %28, %30 : vector<34x128xf32>
    %cst_14 = arith.constant 5.000000e-01 : f32
    %32 = vector.broadcast %cst_14 : f32 to vector<34x128xf32>
    %33 = arith.mulf %32, %31 : vector<34x128xf32>
    %cst_15 = arith.constant 0.707106769 : f32
    %34 = vector.broadcast %cst_15 : f32 to vector<34x128xf32>
    %35 = arith.mulf %31, %34 : vector<34x128xf32>
    %cst_16 = arith.constant -4.000000e+00 : f32
    %cst_17 = arith.constant 4.000000e+00 : f32
    %36 = vector.broadcast %cst_16 : f32 to vector<34x128xf32>
    %37 = arith.maximumf %36, %35 : vector<34x128xf32>
    %38 = vector.broadcast %cst_17 : f32 to vector<34x128xf32>
    %39 = arith.minimumf %38, %37 : vector<34x128xf32>
    %40 = arith.mulf %39, %39 : vector<34x128xf32>
    %cst_18 = arith.constant -2.72614237E-10 : f32
    %41 = vector.broadcast %cst_18 : f32 to vector<34x128xf32>
    %42 = arith.mulf %41, %40 : vector<34x128xf32>
    %cst_19 = arith.constant 2.77068146E-8 : f32
    %43 = vector.broadcast %cst_19 : f32 to vector<34x128xf32>
    %44 = arith.addf %42, %43 : vector<34x128xf32>
    %45 = arith.mulf %44, %40 : vector<34x128xf32>
    %cst_20 = arith.constant -2.10102394E-6 : f32
    %46 = vector.broadcast %cst_20 : f32 to vector<34x128xf32>
    %47 = arith.addf %45, %46 : vector<34x128xf32>
    %48 = arith.mulf %47, %40 : vector<34x128xf32>
    %cst_21 = arith.constant -5.69250624E-5 : f32
    %49 = vector.broadcast %cst_21 : f32 to vector<34x128xf32>
    %50 = arith.addf %48, %49 : vector<34x128xf32>
    %51 = arith.mulf %50, %40 : vector<34x128xf32>
    %cst_22 = arith.constant -7.34990637E-4 : f32
    %52 = vector.broadcast %cst_22 : f32 to vector<34x128xf32>
    %53 = arith.addf %51, %52 : vector<34x128xf32>
    %54 = arith.mulf %53, %40 : vector<34x128xf32>
    %cst_23 = arith.constant -2.954600e-03 : f32
    %55 = vector.broadcast %cst_23 : f32 to vector<34x128xf32>
    %56 = arith.addf %54, %55 : vector<34x128xf32>
    %57 = arith.mulf %56, %40 : vector<34x128xf32>
    %cst_24 = arith.constant -0.0160960332 : f32
    %58 = vector.broadcast %cst_24 : f32 to vector<34x128xf32>
    %59 = arith.addf %57, %58 : vector<34x128xf32>
    %cst_25 = arith.constant -1.45660715E-5 : f32
    %60 = vector.broadcast %cst_25 : f32 to vector<34x128xf32>
    %61 = arith.mulf %60, %40 : vector<34x128xf32>
    %cst_26 = arith.constant -2.13374049E-4 : f32
    %62 = vector.broadcast %cst_26 : f32 to vector<34x128xf32>
    %63 = arith.addf %61, %62 : vector<34x128xf32>
    %64 = arith.mulf %63, %40 : vector<34x128xf32>
    %cst_27 = arith.constant -0.00168282702 : f32
    %65 = vector.broadcast %cst_27 : f32 to vector<34x128xf32>
    %66 = arith.addf %64, %65 : vector<34x128xf32>
    %67 = arith.mulf %66, %40 : vector<34x128xf32>
    %cst_28 = arith.constant -0.00737332925 : f32
    %68 = vector.broadcast %cst_28 : f32 to vector<34x128xf32>
    %69 = arith.addf %67, %68 : vector<34x128xf32>
    %70 = arith.mulf %69, %40 : vector<34x128xf32>
    %cst_29 = arith.constant -0.0142647391 : f32
    %71 = vector.broadcast %cst_29 : f32 to vector<34x128xf32>
    %72 = arith.addf %70, %71 : vector<34x128xf32>
    %73 = arith.mulf %39, %59 : vector<34x128xf32>
    %74 = arith.divf %73, %72 : vector<34x128xf32>
    %cst_30 = arith.constant 1.000000e+00 : f32
    %75 = vector.broadcast %cst_30 : f32 to vector<34x128xf32>
    %76 = arith.addf %75, %74 : vector<34x128xf32>
    %77 = arith.mulf %33, %76 : vector<34x128xf32>
    %78 = arith.truncf %77 : vector<34x128xf32> to vector<34x128xbf16>
    %c0_31 = arith.constant 0 : index
    %c0_32 = arith.constant 0 : index
    %79 = vector.load %arg6[%c0_31, %c0_32] : memref<128x32xbf16, #tpu.memory_space<vmem>>, vector<128x32xbf16>
    %cst_33 = arith.constant dense<0.000000e+00> : vector<34x32xf32>
    %80 = tpu.matmul %78, %79, %cst_33 {dimension_numbers = #tpu.dot_dimension_numbers<[1], [0], [0], [1], [0, 0, 1, 1], [], []>} : vector<34x128xbf16>, vector<128x32xbf16>, vector<34x32xf32> -> vector<34x32xf32>
    %c0_34 = arith.constant 0 : index
    %c0_35 = arith.constant 0 : index
    %81 = vector.load %arg7[%c0_34, %c0_35] : memref<1x32xf32, #tpu.memory_space<vmem>>, vector<1x32xf32>
    %82 = vector.broadcast %81 : vector<1x32xf32> to vector<34x32xf32>
    %83 = arith.addf %80, %82 : vector<34x32xf32>
    %84 = arith.addf %1, %83 : vector<34x32xf32>
    %85 = arith.truncf %84 : vector<34x32xf32> to vector<34x32xbf16>
    %c0_36 = arith.constant 0 : index
    %c0_37 = arith.constant 0 : index
    %86 = vector.load %arg8[%c0_36, %c0_37] : memref<34x32xbf16, #tpu.memory_space<vmem>>, vector<34x32xbf16>
    tpu.vector_store %arg8[%c0_36, %c0_37], %85 {strides = array<i32>} : memref<34x32xbf16, #tpu.memory_space<vmem>>, vector<34x32xbf16>,
    return
  }
  func.func @transform_0(%arg0: i32) -> (i32, i32) {
    %c0_i32 = arith.constant 0 : i32
    %c0_i32_0 = arith.constant 0 : i32
    return %arg0, %c0_i32 : i32, i32
  }
  func.func @transform_1(%arg0: i32) -> (i32, i32) {
    %c0_i32 = arith.constant 0 : i32
    %c0_i32_0 = arith.constant 0 : i32
    %c0_i32_1 = arith.constant 0 : i32
    return %c0_i32, %c0_i32_0 : i32, i32
  }
  func.func @transform_2(%arg0: i32) -> (i32, i32) {
    %c0_i32 = arith.constant 0 : i32
    %c0_i32_0 = arith.constant 0 : i32
    %c0_i32_1 = arith.constant 0 : i32
    return %c0_i32, %c0_i32_0 : i32, i32
  }
  func.func @transform_3(%arg0: i32) -> (i32, i32) {
    %c0_i32 = arith.constant 0 : i32
    %c0_i32_0 = arith.constant 0 : i32
    %c0_i32_1 = arith.constant 0 : i32
    return %c0_i32, %c0_i32_0 : i32, i32
  }
  func.func @transform_4(%arg0: i32) -> (i32, i32) {
    %c0_i32 = arith.constant 0 : i32
    %c0_i32_0 = arith.constant 0 : i32
    %c0_i32_1 = arith.constant 0 : i32
    return %c0_i32, %c0_i32_0 : i32, i32
  }
  func.func @transform_5(%arg0: i32) -> (i32, i32) {
    %c0_i32 = arith.constant 0 : i32
    %c0_i32_0 = arith.constant 0 : i32
    %c0_i32_1 = arith.constant 0 : i32
    return %c0_i32, %c0_i32_0 : i32, i32
  }
  func.func @transform_6(%arg0: i32) -> (i32, i32) {
    %c0_i32 = arith.constant 0 : i32
    %c0_i32_0 = arith.constant 0 : i32
    %c0_i32_1 = arith.constant 0 : i32
    return %c0_i32, %c0_i32_0 : i32, i32
  }
  func.func @transform_7(%arg0: i32) -> (i32, i32) {
    %c0_i32 = arith.constant 0 : i32
    %c0_i32_0 = arith.constant 0 : i32
    return %arg0, %c0_i32 : i32, i32
  }
}

</mosaic_0001>

<bundles_post_ra>
// kernel: t2t_vit_forward.12
= control target key start
LH: loop header
LB: loop body
LE: loop exit
PB: predicated region body
PF: predicated region fallthrough
CT: control target
= control target key end

     0   :  { %vm39_vm0 = vcmask 220160   ;;  %vm347_vm1 = vcmask 1044480   ;;  %vm348_vm2 = vcmask 1045504   ;;  %vm515_vm3 = vcmask 388096   ;;  %s1022_s0 = inlined_call_operand.vmem [shape: f32[128,27], index: 0, kind: input, shape index: {}]   ;;  %s1023_s3 = inlined_call_operand.vmem [shape: bf16[27,48], index: 3, kind: input, shape index: {}]   ;;  %s1024_s1 = inlined_call_operand.vmem [shape: f32[1,27], index: 1, kind: input, shape index: {}]   ;;  %s1025_s2 = inlined_call_operand.vmem [shape: f32[1,27], index: 2, kind: input, shape index: {}]   ;;  %s1026_s4 = inlined_call_operand.vmem [shape: f32[1,48], index: 4, kind: input, shape index: {}]   ;;  %s1027_s5 = inlined_call_operand.vmem [shape: bf16[128,48], index: 5, kind: output, shape index: {}]  }
   0x1   :  { %v21_v0 = vld [vmem:[%s1022_s0] sm:$0xff]  ;;  %v22_v2 = vld [vmem:[%s1022_s0 + $0x8] sm:$0xff]  ;;  %v23_v8 = vld [vmem:[%s1022_s0 + $0x10] sm:$0xff] }
   0x2   :  { %v29_v1 = vld [vmem:[%s1022_s0 + $0x40] sm:$0xff]  ;;  %v40_v3 = vsel %vm39_vm0, %v21_v0, 0.0  ;;  %v30_v5 = vld [vmem:[%s1022_s0 + $0x48] sm:$0xff]  ;;  %v43_v6 = vsel %vm39_vm0, %v22_v2, 0.0  ;;  %v24_v9 = vld [vmem:[%s1022_s0 + $0x18] sm:$0xff]  ;;  %v46_v10 = vsel %vm39_vm0, %v23_v8, 0.0 }
   0x3   :  { %v64_v4 = vsel %vm39_vm0, %v29_v1, 0.0  ;;  %41 = vadd.xlane.f32.xlu0 %v40_v3  ;;  %v67_v7 = vsel %vm39_vm0, %v30_v5, 0.0  ;;  %v49_v11 = vsel %vm39_vm0, %v24_v9, 0.0  ;;  %v708_v12 = vld [vmem:[%s1022_s0 + $0x50] sm:$0xff]  ;;  %v713_v13 = vld [vmem:[%s1022_s0 + $0x58] sm:$0xff]  ;;  %v722_v16 = vld [vmem:[%s1022_s0 + $0x20] sm:$0xff] }
   0x4   :  { %65 = vadd.xlane.f32.xlu1 %v64_v4  ;;  %v70_v14 = vsel %vm39_vm0, %v708_v12, 0.0  ;;  %v73_v15 = vsel %vm39_vm0, %v713_v13, 0.0  ;;  %v727_v17 = vld [vmem:[%s1022_s0 + $0x28] sm:$0xff]  ;;  %v52_v18 = vsel %vm39_vm0, %v722_v16, 0.0  ;;  %v736_v20 = vld [vmem:[%s1022_s0 + $0x60] sm:$0xff]  ;;  %v750_v24 = vld [vmem:[%s1022_s0 + $0x30] sm:$0xff] }
   0x5   :  { %v55_v19 = vsel %vm39_vm0, %v727_v17, 0.0  ;;  %v741_v21 = vld [vmem:[%s1022_s0 + $0x68] sm:$0xff]  ;;  %v76_v22 = vsel %vm39_vm0, %v736_v20, 0.0  ;;  %v755_v25 = vld [vmem:[%s1022_s0 + $0x38] sm:$0xff]  ;;  %v58_v26 = vsel %vm39_vm0, %v750_v24, 0.0  ;;  %v764_v28 = vld [vmem:[%s1022_s0 + $0x70] sm:$0xff] }
   0x6   :  { %v79_v23 = vsel %vm39_vm0, %v741_v21, 0.0  ;;  %v61_v27 = vsel %vm39_vm0, %v755_v25, 0.0  ;;  %v769_v29 = vld [vmem:[%s1022_s0 + $0x78] sm:$0xff]  ;;  %v82_v30 = vsel %vm39_vm0, %v764_v28, 0.0 }
   0x7   :  { %44 = vadd.xlane.f32.xlu0 %v43_v6  ;;  %v85_v31 = vsel %vm39_vm0, %v769_v29, 0.0 }
   0x8   :  { %68 = vadd.xlane.f32.xlu1 %v67_v7 }
   0xb   :  { %47 = vadd.xlane.f32.xlu0 %v46_v10 }
   0xc   :  { %50 = vadd.xlane.f32.xlu1 %v49_v11 }
   0xf   :  { %71 = vadd.xlane.f32.xlu0 %v70_v14 }
  0x10   :  { %74 = vadd.xlane.f32.xlu1 %v73_v15 }
  0x13   :  { %53 = vadd.xlane.f32.xlu0 %v52_v18 }
  0x14   :  { %56 = vadd.xlane.f32.xlu1 %v55_v19 }
  0x17   :  { %77 = vadd.xlane.f32.xlu0 %v76_v22 }
  0x18   :  { %80 = vadd.xlane.f32.xlu1 %v79_v23 }
  0x1b   :  { %59 = vadd.xlane.f32.xlu0 %v58_v26 }
  0x1c   :  { %62 = vadd.xlane.f32.xlu1 %v61_v27 }
  0x1f   :  { %83 = vadd.xlane.f32.xlu0 %v82_v30 }
  0x20   :  { %86 = vadd.xlane.f32.xlu1 %v85_v31 }
  0x8c   :  { %v42_v32 = vpop.xlane.xlu0 %41 }
  0x8d   :  { %v66_v33 = vpop.xlane.xlu1 %65  ;;  %v89_v34 = vmul.f32 0.037037037, %v42_v32 }
  0x8e   :  { %v97_v35 = vmul.f32 0.037037037, %v66_v33 }
  0x8f   :  { %v775_v36 = vsub.f32 %v21_v0, %v89_v34 }
  0x90   :  { %v777_v37 = vsub.f32 %v29_v1, %v97_v35  ;;  %v45_v38 = vpop.xlane.xlu0 %44 }
  0x91   :  { %v69_v39 = vpop.xlane.xlu1 %68  ;;  %v90_v40 = vmul.f32 0.037037037, %v45_v38  ;;  %v121_v42 = vmul.f32 %v775_v36, %v775_v36 }
  0x92   :  { %v98_v41 = vmul.f32 0.037037037, %v69_v39  ;;  %v129_v43 = vmul.f32 %v777_v37, %v777_v37 }
  0x93   :  { %v783_v44 = vsub.f32 %v22_v2, %v90_v40  ;;  %v137_v46 = vsel %vm39_vm0, %v121_v42, 0.0 }
  0x94   :  { %v785_v45 = vsub.f32 %v30_v5, %v98_v41  ;;  %138 = vadd.xlane.f32.xlu0 %v137_v46  ;;  %v48_v47 = vpop.xlane.xlu0 %47  ;;  %v161_v49 = vsel %vm39_vm0, %v129_v43, 0.0 }
  0x95   :  { %v51_v48 = vpop.xlane.xlu1 %50  ;;  %v91_v50 = vmul.f32 0.037037037, %v48_v47  ;;  %v122_v52 = vmul.f32 %v783_v44, %v783_v44 }
  0x96   :  { %v92_v51 = vmul.f32 0.037037037, %v51_v48  ;;  %v130_v53 = vmul.f32 %v785_v45, %v785_v45 }
  0x97   :  { %v793_v54 = vsub.f32 %v23_v8, %v91_v50  ;;  %v140_v56 = vsel %vm39_vm0, %v122_v52, 0.0 }
  0x98   :  { %v795_v55 = vsub.f32 %v24_v9, %v92_v51  ;;  %162 = vadd.xlane.f32.xlu0 %v161_v49  ;;  %141 = vadd.xlane.f32.xlu1 %v140_v56  ;;  %v72_v57 = vpop.xlane.xlu0 %71  ;;  %v164_v59 = vsel %vm39_vm0, %v130_v53, 0.0  ;;  %v650_v53 = vmov 65535  }
  0x99   :  { %v75_v58 = vpop.xlane.xlu1 %74  ;;  %v99_v60 = vmul.f32 0.037037037, %v72_v57  ;;  %v123_v62 = vmul.f32 %v793_v54, %v793_v54  ;;  %v349_v56 = vsel %vm347_vm1, 4294967295, %v650_v53 }
  0x9a   :  { %v100_v61 = vmul.f32 0.037037037, %v75_v58  ;;  %v124_v63 = vmul.f32 %v795_v55, %v795_v55  ;;  %v350_v57 = vsel %vm348_vm2, %v349_v56, 0 }
  0x9b   :  { %v804_v0 = vsub.f32 %v708_v12, %v99_v60  ;;  %v143_v2 = vsel %vm39_vm0, %v123_v62, 0.0 }
  0x9c   :  { %v807_v1 = vsub.f32 %v713_v13, %v100_v61  ;;  %165 = vadd.xlane.f32.xlu1 %v164_v59  ;;  %144 = vadd.xlane.f32.xlu0 %v143_v2  ;;  %v54_v3 = vpop.xlane.xlu0 %53  ;;  %v146_v5 = vsel %vm39_vm0, %v124_v63, 0.0  ;;  %v617_v59 = vld [vmem:[%s1023_s3] sm:$0xff]  }
  0x9d   :  { %v57_v4 = vpop.xlane.xlu1 %56  ;;  %v93_v6 = vmul.f32 0.037037037, %v54_v3  ;;  %v131_v8 = vmul.f32 %v804_v0, %v804_v0 }
  0x9e   :  { %v94_v7 = vmul.f32 0.037037037, %v57_v4  ;;  %v132_v9 = vmul.f32 %v807_v1, %v807_v1 }
  0x9f   :  { %v816_v10 = vsub.f32 %v722_v16, %v93_v6  ;;  %v167_v12 = vsel %vm39_vm0, %v131_v8, 0.0 }
  0xa0   :  { %v819_v11 = vsub.f32 %v727_v17, %v94_v7  ;;  %147 = vadd.xlane.f32.xlu1 %v146_v5  ;;  %168 = vadd.xlane.f32.xlu0 %v167_v12  ;;  %v78_v13 = vpop.xlane.xlu0 %77  ;;  %v170_v15 = vsel %vm39_vm0, %v132_v9, 0.0 }
  0xa1   :  { %v81_v14 = vpop.xlane.xlu1 %80  ;;  %v101_v18 = vmul.f32 0.037037037, %v78_v13  ;;  %v125_v22 = vmul.f32 %v816_v10, %v816_v10 }
  0xa2   :  { %v102_v19 = vmul.f32 0.037037037, %v81_v14  ;;  %v126_v16 = vmul.f32 %v819_v11, %v819_v11 }
  0xa3   :  { %v828_v23 = vsub.f32 %v736_v20, %v101_v18  ;;  %v149_v26 = vsel %vm39_vm0, %v125_v22, 0.0 }
  0xa4   :  { %v831_v17 = vsub.f32 %v741_v21, %v102_v19  ;;  %171 = vadd.xlane.f32.xlu1 %v170_v15  ;;  %150 = vadd.xlane.f32.xlu0 %v149_v26  ;;  %v60_v27 = vpop.xlane.xlu0 %59  ;;  %v152_v31 = vsel %vm39_vm0, %v126_v16, 0.0 }
  0xa5   :  { %v63_v30 = vpop.xlane.xlu1 %62  ;;  %v95_v32 = vmul.f32 0.037037037, %v60_v27  ;;  %v133_v34 = vmul.f32 %v828_v23, %v828_v23 }
  0xa6   :  { %v96_v33 = vmul.f32 0.037037037, %v63_v30  ;;  %v134_v20 = vmul.f32 %v831_v17, %v831_v17 }
  0xa7   :  { %v840_v35 = vsub.f32 %v750_v24, %v95_v32  ;;  %v173_v38 = vsel %vm39_vm0, %v133_v34, 0.0 }
  0xa8   :  { %v843_v21 = vsub.f32 %v755_v25, %v96_v33  ;;  %153 = vadd.xlane.f32.xlu1 %v152_v31  ;;  %174 = vadd.xlane.f32.xlu0 %v173_v38  ;;  %v84_v39 = vpop.xlane.xlu0 %83  ;;  %v176_v41 = vsel %vm39_vm0, %v134_v20, 0.0  ;;  %v874_v38 = vld [vmem:[%s1024_s1] ss:$0 sm:$0xff] }
  0xa9   :  { %v87_v40 = vpop.xlane.xlu1 %86  ;;  %v103_v42 = vmul.f32 0.037037037, %v84_v39  ;;  %v127_v46 = vmul.f32 %v840_v35, %v840_v35 }
  0xaa   :  { %v104_v43 = vmul.f32 0.037037037, %v87_v40  ;;  %v128_v24 = vmul.f32 %v843_v21, %v843_v21 }
  0xab   :  { %v852_v47 = vsub.f32 %v764_v28, %v103_v42  ;;  %v155_v48 = vsel %vm39_vm0, %v127_v46, 0.0 }
  0xac   :  { %v855_v25 = vsub.f32 %v769_v29, %v104_v43  ;;  %177 = vadd.xlane.f32.xlu1 %v176_v41  ;;  %156 = vadd.xlane.f32.xlu0 %v155_v48  ;;  %v158_v49 = vsel %vm39_vm0, %v128_v24, 0.0  ;;  %v616_v29 = vld [vmem:[%s1023_s3 + $0x8] sm:$0x3f]  }
  0xad   :  { %v135_v50 = vmul.f32 %v852_v47, %v852_v47  ;;  %v352_v58 = vand.u32 %v616_v29, %v350_v57 }
  0xae   :  { %v136_v51 = vmul.f32 %v855_v25, %v855_v25 }
  0xaf   :  { %v179_v52 = vsel %vm39_vm0, %v135_v50, 0.0  ;;  %591 = vmatprep.subr.bf16.mxu0 %v352_v58  ;;  %611 = vmatprep.subr.bf16.mxu1 %v352_v58 }
  0xb0   :  { %159 = vadd.xlane.f32.xlu1 %v158_v49  ;;  %180 = vadd.xlane.f32.xlu0 %v179_v52  ;;  %v182_v28 = vsel %vm39_vm0, %v136_v51, 0.0  ;;  %v881_v51 = vld [vmem:[%s1025_s2] ss:$0 sm:$0xff] }
  0xb1   :  { %592 = vmatpush3.bf16.msra.mxu0 %v352_v58  ;;  %613 = vmatpush3.bf16.msra.mxu1 %v352_v58 }
  0xb2   :  { %593 = vmatprep.subr.bf16.mxu0 %v617_v59  ;;  %612 = vmatprep.subr.bf16.mxu1 %v617_v59 }
  0xb4   :  { %183 = vadd.xlane.f32.xlu1 %v182_v28 }
  0xb5   :  { %594 = vmatpush3.bf16.msra.mxu0 %v617_v59  ;;  %614 = vmatpush3.bf16.msra.mxu1 %v617_v59 }
 0x11d   :  { %v139_v60 = vpop.xlane.xlu0 %138 }
 0x11e   :  { %v185_v61 = vmul.f32 0.037037037, %v139_v60 }
 0x120   :  { %v201_v62 = vadd.f32 1e-05, %v185_v61 }
 0x121   :  { %v142_v63 = vpop.xlane.xlu1 %141  ;;  %v163_v2 = vpop.xlane.xlu0 %162 }
 0x122   :  { %618 = vrsqrt.f32 %v201_v62  ;;  %v186_v3 = vmul.f32 0.037037037, %v142_v63  ;;  %v193_v4 = vmul.f32 0.037037037, %v163_v2 }
 0x124   :  { %v202_v5 = vadd.f32 1e-05, %v186_v3  ;;  %v209_v6 = vadd.f32 1e-05, %v193_v4 }
 0x125   :  { %v166_v7 = vpop.xlane.xlu1 %165  ;;  %v145_v8 = vpop.xlane.xlu0 %144 }
 0x126   :  { %620 = vrsqrt.f32 %v202_v5  ;;  %v194_v9 = vmul.f32 0.037037037, %v166_v7  ;;  %v187_v12 = vmul.f32 0.037037037, %v145_v8 }
 0x127   :  { %622 = vrsqrt.f32 %v209_v6 }
 0x128   :  { %v210_v13 = vadd.f32 1e-05, %v194_v9  ;;  %v203_v14 = vadd.f32 1e-05, %v187_v12 }
 0x129   :  { %v148_v15 = vpop.xlane.xlu1 %147  ;;  %v169_v18 = vpop.xlane.xlu0 %168 }
 0x12a   :  { %624 = vrsqrt.f32 %v210_v13  ;;  %v188_v19 = vmul.f32 0.037037037, %v148_v15  ;;  %v195_v22 = vmul.f32 0.037037037, %v169_v18 }
 0x12b   :  { %626 = vrsqrt.f32 %v203_v14 }
 0x12c   :  { %v204_v16 = vadd.f32 1e-05, %v188_v19  ;;  %v211_v26 = vadd.f32 1e-05, %v195_v22 }
 0x12d   :  { %v172_v27 = vpop.xlane.xlu1 %171  ;;  %v151_v30 = vpop.xlane.xlu0 %150 }
 0x12e   :  { %628 = vrsqrt.f32 %v204_v16  ;;  %v196_v31 = vmul.f32 0.037037037, %v172_v27  ;;  %v189_v32 = vmul.f32 0.037037037, %v151_v30 }
 0x12f   :  { %v619_v33 = vpop.eup %618  ;;  %630 = vrsqrt.f32 %v211_v26 }
 0x130   :  { %v212_v34 = vadd.f32 1e-05, %v196_v31  ;;  %v205_v20 = vadd.f32 1e-05, %v189_v32  ;;  %v233_v39 = vmul.f32 %v619_v33, %v775_v36 }
 0x131   :  { %v154_v40 = vpop.xlane.xlu1 %153  ;;  %v175_v41 = vpop.xlane.xlu0 %174 }
 0x132   :  { %632 = vrsqrt.f32 %v212_v34  ;;  %v190_v42 = vmul.f32 0.037037037, %v154_v40  ;;  %v197_v43 = vmul.f32 0.037037037, %v175_v41  ;;  %v255_v24 = vmul.f32 %v874_v38, %v233_v39 }
 0x133   :  { %v621_v46 = vpop.eup %620  ;;  %634 = vrsqrt.f32 %v205_v20 }
 0x134   :  { %v623_v48 = vpop.eup %622  ;;  %v206_v49 = vadd.f32 1e-05, %v190_v42  ;;  %v213_v50 = vadd.f32 1e-05, %v197_v43  ;;  %v234_v52 = vmul.f32 %v621_v46, %v783_v44  ;;  %v277_v59 = vadd.f32 %v881_v51, %v255_v24 }
 0x135   :  { %v178_v36 = vpop.xlane.xlu1 %177  ;;  %v157_v28 = vpop.xlane.xlu0 %156  ;;  %v241_v29 = vmul.f32 %v623_v48, %v777_v37 }
 0x136   :  { %636 = vrsqrt.f32 %v206_v49  ;;  %v198_v53 = vmul.f32 0.037037037, %v178_v36  ;;  %v191_v56 = vmul.f32 0.037037037, %v157_v28  ;;  %v256_v57 = vmul.f32 %v874_v38, %v234_v52 }
 0x137   :  { %v625_v58 = vpop.eup %624  ;;  %638 = vrsqrt.f32 %v213_v50  ;;  %v263_v37 = vmul.f32 %v874_v38, %v241_v29 }
 0x138   :  { %v627_v60 = vpop.eup %626  ;;  %v214_v61 = vadd.f32 1e-05, %v198_v53  ;;  %v207_v62 = vadd.f32 1e-05, %v191_v56  ;;  %v278_v63 = vadd.f32 %v881_v51, %v256_v57  ;;  %v242_v44 = vmul.f32 %v625_v58, %v785_v45 }
 0x139   :  { %v160_v2 = vpop.xlane.xlu1 %159  ;;  %v181_v3 = vpop.xlane.xlu0 %180  ;;  %v235_v4 = vmul.f32 %v627_v60, %v793_v54  ;;  %v285_v54 = vadd.f32 %v881_v51, %v263_v37 }
 0x13a   :  { %640 = vrsqrt.f32 %v214_v61  ;;  %v192_v5 = vmul.f32 0.037037037, %v160_v2  ;;  %v199_v6 = vmul.f32 0.037037037, %v181_v3  ;;  %v293_v7 = vpack.c.bf16 %v278_v63, %v277_v59 }
 0x13b   :  { %v629_v8 = vpop.eup %628  ;;  %642 = vrsqrt.f32 %v207_v62  ;;  %v264_v9 = vmul.f32 %v874_v38, %v242_v44  ;;  %v257_v12 = vmul.f32 %v874_v38, %v235_v4 }
 0x13c   :  { %v631_v13 = vpop.eup %630  ;;  %v208_v14 = vadd.f32 1e-05, %v192_v5  ;;  %v215_v15 = vadd.f32 1e-05, %v199_v6  ;;  %595 = vmatprep.mubr.msk.bf16.mxu0 %vm39_vm0, %v293_v7  ;;  %v236_v45 = vmul.f32 %v629_v8, %v795_v55  ;;  %v940_v8 = vld [vmem:[%s1026_s4] ss:$0 sm:$0xff] }
 0x13d   :  { %v184_v18 = vpop.xlane.xlu1 %183  ;;  %v286_v19 = vadd.f32 %v881_v51, %v264_v9  ;;  %v243_v22 = vmul.f32 %v631_v13, %v804_v0  ;;  %v279_v31 = vadd.f32 %v881_v51, %v257_v12 }
 0x13e   :  { %644 = vrsqrt.f32 %v208_v14  ;;  %v200_v16 = vmul.f32 0.037037037, %v184_v18  ;;  %v258_v26 = vmul.f32 %v874_v38, %v236_v45 }
 0x13f   :  { %v633_v27 = vpop.eup %632  ;;  %646 = vrsqrt.f32 %v215_v15  ;;  %v297_v30 = vpack.c.bf16 %v286_v19, %v285_v54  ;;  %v265_v20 = vmul.f32 %v874_v38, %v243_v22 }
 0x140   :  { %v635_v32 = vpop.eup %634  ;;  %v216_v33 = vadd.f32 1e-05, %v200_v16  ;;  %v280_v55 = vadd.f32 %v881_v51, %v258_v26  ;;  %v244_v34 = vmul.f32 %v633_v27, %v807_v1 }
 0x141   :  { %603 = vmatprep.mubr.msk.bf16.mxu1 %vm39_vm0, %v297_v30  ;;  %v237_v0 = vmul.f32 %v635_v32, %v816_v10  ;;  %v287_v43 = vadd.f32 %v881_v51, %v265_v20 }
 0x142   :  { %648 = vrsqrt.f32 %v216_v33  ;;  %v294_v39 = vpack.c.bf16 %v280_v55, %v279_v31  ;;  %v266_v40 = vmul.f32 %v874_v38, %v244_v34 }
 0x143   :  { %v637_v41 = vpop.eup %636  ;;  %v259_v24 = vmul.f32 %v874_v38, %v237_v0 }
 0x144   :  { %v639_v42 = vpop.eup %638  ;;  %596 = vmatmul.mubr.msk.bf16.vlgmr.msra.gmra.mxu0 %vm39_vm0, %v294_v39  ;;  %v288_v46 = vadd.f32 %v881_v51, %v266_v40  ;;  %v238_v1 = vmul.f32 %v637_v41, %v819_v11 }
 0x145   :  { %v245_v48 = vmul.f32 %v639_v42, %v828_v23  ;;  %v281_v36 = vadd.f32 %v881_v51, %v259_v24 }
 0x146   :  { %v298_v49 = vpack.c.bf16 %v288_v46, %v287_v43  ;;  %v260_v10 = vmul.f32 %v874_v38, %v238_v1 }
 0x147   :  { %v641_v50 = vpop.eup %640  ;;  %v267_v53 = vmul.f32 %v874_v38, %v245_v48 }
 0x148   :  { %v643_v52 = vpop.eup %642  ;;  %604 = vmatmul.mubr.msk.bf16.vlgmr.msra.gmra.mxu1 %vm39_vm0, %v298_v49  ;;  %v282_v28 = vadd.f32 %v881_v51, %v260_v10  ;;  %v246_v29 = vmul.f32 %v641_v50, %v831_v17 }
 0x149   :  { %v239_v11 = vmul.f32 %v643_v52, %v840_v35  ;;  %v289_v59 = vadd.f32 %v881_v51, %v267_v53 }
 0x14a   :  { %v295_v56 = vpack.c.bf16 %v282_v28, %v281_v36  ;;  %v268_v23 = vmul.f32 %v874_v38, %v246_v29 }
 0x14b   :  { %v645_v57 = vpop.eup %644  ;;  %v261_v62 = vmul.f32 %v874_v38, %v239_v11 }
 0x14c   :  { %v647_v58 = vpop.eup %646  ;;  %599 = vmatprep.mubr.msk.bf16.mxu0 %vm39_vm0, %v295_v56  ;;  %v290_v60 = vadd.f32 %v881_v51, %v268_v23  ;;  %v240_v61 = vmul.f32 %v645_v57, %v843_v21 }
 0x14d   :  { %v247_v17 = vmul.f32 %v647_v58, %v852_v47  ;;  %v283_v2 = vadd.f32 %v881_v51, %v261_v62 }
 0x14e   :  { %v299_v63 = vpack.c.bf16 %v290_v60, %v289_v59  ;;  %v262_v35 = vmul.f32 %v874_v38, %v240_v61 }
 0x14f   :  { %v649_v44 = vpop.eup %648  ;;  %v269_v4 = vmul.f32 %v874_v38, %v247_v17 }
 0x150   :  { %607 = vmatprep.mubr.msk.bf16.mxu1 %vm39_vm0, %v299_v63  ;;  %v284_v3 = vadd.f32 %v881_v51, %v262_v35  ;;  %v248_v37 = vmul.f32 %v649_v44, %v855_v25 }
 0x151   :  { %v291_v47 = vadd.f32 %v881_v51, %v269_v4 }
 0x152   :  { %v296_v5 = vpack.c.bf16 %v284_v3, %v283_v2  ;;  %v270_v21 = vmul.f32 %v874_v38, %v248_v37 }
 0x154   :  { %600 = vmatmul.mubr.msk.bf16.gmra.mxu0 %vm39_vm0, %v296_v5  ;;  %v292_v6 = vadd.f32 %v881_v51, %v270_v21 }
 0x156   :  { %v300_v7 = vpack.c.bf16 %v292_v6, %v291_v47 }
 0x158   :  { %608 = vmatmul.mubr.msk.bf16.gmra.mxu1 %vm39_vm0, %v300_v7 }
 0x204   :  { %v597_v25 = vpop.f32.mrf.mxu0 }
 0x205   :  { %v397_v9 = vadd.f32 %v597_v25, %v940_v8 }
 0x206   :  { %v388_v12 = vpop.f32.mrf.mxu0 }
 0x207   :  { %v567_v38 = vpack.c.bf16 %v397_v9, %v397_v9  ;;  %v389_v13 = vadd.f32 %v940_v8, %v388_v12 }
 0x208   :  { %v598_v14 = vpop.f32.mrf.mxu0  ;;  %v605_v15 = vpop.f32.mrf.mxu1 }
 0x209   :  { %518 = vst.msk [vmem:[%s1027_s5 + $0x8] sm:$0xf] %vm515_vm3, %v567_v38  ;;  %v565_v51 = vpack.c.bf16 %v389_v13, %v389_v13  ;;  %v400_v45 = vadd.f32 %v598_v14, %v940_v8  ;;  %v429_v18 = vadd.f32 %v605_v15, %v940_v8 }
 0x20a   :  { %v391_v54 = vpop.f32.mrf.mxu0  ;;  %v420_v19 = vpop.f32.mrf.mxu1 }
 0x20b   :  { %516 = vst.msk [vmem:[%s1027_s5] sm:$0xf] %vm515_vm3, %v565_v51  ;;  %v568_v22 = vpack.c.bf16 %v400_v45, %v400_v45  ;;  %v575_v16 = vpack.c.bf16 %v429_v18, %v429_v18  ;;  %v392_v26 = vadd.f32 %v940_v8, %v391_v54  ;;  %v421_v27 = vadd.f32 %v940_v8, %v420_v19 }
 0x20c   :  { %v606_v30 = vpop.f32.mrf.mxu1 }
 0x20d   :  { %519 = vst.msk [vmem:[%s1027_s5 + $0xc] sm:$0xf] %vm515_vm3, %v568_v22  ;;  %526 = vst.msk [vmem:[%s1027_s5 + $0x28] sm:$0xf] %vm515_vm3, %v575_v16  ;;  %v566_v31 = vpack.c.bf16 %v392_v26, %v392_v26  ;;  %v573_v32 = vpack.c.bf16 %v421_v27, %v421_v27  ;;  %v432_v33 = vadd.f32 %v606_v30, %v940_v8 }
 0x20e   :  { %v423_v55 = vpop.f32.mrf.mxu1 }
 0x20f   :  { %517 = vst.msk [vmem:[%s1027_s5 + $0x4] sm:$0xf] %vm515_vm3, %v566_v31  ;;  %524 = vst.msk [vmem:[%s1027_s5 + $0x20] sm:$0xf] %vm515_vm3, %v573_v32  ;;  %v576_v34 = vpack.c.bf16 %v432_v33, %v432_v33  ;;  %v424_v20 = vadd.f32 %v940_v8, %v423_v55 }
 0x211   :  { %527 = vst.msk [vmem:[%s1027_s5 + $0x2c] sm:$0xf] %vm515_vm3, %v576_v34  ;;  %v574_v0 = vpack.c.bf16 %v424_v20, %v424_v20 }
 0x213   :  { %525 = vst.msk [vmem:[%s1027_s5 + $0x24] sm:$0xf] %vm515_vm3, %v574_v0 }
 0x214   :  { %v601_v39 = vpop.f32.mrf.mxu0 }
 0x215   :  { %v413_v40 = vadd.f32 %v601_v39, %v940_v8 }
 0x216   :  { %v404_v41 = vpop.f32.mrf.mxu0 }
 0x217   :  { %v571_v42 = vpack.c.bf16 %v413_v40, %v413_v40  ;;  %v405_v43 = vadd.f32 %v940_v8, %v404_v41 }
 0x218   :  { %v602_v46 = vpop.f32.mrf.mxu0  ;;  %v609_v1 = vpop.f32.mrf.mxu1 }
 0x219   :  { %522 = vst.msk [vmem:[%s1027_s5 + $0x18] sm:$0xf] %vm515_vm3, %v571_v42  ;;  %v569_v24 = vpack.c.bf16 %v405_v43, %v405_v43  ;;  %v416_v48 = vadd.f32 %v602_v46, %v940_v8  ;;  %v445_v49 = vadd.f32 %v609_v1, %v940_v8 }
 0x21a   :  { %v407_v10 = vpop.f32.mrf.mxu0  ;;  %v436_v50 = vpop.f32.mrf.mxu1 }
 0x21b   :  { %520 = vst.msk [vmem:[%s1027_s5 + $0x10] sm:$0xf] %vm515_vm3, %v569_v24  ;;  %v572_v52 = vpack.c.bf16 %v416_v48, %v416_v48  ;;  %v579_v36 = vpack.c.bf16 %v445_v49, %v445_v49  ;;  %v408_v28 = vadd.f32 %v940_v8, %v407_v10  ;;  %v437_v29 = vadd.f32 %v940_v8, %v436_v50 }
 0x21c   :  { %v610_v53 = vpop.f32.mrf.mxu1 }
 0x21d   :  { %523 = vst.msk [vmem:[%s1027_s5 + $0x1c] sm:$0xf] %vm515_vm3, %v572_v52  ;;  %530 = vst.msk [vmem:[%s1027_s5 + $0x38] sm:$0xf] %vm515_vm3, %v579_v36  ;;  %v570_v11 = vpack.c.bf16 %v408_v28, %v408_v28  ;;  %v577_v56 = vpack.c.bf16 %v437_v29, %v437_v29  ;;  %v448_v23 = vadd.f32 %v610_v53, %v940_v8 }
 0x21e   :  { %v439_v57 = vpop.f32.mrf.mxu1 }
 0x21f   :  { %521 = vst.msk [vmem:[%s1027_s5 + $0x14] sm:$0xf] %vm515_vm3, %v570_v11  ;;  %528 = vst.msk [vmem:[%s1027_s5 + $0x30] sm:$0xf] %vm515_vm3, %v577_v56  ;;  %v580_v58 = vpack.c.bf16 %v448_v23, %v448_v23  ;;  %v440_v59 = vadd.f32 %v940_v8, %v439_v57 }
 0x221   :  { %531 = vst.msk [vmem:[%s1027_s5 + $0x3c] sm:$0xf] %vm515_vm3, %v580_v58  ;;  %v578_v60 = vpack.c.bf16 %v440_v59, %v440_v59 }
 0x223   :  { %529 = vst.msk [vmem:[%s1027_s5 + $0x34] sm:$0xf] %vm515_vm3, %v578_v60 }

// kernel: t2t_vit_forward.13
= control target key start
LH: loop header
LB: loop body
LE: loop exit
PB: predicated region body
PF: predicated region fallthrough
CT: control target
= control target key end

     0   :  { %s1432_s15 = smov 0   ;;  %s1618_s0 = inlined_call_operand.vmem [shape: bf16[2,64,48], index: 0, kind: input, shape index: {}]   ;;  %s1619_s1 = inlined_call_operand.vmem [shape: bf16[8,16], index: 1, kind: input, shape index: {}]   ;;  %s1620_s2 = inlined_call_operand.vmem [shape: bf16[16,16], index: 2, kind: input, shape index: {}]   ;;  %s1621_s3 = inlined_call_operand.vmem [shape: f32[1,16], index: 3, kind: input, shape index: {}]   ;;  %s1622_s4 = inlined_call_operand.vmem [shape: bf16[2,64,16], index: 4, kind: output, shape index: {}]  }
   0x1 LB: > { %s1173_s16 = sadd.s32 4294967295, %s1399_s15   ;;  %p1177_p0 = scmp.ge.s32.totalorder %s1399_s15, 1  ;;  %s1399_s15 = sphi %s1432_s15, %s14_s15  }
   0x2   : > { %p162_p1 = scmp.lt.s32.totalorder %s1399_s15, 3 }
   0x4   : > { %p163_p2 = pnand %p1177_p0, %p162_p1 }
   0x5   : > { %p188_p3 = scmp.lt.s32.totalorder (!%p163_p2), %s1173_s16, 1  ;;  %s1403_s23 = smov (!%p163_p2), 112  }
   0x6   : > { %166 = sbr.rel (%p163_p2) target bundleno = 1202 (0x4b2), region = 36  ;;  %s1404_s24 = smov (!%p163_p2), 96  }
   0x7   : > { %s1406_s29 = smov (!%p163_p2), 32  }
   0xb   : > { %v1401_v0 = vmov 0.0   ;;  %vm224_vm0 = vcmask 130048   ;;  %vm1402_vm1 = vmmov 0   ;;  %v207_v1 = vld [vmem:[%s1619_s1] sm:$0xf]  ;;  %s1624_s16 = smov (!%p188_p3, %s1173_s16), 1  ;;  %v404_v46 = vlaneseq }
   0xc   : > { %1264 = vmatprep.subr.bf16.mxu0 %v1401_v0  ;;  %1272 = vmatprep.mubr.msk.bf16.mxu0 %vm1402_vm1, %v1401_v0  ;;  %v342_v2 = vsel %vm224_vm0, %v207_v1, 0  ;;  %s1220_s19 = sshll.u32 %s1624_s16, 5  ;;  %vm415_vm2 = vcmask 130112   ;;  %vm422_vm3 = vcmask 195712   ;;  %vm429_vm4 = vcmask 261312  }
   0xd   : > { %1332 = vmatprep.subr.msk.bf16.mxu1 %vm224_vm0, %v207_v1  ;;  %s192_s22 = scalar_lea.vmem %s1618_s0, %s1220_s19  ;;  %v1531_v49 = vand.u32 127, %v404_v46  ;;  %v1534_v52 = vshrl.u32 %v404_v46, 7  ;;  %vm436_vm5 = vcmask 326912   ;;  %vm443_vm6 = vcmask 392512   ;;  %s197_s6 = scalar_lea.vmem %s1622_s4, %s1220_s19 }
   0xe   : > { %1277 = vmatpush3.bf16.xpose.msra.mxu1 %v342_v2  ;;  %v203_v3 = vld [vmem:[%s192_s22 + $0x10] sm:$0xff]   ;;  %v205_v4 = vld [vmem:[%s192_s22 + $0x18] sm:$0xff]   ;;  %v199_v5 = vld [vmem:[%s192_s22] sm:$0xff]   ;;  %vm450_vm7 = vcmask 458112   ;;  %vm457_vm8 = vcmask 523712   ;;  %vm593_vm9 = vcmask 523264  }
   0xf   : > { %1286 = vmatprep.subr.bf16.mxu1 %v1401_v0  ;;  %v201_v6 = vld [vmem:[%s192_s22 + $0x8] sm:$0xff]   ;;  %480 = vrot.lane.b32.xlu1 %v203_v3, %s1403_s23  ;;  %v354_v7 = vsel %vm224_vm0, %v205_v4, 0  ;;  %v351_v8 = vsel %vm224_vm0, %v203_v3, 0  ;;  %v345_v10 = vsel %vm224_vm0, %v199_v5, 0  ;;  %v1468_v11 = vunpack.c.l.bf16 %v199_v5 }
  0x10   : > { %476 = vrot.lane.b32.xlu0 %v199_v5, %s1403_s23  ;;  %1265 = vmatpush3.bf16.xpose.msra.mxu0 %v354_v7  ;;  %v348_v9 = vsel %vm224_vm0, %v201_v6, 0  ;;  %v1472_v13 = vunpack.c.l.bf16 %v201_v6  ;;  %v1474_v14 = vunpack.c.h.bf16 %v199_v5  ;;  %v1480_v17 = vunpack.c.h.bf16 %v201_v6 }
  0x11   : > { %1266 = vmatprep.subr.bf16.mxu0 %v1401_v0  ;;  %v216_v12 = vmul.f32 %v1468_v11, %v1468_v11  ;;  %v1484_v19 = vunpack.c.l.bf16 %v203_v3  ;;  %v1489_v22 = vunpack.c.h.bf16 %v203_v3  ;;  %v1494_v25 = vunpack.c.l.bf16 %v205_v4 }
  0x12   : > { %v218_v16 = vmul.f32 %v1472_v13, %v1472_v13  ;;  %v217_v18 = vmul.f32 %v1474_v14, %v1474_v14  ;;  %v219_v21 = vmul.f32 %v1480_v17, %v1480_v17  ;;  %v1499_v28 = vunpack.c.h.bf16 %v205_v4 }
  0x13   : > { %482 = vrot.lane.b32.xlu1 %v205_v4, %s1403_s23  ;;  %v225_v15 = vsel %vm224_vm0, %v216_v12, 0.0  ;;  %v220_v24 = vmul.f32 %v1484_v19, %v1484_v19  ;;  %v221_v27 = vmul.f32 %v1489_v22, %v1489_v22  ;;  %v222_v30 = vmul.f32 %v1494_v25, %v1494_v25 }
  0x14   : > { %478 = vrot.lane.b32.xlu0 %v201_v6, %s1403_s23  ;;  %v231_v20 = vsel %vm224_vm0, %v218_v16, 0.0  ;;  %v228_v23 = vsel %vm224_vm0, %v217_v18, 0.0  ;;  %v234_v26 = vsel %vm224_vm0, %v219_v21, 0.0  ;;  %v223_v32 = vmul.f32 %v1499_v28, %v1499_v28 }
  0x15   : > { %v237_v29 = vsel %vm224_vm0, %v220_v24, 0.0  ;;  %v240_v31 = vsel %vm224_vm0, %v221_v27, 0.0  ;;  %v243_v33 = vsel %vm224_vm0, %v222_v30, 0.0  ;;  %v410_v53 = vadd.s32 4294967288, %v1531_v49 }
  0x16   : > { %v246_v34 = vsel %vm224_vm0, %v223_v32, 0.0  ;;  %v417_v55 = vadd.s32 4294967280, %v1531_v49  ;;  %v408_v58 = vsub.s32 %v1531_v49, %v1534_v52  ;;  %v424_v62 = vadd.s32 4294967272, %v1531_v49 }
  0x17   : > { %v413_v60 = vsub.s32 %v410_v53, %v1534_v52  ;;  %vm658_vm10 = vcmask 64512   ;;  %vm671_vm11 = vcmask 1043456   ;;  %vm1109_vm12 = vcmask 125952  }
  0x18   : > { %1267 = vmatpush3.bf16.xpose.msra.mxu0 %v351_v8  ;;  %v431_v8 = vadd.s32 4294967264, %v1531_v49 }
  0x19   : > { %1268 = vmatprep.subr.bf16.mxu0 %v1401_v0 }
  0x20   : > { %1269 = vmatpush3.bf16.xpose.msra.mxu0 %v348_v9 }
  0x21   : > { %1270 = vmatprep.subr.bf16.mxu0 %v1401_v0 }
  0x28   : > { %1271 = vmatpush3.bf16.xpose.msra.mxu0 %v345_v10 }
  0x2f   : > { %1273 = vmatmul.mubr.msk.bf16.vlgmr.msra.gmra.mxu0 %vm224_vm0, %v207_v1  ;;  %v420_v1 = vsub.s32 %v417_v55, %v1534_v52 }
  0x33   : > { %226 = vadd.xlane.f32.xlu0 %v225_v15 }
  0x37   : > { %232 = vadd.xlane.f32.xlu0 %v231_v20  ;;  %229 = vadd.xlane.f32.xlu1 %v228_v23  ;;  %v438_v20 = vadd.s32 4294967256, %v1531_v49  ;;  %v434_v23 = vsub.s32 %v431_v8, %v1534_v52 }
  0x3b   : > { %235 = vadd.xlane.f32.xlu0 %v234_v26  ;;  %238 = vadd.xlane.f32.xlu1 %v237_v29 }
  0x3f   : > { %241 = vadd.xlane.f32.xlu0 %v240_v31  ;;  %244 = vadd.xlane.f32.xlu1 %v243_v33  ;;  %v441_v33 = vsub.s32 %v438_v20, %v1534_v52 }
  0x43   : > { %247 = vadd.xlane.f32.xlu0 %v246_v34 }
  0x50   : > { %604 = vrot.lane.b32.xlu1 %v205_v4, %s1404_s24 }
  0x54   : > { %600 = vrot.lane.b32.xlu1 %v201_v6, %s1404_s24 }
  0x58   : > { %598 = vrot.lane.b32.xlu1 %v199_v5, %s1404_s24 }
  0x59   : > { %602 = vrot.lane.b32.xlu0 %v203_v3, %s1404_s24 }
  0x5c   : > { %267 = vrot.lane.b32.xlu1 %v217_v18, %s1403_s23 }
  0x5d   : > { %265 = vrot.lane.b32.xlu0 %v216_v12, %s1403_s23 }
  0x60   : > { %271 = vrot.lane.b32.xlu1 %v219_v21, %s1403_s23 }
  0x61   : > { %269 = vrot.lane.b32.xlu0 %v218_v16, %s1403_s23 }
  0x64   : > { %275 = vrot.lane.b32.xlu1 %v221_v27, %s1403_s23 }
  0x65   : > { %273 = vrot.lane.b32.xlu0 %v220_v24, %s1403_s23 }
  0x68   : > { %279 = vrot.lane.b32.xlu1 %v223_v32, %s1403_s23 }
  0x69   : > { %277 = vrot.lane.b32.xlu0 %v222_v30, %s1403_s23  ;;  %v445_v30 = vadd.s32 4294967248, %v1531_v49 }
  0x81   : > { %v481_v37 = vpop.permute.xlu1 %480 }
  0x82   : > { %v477_v35 = vpop.permute.xlu0 %476 }
  0x83   : > { %1278 = vmatprep.mubr.msk.bf16.mxu1 %vm224_vm0, %v477_v35 }
  0x85   : > { %v483_v38 = vpop.permute.xlu1 %482 }
  0x86   : > { %v479_v36 = vpop.permute.xlu0 %478 }
  0x87   : > { %1279 = vmatmul.mubr.msk.bf16.vlgmr.msra.gmra.mxu1 %vm224_vm0, %v479_v36 }
  0x88   : > { %1282 = vmatprep.mubr.msk.bf16.mxu1 %vm224_vm0, %v481_v37 }
  0x8f   : > { %1283 = vmatmul.mubr.msk.bf16.gmra.mxu1 %vm224_vm0, %v483_v38  ;;  %v452_v38 = vadd.s32 4294967240, %v1531_v49 }
  0x90   : > { %1294 = vmatprep.mubr.msk.bf16.mxu1 %vm1402_vm1, %v1401_v0 }
  0xbc   : > { %v227_v39 = vpop.xlane.xlu0 %226 }
  0xbd   : > { %v249_v59 = vmul.f32 0.5, %v227_v39  ;;  %v448_v39 = vsub.s32 %v445_v30, %v1534_v52 }
  0xbf   : > { %v409_v5 = vrot.slane %v249_v59, %v408_v58 }
  0xc0   : > { %v233_v40 = vpop.xlane.xlu0 %232  ;;  %v230_v41 = vpop.xlane.xlu1 %229 }
  0xc1   : > { %v250_v61 = vmul.f32 0.5, %v230_v41  ;;  %v251_v2 = vmul.f32 0.5, %v233_v40 }
  0xc3   : > { %v414_v6 = vrot.slane %v250_v61, %v413_v60  ;;  %v421_v12 = vrot.slane %v251_v2, %v420_v1 }
  0xc4   : > { %v236_v42 = vpop.xlane.xlu0 %235  ;;  %v239_v43 = vpop.xlane.xlu1 %238 }
  0xc5   : > { %v252_v9 = vmul.f32 0.5, %v236_v42  ;;  %v416_v18 = vsel %vm415_vm2, %v414_v6, %v409_v5  ;;  %v253_v24 = vmul.f32 0.5, %v239_v43 }
  0xc6   : > { %v423_v29 = vsel %vm422_vm3, %v421_v12, %v416_v18 }
  0xc7   : > { %v435_v36 = vrot.slane %v253_v24, %v434_v23 }
  0xc8   : > { %v242_v44 = vpop.xlane.xlu0 %241  ;;  %v1527_v45 = vpop.xlane.xlu1 %244 }
  0xc9   : > { %v254_v34 = vmul.f32 0.5, %v242_v44  ;;  %v255_v40 = vmul.f32 0.5, %v1527_v45  ;;  %v455_v44 = vsub.s32 %v452_v38, %v1534_v52 }
  0xcb   : > { %v442_v42 = vrot.slane %v254_v34, %v441_v33 }
  0xcc   : > { %v1529_v47 = vpop.xlane.xlu0 %247  ;;  %v605_v48 = vpop.permute.xlu1 %604 }
  0xcd   : > { %1287 = vmatpush3.bf16.msra.mxu1 %v605_v48  ;;  %v256_v48 = vmul.f32 0.5, %v1529_v47 }
  0xce   : > { %1288 = vmatprep.subr.bf16.mxu1 %v1401_v0 }
  0xcf   : > { %v456_v49 = vrot.slane %v256_v48, %v455_v44 }
  0xd0   : > { %v603_v50 = vpop.permute.xlu0 %602  ;;  %v601_v51 = vpop.permute.xlu1 %600 }
  0xd1   : > { %1289 = vmatpush3.bf16.msra.mxu1 %v603_v50  ;;  %v449_v50 = vrot.slane %v255_v40, %v448_v39 }
  0xd2   : > { %1290 = vmatprep.subr.bf16.mxu1 %v1401_v0 }
  0xd4   : > { %v266_v54 = vpop.permute.xlu0 %265  ;;  %v599_v56 = vpop.permute.xlu1 %598 }
  0xd5   : > { %v289_v57 = vsel %vm224_vm0, %v266_v54, 0.0  ;;  %1291 = vmatpush3.bf16.msra.mxu1 %v601_v51 }
  0xd6   : > { %290 = vadd.xlane.f32.xlu0 %v289_v57  ;;  %1292 = vmatprep.subr.bf16.mxu1 %v1401_v0  ;;  %v427_v0 = vsub.s32 %v424_v62, %v1534_v52 }
  0xd8   : > { %v270_v63 = vpop.permute.xlu0 %269  ;;  %v268_v3 = vpop.permute.xlu1 %267  ;;  %v428_v26 = vrot.slane %v252_v9, %v427_v0 }
  0xd9   : > { %v295_v4 = vsel %vm224_vm0, %v270_v63, 0.0  ;;  %v292_v7 = vsel %vm224_vm0, %v268_v3, 0.0  ;;  %1293 = vmatpush3.bf16.msra.mxu1 %v599_v56 }
  0xda   : > { %296 = vadd.xlane.f32.xlu0 %v295_v4  ;;  %293 = vadd.xlane.f32.xlu1 %v292_v7  ;;  %v430_v37 = vsel %vm429_vm4, %v428_v26, %v423_v29 }
  0xdb   : > { %v437_v46 = vsel %vm436_vm5, %v435_v36, %v430_v37 }
  0xdc   : > { %v274_v10 = vpop.permute.xlu0 %273  ;;  %v272_v15 = vpop.permute.xlu1 %271  ;;  %v444_v51 = vsel %vm443_vm6, %v442_v42, %v437_v46 }
  0xdd   : > { %v301_v16 = vsel %vm224_vm0, %v274_v10, 0.0  ;;  %v298_v21 = vsel %vm224_vm0, %v272_v15, 0.0  ;;  %v451_v53 = vsel %vm450_vm7, %v449_v50, %v444_v51 }
  0xde   : > { %299 = vadd.xlane.f32.xlu0 %v298_v21  ;;  %302 = vadd.xlane.f32.xlu1 %v301_v16  ;;  %v458_v55 = vsel %vm457_vm8, %v456_v49, %v451_v53 }
  0xe0   : > { %v278_v27 = vpop.permute.xlu0 %277  ;;  %v276_v31 = vpop.permute.xlu1 %275 }
  0xe1   : > { %v307_v32 = vsel %vm224_vm0, %v278_v27, 0.0  ;;  %v304_v35 = vsel %vm224_vm0, %v276_v31, 0.0 }
  0xe2   : > { %305 = vadd.xlane.f32.xlu0 %v304_v35  ;;  %308 = vadd.xlane.f32.xlu1 %v307_v32 }
  0xe4   : > { %v280_v41 = vpop.permute.xlu1 %279 }
  0xe5   : > { %v310_v43 = vsel %vm224_vm0, %v280_v41, 0.0 }
  0xe6   : > { %311 = vadd.xlane.f32.xlu0 %v310_v43 }
  0xef   : > { %v390_v54 = vpop.f32.mrf.mxu0 }
  0xf0   : > { %v472_v45 = vsub.f32 %v390_v54, %v458_v55 }
  0xf1   : > { %v1274_v56 = vpop.f32.mrf.mxu0 }
  0xf2   : > { %v473_v57 = vmul.f32 1.442695, %v472_v45 }
  0xf3   : > { %v393_v58 = vpop.f32.mrf.mxu0 }
  0xf4   : > { %1359 = vpow2.f32 %v473_v57 }
  0xf5   : > { %v1275_v59 = vpop.f32.mrf.mxu0 }
 0x101   : > { %v1360_v60 = vpop.eup %1359 }
 0x102   : > { %v475_v61 = vmul.f32 0.35355338, %v1360_v60 }
 0x104   : > { %v594_v52 = vsel %vm593_vm9, %v475_v61, 0.0  ;;  %v597_v62 = vpack.c.bf16 %v475_v61, %v475_v61 }
 0x105   : > { %595 = vadd.xlane.f32.xlu1 %v594_v52 }
 0x106   : > { %1295 = vmatmul.mubr.msk.bf16.vlgmr.msra.gmra.mxu1 %vm593_vm9, %v597_v62 }
 0x147   : > { %v1280_v47 = vpop.f32.mrf.mxu1 }
 0x149   : > { %v530_v63 = vpop.f32.mrf.mxu1 }
 0x14b   : > { %v1281_v3 = vpop.f32.mrf.mxu1 }
 0x14d   : > { %v533_v8 = vpop.f32.mrf.mxu1 }
 0x14f   : > { %v1284_v16 = vpop.f32.mrf.mxu1 }
 0x151   : > { %v546_v23 = vpop.f32.mrf.mxu1 }
 0x153   : > { %v1285_v33 = vpop.f32.mrf.mxu1 }
 0x155   : > { %v549_v41 = vpop.f32.mrf.mxu1 }
 0x15f   : > { %v291_v1 = vpop.xlane.xlu0 %290 }
 0x160   : > { %v313_v2 = vmul.f32 0.5, %v291_v1 }
 0x162   : > { %v561_v4 = vsub.f32 %v530_v63, %v313_v2 }
 0x163   : > { %v294_v6 = vpop.xlane.xlu1 %293  ;;  %v297_v10 = vpop.xlane.xlu0 %296 }
 0x164   : > { %v569_v5 = vmul.f32 1.442695, %v561_v4  ;;  %v314_v7 = vmul.f32 0.5, %v294_v6  ;;  %v315_v21 = vmul.f32 0.5, %v297_v10 }
 0x166   : > { %1361 = vpow2.f32 %v569_v5  ;;  %v562_v0 = vsub.f32 %v533_v8, %v314_v7  ;;  %v563_v30 = vsub.f32 %v1280_v47, %v315_v21 }
 0x167   : > { %v300_v12 = vpop.xlane.xlu0 %299  ;;  %v303_v20 = vpop.xlane.xlu1 %302 }
 0x168   : > { %v571_v9 = vmul.f32 1.442695, %v562_v0  ;;  %v316_v27 = vmul.f32 0.5, %v300_v12  ;;  %v317_v31 = vmul.f32 0.5, %v303_v20  ;;  %v573_v37 = vmul.f32 1.442695, %v563_v30 }
 0x16a   : > { %1363 = vpow2.f32 %v571_v9  ;;  %v564_v35 = vsub.f32 %v1281_v3, %v316_v27  ;;  %v565_v38 = vsub.f32 %v546_v23, %v317_v31  ;;  %v1405_v9 = vmov 0  }
 0x16b   : > { %v306_v24 = vpop.xlane.xlu0 %305  ;;  %v309_v32 = vpop.xlane.xlu1 %308  ;;  %1365 = vpow2.f32 %v573_v37  ;;  %1349 = vset.pattern.permute.xlu1 %v1405_v9  ;;  %1348 = vset.pattern.permute.xlu0 %v1405_v9 }
 0x16c   : > { %v318_v36 = vmul.f32 0.5, %v306_v24  ;;  %v319_v39 = vmul.f32 0.5, %v309_v32  ;;  %v575_v42 = vmul.f32 1.442695, %v564_v35  ;;  %v577_v44 = vmul.f32 1.442695, %v565_v38 }
 0x16e   : > { %v566_v43 = vsub.f32 %v549_v41, %v318_v36  ;;  %v567_v48 = vsub.f32 %v1284_v16, %v319_v39  ;;  %1367 = vpow2.f32 %v575_v42  ;;  %v1354_v36 = vld [vmem:[%s1620_s2] sm:$0xff]  }
 0x16f   : > { %v312_v40 = vpop.xlane.xlu0 %311  ;;  %1369 = vpow2.f32 %v577_v44 }
 0x170   : > { %v320_v46 = vmul.f32 0.5, %v312_v40  ;;  %v579_v50 = vmul.f32 1.442695, %v566_v43  ;;  %v581_v49 = vmul.f32 1.442695, %v567_v48 }
 0x172   : > { %v568_v51 = vsub.f32 %v1285_v33, %v320_v46  ;;  %1371 = vpow2.f32 %v579_v50 }
 0x173   : > { %v1362_v15 = vpop.eup %1361  ;;  %1373 = vpow2.f32 %v581_v49 }
 0x174   : > { %v585_v18 = vmul.f32 0.35355338, %v1362_v15  ;;  %v583_v53 = vmul.f32 1.442695, %v568_v51 }
 0x176   : > { %1310 = vmatprep.mubr.msk.f32.mxu0 %vm658_vm10, %v585_v18  ;;  %1375 = vpow2.f32 %v583_v53 }
 0x177   : > { %v1364_v26 = vpop.eup %1363 }
 0x178   : > { %v586_v29 = vmul.f32 0.35355338, %v1364_v26  ;;  %v1366_v54 = vpop.eup %1365 }
 0x179   : > { %v587_v56 = vmul.f32 0.35355338, %v1366_v54 }
 0x17a   : > { %v653_v34 = vpack.c.bf16 %v586_v29, %v585_v18 }
 0x17b   : > { %v1368_v45 = vpop.eup %1367 }
 0x17c   : > { %1300 = vmatprep.mubr.msk.bf16.mxu1 %vm658_vm10, %v653_v34  ;;  %v1370_v57 = vpop.eup %1369  ;;  %v588_v58 = vmul.f32 0.35355338, %v1368_v45 }
 0x17d   : > { %v589_v60 = vmul.f32 0.35355338, %v1370_v57 }
 0x17e   : > { %v654_v6 = vpack.c.bf16 %v588_v58, %v587_v56 }
 0x17f   : > { %v1372_v59 = vpop.eup %1371 }
 0x180   : > { %v1374_v61 = vpop.eup %1373  ;;  %v590_v52 = vmul.f32 0.35355338, %v1372_v59 }
 0x181   : > { %v591_v47 = vmul.f32 0.35355338, %v1374_v61 }
 0x182   : > { %v655_v8 = vpack.c.bf16 %v590_v52, %v589_v60 }
 0x183   : > { %v1376_v62 = vpop.eup %1375 }
 0x184   : > { %v592_v63 = vmul.f32 0.35355338, %v1376_v62 }
 0x186   : > { %v656_v0 = vpack.c.bf16 %v592_v63, %v591_v47 }
 0x18e   : > { %v596_v55 = vpop.xlane.xlu1 %595 }
 0x18f   : > { %1308 = vmatprep.subr.mxu0 %v596_v55 }
 0x190   : > { %1309 = vmatpush3.msra.mxu0 %v596_v55 }
 0x191   : > { %1311 = vmatmul.mubr.msk.f32.vlgmr.msra.gmra.mxu0 %vm658_vm10, %v586_v29 }
 0x192   : > { %1313 = vmatprep.mubr.msk.f32.mxu0 %vm658_vm10, %v587_v56 }
 0x195   : > { %1314 = vmatmul.mubr.msk.f32.gmra.mxu0 %vm658_vm10, %v588_v58 }
 0x196   : > { %1316 = vmatprep.mubr.msk.f32.mxu0 %vm658_vm10, %v589_v60 }
 0x199   : > { %1317 = vmatmul.mubr.msk.f32.gmra.mxu0 %vm658_vm10, %v590_v52 }
 0x19a   : > { %1319 = vmatprep.mubr.msk.f32.mxu0 %vm658_vm10, %v591_v47 }
 0x19d   : > { %1320 = vmatmul.mubr.msk.f32.gmra.mxu0 %vm658_vm10, %v592_v63 }
 0x1c6   : > { %v647_v1 = vpop.f32.mrf.mxu1 }
 0x1c7   : > { %v657_v2 = vpack.c.bf16 %v647_v1, %v647_v1 }
 0x1c8   : > { %v1296_v3 = vpop.f32.mrf.mxu1 }
 0x1c9   : > { %v673_v4 = vsel %vm671_vm11, %v657_v2, 0  ;;  %1333 = vmatprep.subr.msk.bf16.mxu1 %vm671_vm11, %v657_v2 }
 0x1ca   : > { %v650_v5 = vpop.f32.mrf.mxu1  ;;  %1299 = vmatpush3.bf16.msra.mxu1 %v673_v4 }
 0x1cb   : > { %1322 = vmatprep.subr.bf16.mxu1 %v1354_v36 }
 0x1cc   : > { %v1297_v7 = vpop.f32.mrf.mxu1 }
 0x1cd   : > { %1301 = vmatmul.mubr.msk.bf16.vlgmr.msra.gmra.mxu1 %vm658_vm10, %v654_v6 }
 0x1ce   : > { %1304 = vmatprep.mubr.msk.bf16.mxu1 %vm658_vm10, %v655_v8  ;;  %1323 = vmatpush3.bf16.msra.mxu1 %v1354_v36  ;;  %v1204_v8 = vld [vmem:[%s1621_s3] ss:$0 sm:$0xff] }
 0x1d5   : > { %1305 = vmatmul.mubr.msk.bf16.gmra.mxu1 %vm658_vm10, %v656_v0 }
 0x251   : > { %v1312_v10 = vpop.f32.mrf.mxu0 }
 0x252   : > { %v836_v12 = vadd.f32 1e-08, %v1312_v10 }
 0x253   : > { %v830_v15 = vpop.f32.mrf.mxu0 }
 0x254   : > { %1377 = vrcp.f32 %v836_v12  ;;  %v831_v16 = vadd.f32 1e-08, %v830_v15 }
 0x255   : > { %v1315_v18 = vpop.f32.mrf.mxu0 }
 0x256   : > { %1379 = vrcp.f32 %v831_v16  ;;  %v846_v20 = vadd.f32 1e-08, %v1315_v18 }
 0x257   : > { %v840_v21 = vpop.f32.mrf.mxu0 }
 0x258   : > { %1381 = vrcp.f32 %v846_v20  ;;  %v841_v23 = vadd.f32 1e-08, %v840_v21 }
 0x259   : > { %v1318_v24 = vpop.f32.mrf.mxu0 }
 0x25a   : > { %1383 = vrcp.f32 %v841_v23  ;;  %v856_v27 = vadd.f32 1e-08, %v1318_v24 }
 0x25b   : > { %v850_v26 = vpop.f32.mrf.mxu0 }
 0x25c   : > { %1385 = vrcp.f32 %v856_v27  ;;  %v851_v30 = vadd.f32 1e-08, %v850_v26 }
 0x25d   : > { %v1321_v29 = vpop.f32.mrf.mxu0 }
 0x25e   : > { %1387 = vrcp.f32 %v851_v30  ;;  %v866_v37 = vadd.f32 1e-08, %v1321_v29 }
 0x25f   : > { %v860_v32 = vpop.f32.mrf.mxu0 }
 0x260   : > { %v861_v34 = vadd.f32 1e-08, %v860_v32 }
 0x261   : > { %v1378_v31 = vpop.eup %1377 }
 0x262   : > { %884 = vperm.xlu1 %1349, %v1378_v31   ;;  %1389 = vrcp.f32 %v861_v34 }
 0x263   : > { %v1380_v33 = vpop.eup %1379  ;;  %1391 = vrcp.f32 %v866_v37 }
 0x264   : > { %879 = vperm.xlu0 %1348, %v1380_v33  }
 0x265   : > { %v1382_v35 = vpop.eup %1381 }
 0x266   : > { %894 = vperm.xlu1 %1349, %v1382_v35  }
 0x267   : > { %v1384_v38 = vpop.eup %1383 }
 0x269   : > { %v1386_v39 = vpop.eup %1385 }
 0x26a   : > { %889 = vperm.xlu1 %1349, %v1384_v38  }
 0x26b   : > { %v1388_v40 = vpop.eup %1387 }
 0x26e   : > { %904 = vperm.xlu1 %1349, %v1386_v39  }
 0x26f   : > { %v1390_v41 = vpop.eup %1389 }
 0x270   : > { %v1392_v42 = vpop.eup %1391 }
 0x272   : > { %899 = vperm.xlu1 %1349, %v1388_v40  }
 0x276   : > { %909 = vperm.xlu1 %1349, %v1390_v41  }
 0x27a   : > { %914 = vperm.xlu1 %1349, %v1392_v42  }
 0x28d   : > { %v1302_v43 = vpop.f32.mrf.mxu1 }
 0x28f   : > { %v709_v46 = vpop.f32.mrf.mxu1 }
 0x291   : > { %v1303_v44 = vpop.f32.mrf.mxu1 }
 0x293   : > { %v712_v48 = vpop.f32.mrf.mxu1 }
 0x295   : > { %v1306_v54 = vpop.f32.mrf.mxu1 }
 0x297   : > { %v725_v56 = vpop.f32.mrf.mxu1 }
 0x299   : > { %v1307_v61 = vpop.f32.mrf.mxu1 }
 0x29b   : > { %v728_v62 = vpop.f32.mrf.mxu1 }
 0x2dd   : > { %v885_v50 = vpop.permute.xlu1 %884 }
 0x2de   : > { %v918_v49 = vmul.f32 %v885_v50, %v712_v48 }
 0x2df   : > { %v880_v51 = vpop.permute.xlu0 %879 }
 0x2e0   : > { %v917_v53 = vmul.f32 %v880_v51, %v709_v46 }
 0x2e1   : > { %v895_v55 = vpop.permute.xlu1 %894 }
 0x2e2   : > { %v925_v45 = vpack.c.bf16 %v918_v49, %v917_v53  ;;  %v920_v58 = vmul.f32 %v1303_v44, %v895_v55 }
 0x2e4   : > { %1324 = vmatprep.mubr.msk.bf16.mxu1 %vm224_vm0, %v925_v45 }
 0x2e5   : > { %v890_v57 = vpop.permute.xlu1 %889 }
 0x2e6   : > { %v919_v59 = vmul.f32 %v1302_v43, %v890_v57 }
 0x2e8   : > { %v926_v60 = vpack.c.bf16 %v920_v58, %v919_v59 }
 0x2e9   : > { %v905_v52 = vpop.permute.xlu1 %904 }
 0x2ea   : > { %1325 = vmatmul.mubr.msk.bf16.vlgmr.msra.gmra.mxu1 %vm224_vm0, %v926_v60  ;;  %v922_v63 = vmul.f32 %v905_v52, %v728_v62 }
 0x2ed   : > { %v900_v47 = vpop.permute.xlu1 %899 }
 0x2ee   : > { %v921_v1 = vmul.f32 %v900_v47, %v725_v56 }
 0x2f0   : > { %v927_v2 = vpack.c.bf16 %v922_v63, %v921_v1 }
 0x2f1   : > { %v910_v3 = vpop.permute.xlu1 %909 }
 0x2f2   : > { %1328 = vmatprep.mubr.msk.bf16.mxu1 %vm224_vm0, %v927_v2  ;;  %v923_v5 = vmul.f32 %v1306_v54, %v910_v3 }
 0x2f5   : > { %v915_v4 = vpop.permute.xlu1 %914 }
 0x2f6   : > { %v924_v6 = vmul.f32 %v1307_v61, %v915_v4 }
 0x2f8   : > { %v928_v7 = vpack.c.bf16 %v924_v6, %v923_v5 }
 0x2fa   : > { %1329 = vmatmul.mubr.msk.bf16.gmra.mxu1 %vm224_vm0, %v928_v7 }
 0x3aa   : > { %v1326_v0 = vpop.f32.mrf.mxu1 }
 0x3ab   : > { %v999_v9 = vadd.f32 %v1326_v0, %v1204_v8 }
 0x3ac   : > { %v990_v10 = vpop.f32.mrf.mxu1 }
 0x3ad   : > { %1033 = vrot.lane.b32.xlu1 %v999_v9, %s1406_s29  ;;  %v991_v15 = vadd.f32 %v1204_v8, %v990_v10 }
 0x3ae   : > { %v1327_v12 = vpop.f32.mrf.mxu1 }
 0x3af   : > { %v1002_v16 = vadd.f32 %v1327_v12, %v1204_v8 }
 0x3b0   : > { %v993_v18 = vpop.f32.mrf.mxu1 }
 0x3b1   : > { %1035 = vrot.lane.b32.xlu0 %v1002_v16, %s1406_s29  ;;  %1029 = vrot.lane.b32.xlu1 %v991_v15, %s1406_s29  ;;  %v994_v20 = vadd.f32 %v1204_v8, %v993_v18 }
 0x3b5   : > { %1031 = vrot.lane.b32.xlu0 %v994_v20, %s1406_s29 }
 0x3ba   : > { %v1330_v21 = vpop.f32.mrf.mxu1 }
 0x3bb   : > { %v1015_v29 = vadd.f32 %v1330_v21, %v1204_v8 }
 0x3bc   : > { %v1006_v23 = vpop.f32.mrf.mxu1 }
 0x3bd   : > { %v1007_v24 = vadd.f32 %v1204_v8, %v1006_v23 }
 0x3be   : > { %v1331_v26 = vpop.f32.mrf.mxu1 }
 0x3bf   : > { %1037 = vrot.lane.b32.xlu1 %v1007_v24, %s1406_s29  ;;  %v1018_v31 = vadd.f32 %v1331_v26, %v1204_v8 }
 0x3c0   : > { %v1009_v27 = vpop.f32.mrf.mxu1 }
 0x3c1   : > { %v1010_v30 = vadd.f32 %v1204_v8, %v1009_v27 }
 0x3c3   : > { %1039 = vrot.lane.b32.xlu0 %v1010_v30, %s1406_s29  ;;  %1041 = vrot.lane.b32.xlu1 %v1015_v29, %s1406_s29 }
 0x3c7   : > { %1043 = vrot.lane.b32.xlu0 %v1018_v31, %s1406_s29 }
 0x41f   : > { %v1034_v32 = vpop.permute.xlu1 %1033 }
 0x420   : > { %v1055_v33 = vadd.f32 %v1034_v32, %v1472_v13 }
 0x422   : > { %v1224_v34 = vpack.c.bf16 %v1055_v33, %v1055_v33 }
 0x423   : > { %v1036_v35 = vpop.permute.xlu0 %1035  ;;  %v1030_v36 = vpop.permute.xlu1 %1029 }
 0x424   : > { %v1056_v37 = vadd.f32 %v1036_v35, %v1480_v17  ;;  %v1053_v38 = vadd.f32 %v1030_v36, %v1468_v11  ;;  %1089 = vrot.lane.b32.xlu1 %v1224_v34, %s1404_s24 }
 0x426   : > { %v1225_v39 = vpack.c.bf16 %v1056_v37, %v1056_v37  ;;  %v1222_v40 = vpack.c.bf16 %v1053_v38, %v1053_v38 }
 0x427   : > { %v1032_v41 = vpop.permute.xlu0 %1031 }
 0x428   : > { %v1054_v42 = vadd.f32 %v1032_v41, %v1474_v14  ;;  %1091 = vrot.lane.b32.xlu0 %v1225_v39, %s1404_s24  ;;  %1085 = vrot.lane.b32.xlu1 %v1222_v40, %s1404_s24 }
 0x42a   : > { %v1223_v43 = vpack.c.bf16 %v1054_v42, %v1054_v42 }
 0x42c   : > { %1087 = vrot.lane.b32.xlu0 %v1223_v43, %s1404_s24 }
 0x431   : > { %v1038_v13 = vpop.permute.xlu1 %1037 }
 0x432   : > { %v1057_v17 = vadd.f32 %v1038_v13, %v1484_v19 }
 0x434   : > { %v1226_v46 = vpack.c.bf16 %v1057_v17, %v1057_v17 }
 0x435   : > { %v1040_v11 = vpop.permute.xlu0 %1039  ;;  %v1042_v44 = vpop.permute.xlu1 %1041 }
 0x436   : > { %v1058_v48 = vadd.f32 %v1040_v11, %v1489_v22  ;;  %v1059_v50 = vadd.f32 %v1042_v44, %v1494_v25  ;;  %1093 = vrot.lane.b32.xlu1 %v1226_v46, %s1404_s24 }
 0x438   : > { %v1227_v14 = vpack.c.bf16 %v1058_v48, %v1058_v48  ;;  %v1228_v51 = vpack.c.bf16 %v1059_v50, %v1059_v50 }
 0x439   : > { %v1044_v49 = vpop.permute.xlu0 %1043 }
 0x43a   : > { %v1060_v53 = vadd.f32 %v1044_v49, %v1499_v28  ;;  %1095 = vrot.lane.b32.xlu0 %v1227_v14, %s1404_s24  ;;  %1097 = vrot.lane.b32.xlu1 %v1228_v51, %s1404_s24 }
 0x43c   : > { %v1229_v54 = vpack.c.bf16 %v1060_v53, %v1060_v53 }
 0x43e   : > { %1099 = vrot.lane.b32.xlu0 %v1229_v54, %s1404_s24 }
 0x496   : > { %v1090_v19 = vpop.permute.xlu1 %1089 }
 0x497   : > { %1112 = vst.msk [vmem:[%s197_s6 + $0x8] sm:$0xf] %vm1109_vm12, %v1090_v19 }
 0x49a   : > { %v1092_v22 = vpop.permute.xlu0 %1091  ;;  %v1086_v25 = vpop.permute.xlu1 %1085 }
 0x49b   : > { %1113 = vst.msk [vmem:[%s197_s6 + $0xc] sm:$0xf] %vm1109_vm12, %v1092_v22  ;;  %1110 = vst.msk [vmem:[%s197_s6] sm:$0xf] %vm1109_vm12, %v1086_v25 }
 0x49e   : > { %v1088_v28 = vpop.permute.xlu0 %1087 }
 0x49f   : > { %1111 = vst.msk [vmem:[%s197_s6 + $0x4] sm:$0xf] %vm1109_vm12, %v1088_v28 }
 0x4a8   : > { %v1094_v55 = vpop.permute.xlu1 %1093 }
 0x4a9   : > { %1114 = vst.msk [vmem:[%s197_s6 + $0x10] sm:$0xf] %vm1109_vm12, %v1094_v55 }
 0x4ac   : > { %v1096_v45 = vpop.permute.xlu0 %1095  ;;  %v1098_v56 = vpop.permute.xlu1 %1097 }
 0x4ad   : > { %1115 = vst.msk [vmem:[%s197_s6 + $0x14] sm:$0xf] %vm1109_vm12, %v1096_v45  ;;  %1116 = vst.msk [vmem:[%s197_s6 + $0x18] sm:$0xf] %vm1109_vm12, %v1098_v56 }
 0x4b0   : > { %v1100_v57 = vpop.permute.xlu0 %1099 }
 0x4b1   : > { %1117 = vst.msk [vmem:[%s197_s6 + $0x1c] sm:$0xf] %vm1109_vm12, %v1100_v57 }
 0x4b2 PF: > { %s14_s15 = sadd.s32 1, %s1399_s15  }
 0x4b3   : > { %p11_p4 = scmp.ge.s32.totalorder %s14_s15, 4  }
 0x4b5   :  { %13 = sbr.rel (!%p11_p4) target bundleno = 1 (0x1), region = 66 }

// kernel: t2t_vit_forward.14
= control target key start
LH: loop header
LB: loop body
LE: loop exit
PB: predicated region body
PF: predicated region fallthrough
CT: control target
= control target key end

     0   :  { %vm61_vm0 = vcmask 130048   ;;  %vm1163_vm1 = vcmask 125952   ;;  %s2235_s0 = inlined_call_operand.vmem [shape: bf16[128,16], index: 0, kind: input, shape index: {}]   ;;  %s2236_s3 = inlined_call_operand.vmem [shape: bf16[16,16], index: 3, kind: input, shape index: {}]   ;;  %s2237_s1 = inlined_call_operand.vmem [shape: f32[1,16], index: 1, kind: input, shape index: {}]   ;;  %s2238_s2 = inlined_call_operand.vmem [shape: f32[1,16], index: 2, kind: input, shape index: {}]   ;;  %s2239_s5 = inlined_call_operand.vmem [shape: bf16[16,16], index: 5, kind: input, shape index: {}]   ;;  %s2240_s4 = inlined_call_operand.vmem [shape: f32[1,16], index: 4, kind: input, shape index: {}]   ;;  %s2241_s6 = inlined_call_operand.vmem [shape: f32[1,16], index: 6, kind: input, shape index: {}]   ;;  %s2242_s7 = inlined_call_operand.vmem [shape: bf16[128,16], index: 7, kind: output, shape index: {}]  }
   0x1   :  { %v1255_v0 = vld [vmem:[%s2235_s0] sm:$0xff]   ;;  %v1286_v1 = vld [vmem:[%s2235_s0 + $0x8] sm:$0xff]   ;;  %v1287_v6 = vld [vmem:[%s2235_s0 + $0x10] sm:$0xff]  }
   0x2   :  { %v1459_v2 = vunpack.c.l.bf16 %v1255_v0  ;;  %v1461_v3 = vunpack.c.l.bf16 %v1286_v1  ;;  %v1463_v4 = vunpack.c.h.bf16 %v1255_v0  ;;  %v1465_v5 = vunpack.c.h.bf16 %v1286_v1  ;;  %v1288_v13 = vld [vmem:[%s2235_s0 + $0x18] sm:$0xff]   ;;  %v1289_v18 = vld [vmem:[%s2235_s0 + $0x20] sm:$0xff]   ;;  %v1290_v23 = vld [vmem:[%s2235_s0 + $0x28] sm:$0xff]  }
   0x3   :  { %v1478_v11 = vunpack.c.l.bf16 %v1287_v6  ;;  %v1480_v12 = vunpack.c.h.bf16 %v1287_v6  ;;  %v1489_v16 = vunpack.c.l.bf16 %v1288_v13  ;;  %v1491_v17 = vunpack.c.h.bf16 %v1288_v13  ;;  %v1291_v28 = vld [vmem:[%s2235_s0 + $0x30] sm:$0xff]   ;;  %v1292_v33 = vld [vmem:[%s2235_s0 + $0x38] sm:$0xff]  }
   0x4   :  { %2274 = vst [vmem:[#allocation2_spill] sm:$0xff] %v1459_v2  ;;  %2275 = vst [vmem:[#allocation3_spill] sm:$0xff] %v1461_v3  ;;  %v62_v7 = vsel %vm61_vm0, %v1459_v2, 0.0  ;;  %v68_v8 = vsel %vm61_vm0, %v1461_v3, 0.0  ;;  %v65_v9 = vsel %vm61_vm0, %v1463_v4, 0.0  ;;  %v71_v10 = vsel %vm61_vm0, %v1465_v5, 0.0 }
   0x5   :  { %2276 = vst [vmem:[#allocation4_spill] sm:$0xff] %v1463_v4  ;;  %2277 = vst [vmem:[#allocation5_spill] sm:$0xff] %v1465_v5  ;;  %63 = vadd.xlane.f32.xlu0 %v62_v7  ;;  %69 = vadd.xlane.f32.xlu1 %v68_v8  ;;  %v74_v14 = vsel %vm61_vm0, %v1478_v11, 0.0  ;;  %v77_v15 = vsel %vm61_vm0, %v1480_v12, 0.0  ;;  %v80_v19 = vsel %vm61_vm0, %v1489_v16, 0.0  ;;  %v83_v20 = vsel %vm61_vm0, %v1491_v17, 0.0 }
   0x6   :  { %2278 = vst [vmem:[#allocation6_spill] sm:$0xff] %v1478_v11  ;;  %2279 = vst [vmem:[#allocation7_spill] sm:$0xff] %v1480_v12  ;;  %v1500_v21 = vunpack.c.l.bf16 %v1289_v18  ;;  %v1502_v22 = vunpack.c.h.bf16 %v1289_v18  ;;  %v1511_v26 = vunpack.c.l.bf16 %v1290_v23  ;;  %v1513_v27 = vunpack.c.h.bf16 %v1290_v23 }
   0x7   :  { %2280 = vst [vmem:[#allocation8_spill] sm:$0xff] %v1489_v16  ;;  %2281 = vst [vmem:[#allocation9_spill] sm:$0xff] %v1491_v17  ;;  %v1522_v31 = vunpack.c.l.bf16 %v1291_v28  ;;  %v1524_v32 = vunpack.c.h.bf16 %v1291_v28  ;;  %v1533_v36 = vunpack.c.l.bf16 %v1292_v33  ;;  %v1535_v37 = vunpack.c.h.bf16 %v1292_v33 }
   0x8   :  { %2282 = vst [vmem:[#allocation10_spill] sm:$0xff] %v1500_v21  ;;  %2283 = vst [vmem:[#allocation11_spill] sm:$0xff] %v1502_v22  ;;  %v86_v24 = vsel %vm61_vm0, %v1500_v21, 0.0  ;;  %v89_v25 = vsel %vm61_vm0, %v1502_v22, 0.0  ;;  %v92_v29 = vsel %vm61_vm0, %v1511_v26, 0.0  ;;  %v95_v30 = vsel %vm61_vm0, %v1513_v27, 0.0 }
   0x9   :  { %66 = vadd.xlane.f32.xlu0 %v65_v9  ;;  %72 = vadd.xlane.f32.xlu1 %v71_v10  ;;  %2284 = vst [vmem:[#allocation12_spill] sm:$0xff] %v1511_v26  ;;  %2285 = vst [vmem:[#allocation13_spill] sm:$0xff] %v1513_v27  ;;  %v98_v34 = vsel %vm61_vm0, %v1522_v31, 0.0  ;;  %v101_v35 = vsel %vm61_vm0, %v1524_v32, 0.0  ;;  %v104_v38 = vsel %vm61_vm0, %v1533_v36, 0.0  ;;  %v107_v39 = vsel %vm61_vm0, %v1535_v37, 0.0 }
   0xa   :  { %2286 = vst [vmem:[#allocation14_spill] sm:$0xff] %v1522_v31  ;;  %2287 = vst [vmem:[#allocation15_spill] sm:$0xff] %v1524_v32 }
   0xb   :  { %2288 = vst [vmem:[#allocation16_spill] sm:$0xff] %v1533_v36  ;;  %2289 = vst [vmem:[#allocation17_spill] sm:$0xff] %v1535_v37 }
   0xd   :  { %75 = vadd.xlane.f32.xlu0 %v74_v14  ;;  %78 = vadd.xlane.f32.xlu1 %v77_v15 }
  0x11   :  { %81 = vadd.xlane.f32.xlu0 %v80_v19  ;;  %84 = vadd.xlane.f32.xlu1 %v83_v20 }
  0x15   :  { %87 = vadd.xlane.f32.xlu0 %v86_v24  ;;  %90 = vadd.xlane.f32.xlu1 %v89_v25 }
  0x19   :  { %93 = vadd.xlane.f32.xlu0 %v92_v29  ;;  %96 = vadd.xlane.f32.xlu1 %v95_v30 }
  0x1d   :  { %99 = vadd.xlane.f32.xlu0 %v98_v34  ;;  %102 = vadd.xlane.f32.xlu1 %v101_v35 }
  0x21   :  { %105 = vadd.xlane.f32.xlu0 %v104_v38  ;;  %108 = vadd.xlane.f32.xlu1 %v107_v39 }
  0x8e   :  { %v64_v40 = vpop.xlane.xlu0 %63  ;;  %v70_v41 = vpop.xlane.xlu1 %69 }
  0x8f   :  { %v111_v42 = vmul.f32 0.0625, %v64_v40  ;;  %v113_v43 = vmul.f32 0.0625, %v70_v41 }
  0x91   :  { %v1542_v44 = vsub.f32 %v1459_v2, %v111_v42  ;;  %v1545_v45 = vsub.f32 %v1461_v3, %v113_v43 }
  0x92   :  { %v67_v46 = vpop.xlane.xlu0 %66  ;;  %v73_v47 = vpop.xlane.xlu1 %72 }
  0x93   :  { %v112_v48 = vmul.f32 0.0625, %v67_v46  ;;  %v114_v49 = vmul.f32 0.0625, %v73_v47  ;;  %v143_v50 = vmul.f32 %v1542_v44, %v1542_v44  ;;  %v145_v51 = vmul.f32 %v1545_v45, %v1545_v45 }
  0x95   :  { %v1552_v52 = vsub.f32 %v1463_v4, %v112_v48  ;;  %v1555_v53 = vsub.f32 %v1465_v5, %v114_v49  ;;  %v159_v54 = vsel %vm61_vm0, %v143_v50, 0.0  ;;  %v165_v57 = vsel %vm61_vm0, %v145_v51, 0.0 }
  0x96   :  { %160 = vadd.xlane.f32.xlu0 %v159_v54  ;;  %v76_v55 = vpop.xlane.xlu0 %75  ;;  %v79_v56 = vpop.xlane.xlu1 %78 }
  0x97   :  { %v115_v58 = vmul.f32 0.0625, %v76_v55  ;;  %v116_v59 = vmul.f32 0.0625, %v79_v56  ;;  %v144_v60 = vmul.f32 %v1552_v52, %v1552_v52  ;;  %v146_v61 = vmul.f32 %v1555_v53, %v1555_v53 }
  0x99   :  { %v1564_v62 = vsub.f32 %v1478_v11, %v115_v58  ;;  %v1567_v63 = vsub.f32 %v1480_v12, %v116_v59  ;;  %v162_v0 = vsel %vm61_vm0, %v144_v60, 0.0  ;;  %v168_v7 = vsel %vm61_vm0, %v146_v61, 0.0 }
  0x9a   :  { %166 = vadd.xlane.f32.xlu0 %v165_v57  ;;  %163 = vadd.xlane.f32.xlu1 %v162_v0  ;;  %v82_v1 = vpop.xlane.xlu0 %81  ;;  %v85_v6 = vpop.xlane.xlu1 %84 }
  0x9b   :  { %v117_v8 = vmul.f32 0.0625, %v82_v1  ;;  %v118_v9 = vmul.f32 0.0625, %v85_v6  ;;  %v147_v10 = vmul.f32 %v1564_v62, %v1564_v62  ;;  %v148_v13 = vmul.f32 %v1567_v63, %v1567_v63 }
  0x9d   :  { %v1576_v14 = vsub.f32 %v1489_v16, %v117_v8  ;;  %v1579_v15 = vsub.f32 %v1491_v17, %v118_v9  ;;  %v171_v18 = vsel %vm61_vm0, %v147_v10, 0.0  ;;  %v174_v23 = vsel %vm61_vm0, %v148_v13, 0.0 }
  0x9e   :  { %169 = vadd.xlane.f32.xlu1 %v168_v7  ;;  %172 = vadd.xlane.f32.xlu0 %v171_v18  ;;  %v88_v19 = vpop.xlane.xlu0 %87  ;;  %v91_v20 = vpop.xlane.xlu1 %90 }
  0x9f   :  { %v119_v24 = vmul.f32 0.0625, %v88_v19  ;;  %v120_v25 = vmul.f32 0.0625, %v91_v20  ;;  %v149_v28 = vmul.f32 %v1576_v14, %v1576_v14  ;;  %v150_v29 = vmul.f32 %v1579_v15, %v1579_v15 }
  0xa1   :  { %v1588_v30 = vsub.f32 %v1500_v21, %v119_v24  ;;  %v1591_v33 = vsub.f32 %v1502_v22, %v120_v25  ;;  %v177_v34 = vsel %vm61_vm0, %v149_v28, 0.0  ;;  %v180_v39 = vsel %vm61_vm0, %v150_v29, 0.0  ;;  %v1347_v28 = vld [vmem:[%s2236_s3] sm:$0xff]  }
  0xa2   :  { %175 = vadd.xlane.f32.xlu1 %v174_v23  ;;  %178 = vadd.xlane.f32.xlu0 %v177_v34  ;;  %v94_v35 = vpop.xlane.xlu0 %93  ;;  %v97_v38 = vpop.xlane.xlu1 %96 }
  0xa3   :  { %v121_v40 = vmul.f32 0.0625, %v94_v35  ;;  %v122_v41 = vmul.f32 0.0625, %v97_v38  ;;  %v151_v42 = vmul.f32 %v1588_v30, %v1588_v30  ;;  %v152_v43 = vmul.f32 %v1591_v33, %v1591_v33  ;;  %1311 = vmatprep.subr.bf16.mxu0 %v1347_v28 }
  0xa4   :  { %1312 = vmatpush3.bf16.msra.mxu0 %v1347_v28 }
  0xa5   :  { %v1600_v46 = vsub.f32 %v1511_v26, %v121_v40  ;;  %v1603_v47 = vsub.f32 %v1513_v27, %v122_v41  ;;  %v183_v48 = vsel %vm61_vm0, %v151_v42, 0.0  ;;  %v186_v51 = vsel %vm61_vm0, %v152_v43, 0.0 }
  0xa6   :  { %181 = vadd.xlane.f32.xlu1 %v180_v39  ;;  %184 = vadd.xlane.f32.xlu0 %v183_v48  ;;  %v100_v49 = vpop.xlane.xlu0 %99  ;;  %v103_v50 = vpop.xlane.xlu1 %102 }
  0xa7   :  { %v123_v54 = vmul.f32 0.0625, %v100_v49  ;;  %v124_v55 = vmul.f32 0.0625, %v103_v50  ;;  %v153_v56 = vmul.f32 %v1600_v46, %v1600_v46  ;;  %v154_v57 = vmul.f32 %v1603_v47, %v1603_v47 }
  0xa9   :  { %v1612_v58 = vsub.f32 %v1522_v31, %v123_v54  ;;  %v1615_v59 = vsub.f32 %v1524_v32, %v124_v55  ;;  %v189_v60 = vsel %vm61_vm0, %v153_v56, 0.0  ;;  %v192_v1 = vsel %vm61_vm0, %v154_v57, 0.0 }
  0xaa   :  { %187 = vadd.xlane.f32.xlu1 %v186_v51  ;;  %190 = vadd.xlane.f32.xlu0 %v189_v60  ;;  %v106_v61 = vpop.xlane.xlu0 %105  ;;  %v109_v0 = vpop.xlane.xlu1 %108 }
  0xab   :  { %v125_v6 = vmul.f32 0.0625, %v106_v61  ;;  %v126_v7 = vmul.f32 0.0625, %v109_v0  ;;  %v155_v8 = vmul.f32 %v1612_v58, %v1612_v58  ;;  %v156_v9 = vmul.f32 %v1615_v59, %v1615_v59 }
  0xad   :  { %v1624_v10 = vsub.f32 %v1533_v36, %v125_v6  ;;  %v1627_v13 = vsub.f32 %v1535_v37, %v126_v7  ;;  %v195_v18 = vsel %vm61_vm0, %v155_v8, 0.0  ;;  %v198_v19 = vsel %vm61_vm0, %v156_v9, 0.0 }
  0xae   :  { %193 = vadd.xlane.f32.xlu1 %v192_v1  ;;  %196 = vadd.xlane.f32.xlu0 %v195_v18 }
  0xaf   :  { %v157_v20 = vmul.f32 %v1624_v10, %v1624_v10  ;;  %v158_v23 = vmul.f32 %v1627_v13, %v1627_v13 }
  0xb1   :  { %v201_v24 = vsel %vm61_vm0, %v157_v20, 0.0  ;;  %v204_v25 = vsel %vm61_vm0, %v158_v23, 0.0  ;;  %v1643_v23 = vld [vmem:[%s2237_s1] ss:$0 sm:$0xff] }
  0xb2   :  { %199 = vadd.xlane.f32.xlu1 %v198_v19  ;;  %202 = vadd.xlane.f32.xlu0 %v201_v24 }
  0xb6   :  { %205 = vadd.xlane.f32.xlu1 %v204_v25 }
 0x11f   :  { %v161_v29 = vpop.xlane.xlu0 %160 }
 0x120   :  { %v207_v34 = vmul.f32 0.0625, %v161_v29 }
 0x122   :  { %v223_v35 = vadd.f32 1e-05, %v207_v34 }
 0x123   :  { %v164_v38 = vpop.xlane.xlu1 %163  ;;  %v167_v39 = vpop.xlane.xlu0 %166 }
 0x124   :  { %1349 = vrsqrt.f32 %v223_v35  ;;  %v208_v40 = vmul.f32 0.0625, %v164_v38  ;;  %v209_v41 = vmul.f32 0.0625, %v167_v39 }
 0x126   :  { %v224_v42 = vadd.f32 1e-05, %v208_v40  ;;  %v225_v43 = vadd.f32 1e-05, %v209_v41 }
 0x127   :  { %v170_v48 = vpop.xlane.xlu1 %169  ;;  %v173_v49 = vpop.xlane.xlu0 %172 }
 0x128   :  { %1351 = vrsqrt.f32 %v224_v42  ;;  %v210_v50 = vmul.f32 0.0625, %v170_v48  ;;  %v211_v51 = vmul.f32 0.0625, %v173_v49  ;;  %v1650_v42 = vld [vmem:[%s2238_s2] ss:$0 sm:$0xff] }
 0x129   :  { %1353 = vrsqrt.f32 %v225_v43 }
 0x12a   :  { %v226_v54 = vadd.f32 1e-05, %v210_v50  ;;  %v227_v55 = vadd.f32 1e-05, %v211_v51 }
 0x12b   :  { %v176_v56 = vpop.xlane.xlu1 %175  ;;  %v179_v57 = vpop.xlane.xlu0 %178 }
 0x12c   :  { %1355 = vrsqrt.f32 %v226_v54  ;;  %v212_v60 = vmul.f32 0.0625, %v176_v56  ;;  %v213_v61 = vmul.f32 0.0625, %v179_v57 }
 0x12d   :  { %1357 = vrsqrt.f32 %v227_v55 }
 0x12e   :  { %v228_v0 = vadd.f32 1e-05, %v212_v60  ;;  %v229_v1 = vadd.f32 1e-05, %v213_v61 }
 0x12f   :  { %v182_v6 = vpop.xlane.xlu1 %181  ;;  %v185_v7 = vpop.xlane.xlu0 %184 }
 0x130   :  { %1359 = vrsqrt.f32 %v228_v0  ;;  %v214_v8 = vmul.f32 0.0625, %v182_v6  ;;  %v215_v9 = vmul.f32 0.0625, %v185_v7 }
 0x131   :  { %v1350_v18 = vpop.eup %1349  ;;  %1361 = vrsqrt.f32 %v229_v1 }
 0x132   :  { %v230_v19 = vadd.f32 1e-05, %v214_v8  ;;  %v231_v20 = vadd.f32 1e-05, %v215_v9  ;;  %v255_v24 = vmul.f32 %v1350_v18, %v1542_v44 }
 0x133   :  { %v188_v25 = vpop.xlane.xlu1 %187  ;;  %v191_v28 = vpop.xlane.xlu0 %190 }
 0x134   :  { %1363 = vrsqrt.f32 %v230_v19  ;;  %v216_v29 = vmul.f32 0.0625, %v188_v25  ;;  %v217_v34 = vmul.f32 0.0625, %v191_v28  ;;  %v277_v38 = vmul.f32 %v1643_v23, %v255_v24 }
 0x135   :  { %v1352_v35 = vpop.eup %1351  ;;  %1365 = vrsqrt.f32 %v231_v20 }
 0x136   :  { %v1354_v39 = vpop.eup %1353  ;;  %v232_v40 = vadd.f32 1e-05, %v216_v29  ;;  %v233_v41 = vadd.f32 1e-05, %v217_v34  ;;  %v256_v43 = vmul.f32 %v1352_v35, %v1552_v52  ;;  %v299_v56 = vadd.f32 %v1650_v42, %v277_v38 }
 0x137   :  { %v194_v44 = vpop.xlane.xlu1 %193  ;;  %v197_v48 = vpop.xlane.xlu0 %196  ;;  %v257_v49 = vmul.f32 %v1354_v39, %v1545_v45 }
 0x138   :  { %1367 = vrsqrt.f32 %v232_v40  ;;  %v218_v50 = vmul.f32 0.0625, %v194_v44  ;;  %v219_v51 = vmul.f32 0.0625, %v197_v48  ;;  %v278_v54 = vmul.f32 %v1643_v23, %v256_v43 }
 0x139   :  { %v1356_v55 = vpop.eup %1355  ;;  %1369 = vrsqrt.f32 %v233_v41  ;;  %v279_v45 = vmul.f32 %v1643_v23, %v257_v49 }
 0x13a   :  { %v1358_v57 = vpop.eup %1357  ;;  %v234_v60 = vadd.f32 1e-05, %v218_v50  ;;  %v235_v61 = vadd.f32 1e-05, %v219_v51  ;;  %v300_v0 = vadd.f32 %v1650_v42, %v278_v54  ;;  %v258_v52 = vmul.f32 %v1356_v55, %v1555_v53 }
 0x13b   :  { %v200_v1 = vpop.xlane.xlu1 %199  ;;  %v203_v6 = vpop.xlane.xlu0 %202  ;;  %v259_v7 = vmul.f32 %v1358_v57, %v1564_v62  ;;  %v301_v62 = vadd.f32 %v1650_v42, %v279_v45 }
 0x13c   :  { %1371 = vrsqrt.f32 %v234_v60  ;;  %v220_v8 = vmul.f32 0.0625, %v200_v1  ;;  %v221_v9 = vmul.f32 0.0625, %v203_v6  ;;  %v315_v18 = vpack.c.bf16 %v300_v0, %v299_v56 }
 0x13d   :  { %v1360_v19 = vpop.eup %1359  ;;  %1373 = vrsqrt.f32 %v235_v61  ;;  %v280_v20 = vmul.f32 %v1643_v23, %v258_v52  ;;  %v281_v24 = vmul.f32 %v1643_v23, %v259_v7 }
 0x13e   :  { %v1362_v25 = vpop.eup %1361  ;;  %v236_v28 = vadd.f32 1e-05, %v220_v8  ;;  %v237_v29 = vadd.f32 1e-05, %v221_v9  ;;  %1313 = vmatprep.mubr.msk.bf16.mxu0 %vm61_vm0, %v315_v18  ;;  %v260_v53 = vmul.f32 %v1360_v19, %v1567_v63 }
 0x13f   :  { %v206_v34 = vpop.xlane.xlu1 %205  ;;  %v302_v35 = vadd.f32 %v1650_v42, %v280_v20  ;;  %v261_v38 = vmul.f32 %v1362_v25, %v1576_v14  ;;  %v303_v44 = vadd.f32 %v1650_v42, %v281_v24 }
 0x140   :  { %1375 = vrsqrt.f32 %v236_v28  ;;  %v222_v39 = vmul.f32 0.0625, %v206_v34  ;;  %v282_v40 = vmul.f32 %v1643_v23, %v260_v53 }
 0x141   :  { %v1364_v41 = vpop.eup %1363  ;;  %1377 = vrsqrt.f32 %v237_v29  ;;  %v316_v43 = vpack.c.bf16 %v302_v35, %v301_v62  ;;  %v283_v51 = vmul.f32 %v1643_v23, %v261_v38 }
 0x142   :  { %v1366_v48 = vpop.eup %1365  ;;  %v238_v49 = vadd.f32 1e-05, %v222_v39  ;;  %v304_v63 = vadd.f32 %v1650_v42, %v282_v40  ;;  %v262_v50 = vmul.f32 %v1364_v41, %v1579_v15 }
 0x143   :  { %1314 = vmatmul.mubr.msk.bf16.vlgmr.msra.gmra.mxu0 %vm61_vm0, %v316_v43  ;;  %v263_v14 = vmul.f32 %v1366_v48, %v1588_v30  ;;  %v305_v60 = vadd.f32 %v1650_v42, %v283_v51 }
 0x144   :  { %1379 = vrsqrt.f32 %v238_v49  ;;  %v317_v54 = vpack.c.bf16 %v304_v63, %v303_v44  ;;  %v284_v55 = vmul.f32 %v1643_v23, %v262_v50 }
 0x145   :  { %v1368_v56 = vpop.eup %1367  ;;  %v285_v0 = vmul.f32 %v1643_v23, %v263_v14 }
 0x146   :  { %v1370_v57 = vpop.eup %1369  ;;  %1317 = vmatprep.mubr.msk.bf16.mxu0 %vm61_vm0, %v317_v54  ;;  %v306_v61 = vadd.f32 %v1650_v42, %v284_v55  ;;  %v264_v15 = vmul.f32 %v1368_v56, %v1591_v33 }
 0x147   :  { %v265_v52 = vmul.f32 %v1370_v57, %v1600_v46  ;;  %v307_v7 = vadd.f32 %v1650_v42, %v285_v0 }
 0x148   :  { %v318_v1 = vpack.c.bf16 %v306_v61, %v305_v60  ;;  %v286_v30 = vmul.f32 %v1643_v23, %v264_v15 }
 0x149   :  { %v1372_v6 = vpop.eup %1371  ;;  %v287_v18 = vmul.f32 %v1643_v23, %v265_v52 }
 0x14a   :  { %v1374_v45 = vpop.eup %1373  ;;  %v308_v8 = vadd.f32 %v1650_v42, %v286_v30  ;;  %v266_v9 = vmul.f32 %v1372_v6, %v1603_v47 }
 0x14b   :  { %1318 = vmatmul.mubr.msk.bf16.gmra.mxu0 %vm61_vm0, %v318_v1  ;;  %v267_v33 = vmul.f32 %v1374_v45, %v1612_v58  ;;  %v309_v25 = vadd.f32 %v1650_v42, %v287_v18 }
 0x14c   :  { %v319_v19 = vpack.c.bf16 %v308_v8, %v307_v7  ;;  %v288_v46 = vmul.f32 %v1643_v23, %v266_v9 }
 0x14d   :  { %v1376_v20 = vpop.eup %1375  ;;  %v289_v47 = vmul.f32 %v1643_v23, %v267_v33 }
 0x14e   :  { %v1378_v24 = vpop.eup %1377  ;;  %1321 = vmatprep.mubr.msk.bf16.mxu0 %vm61_vm0, %v319_v19  ;;  %v310_v28 = vadd.f32 %v1650_v42, %v288_v46  ;;  %v268_v29 = vmul.f32 %v1376_v20, %v1615_v59 }
 0x14f   :  { %v269_v53 = vmul.f32 %v1378_v24, %v1624_v10  ;;  %v311_v35 = vadd.f32 %v1650_v42, %v289_v47 }
 0x150   :  { %v320_v34 = vpack.c.bf16 %v310_v28, %v309_v25  ;;  %v290_v58 = vmul.f32 %v1643_v23, %v268_v29 }
 0x151   :  { %v1380_v62 = vpop.eup %1379  ;;  %v291_v40 = vmul.f32 %v1643_v23, %v269_v53 }
 0x152   :  { %v312_v38 = vadd.f32 %v1650_v42, %v290_v58  ;;  %v270_v39 = vmul.f32 %v1380_v62, %v1627_v13  ;;  %v1348_v13 = vld [vmem:[%s2239_s5] sm:$0xff]  }
 0x153   :  { %1322 = vmatmul.mubr.msk.bf16.gmra.mxu0 %vm61_vm0, %v320_v34  ;;  %v313_v10 = vadd.f32 %v1650_v42, %v291_v40  ;;  %1329 = vmatprep.subr.bf16.mxu1 %v1348_v13 }
 0x154   :  { %v321_v41 = vpack.c.bf16 %v312_v38, %v311_v35  ;;  %v292_v59 = vmul.f32 %v1643_v23, %v270_v39  ;;  %1330 = vmatpush3.bf16.msra.mxu1 %v1348_v13  ;;  %v1712_v23 = vld [vmem:[%s2240_s4] ss:$0 sm:$0xff] }
 0x156   :  { %1325 = vmatprep.mubr.msk.bf16.mxu0 %vm61_vm0, %v321_v41  ;;  %v314_v43 = vadd.f32 %v1650_v42, %v292_v59 }
 0x158   :  { %v322_v44 = vpack.c.bf16 %v314_v43, %v313_v10 }
 0x15b   :  { %1326 = vmatmul.mubr.msk.bf16.gmra.mxu0 %vm61_vm0, %v322_v44 }
 0x203   :  { %v1315_v48 = vpop.f32.mrf.mxu0 }
 0x204   :  { %v1715_v50 = vadd.f32 %v1315_v48, %v1712_v23 }
 0x205   :  { %v396_v49 = vpop.f32.mrf.mxu0 }
 0x206   :  { %v477_v51 = vmul.f32 0.70710677, %v1715_v50  ;;  %v1719_v14 = vadd.f32 %v1712_v23, %v396_v49 }
 0x207   :  { %v1316_v63 = vpop.f32.mrf.mxu0 }
 0x208   :  { %v1722_v55 = vadd.f32 %v1316_v63, %v1712_v23  ;;  %v1724_v56 = vclamps-f32 %v477_v51, 4.0  ;;  %v475_v57 = vmul.f32 0.70710677, %v1719_v14  ;;  %v1843_v37 = vmul.f32 0.5, %v1719_v14 }
 0x209   :  { %v399_v42 = vpop.f32.mrf.mxu0 }
 0x20a   :  { %v1728_v60 = vadd.f32 %v1712_v23, %v399_v42  ;;  %v478_v15 = vmul.f32 0.70710677, %v1722_v55  ;;  %v1736_v0 = vmul.f32 %v1724_v56, %v1724_v56  ;;  %v1738_v52 = vclamps-f32 %v475_v57, 4.0 }
 0x20b   :  { %v1319_v54 = vpop.f32.mrf.mxu0 }
 0x20c   :  { %v1731_v61 = vadd.f32 %v1319_v54, %v1712_v23  ;;  %v476_v1 = vmul.f32 0.70710677, %v1728_v60  ;;  %v1742_v6 = vclamps-f32 %v478_v15, 4.0  ;;  %v541_v7 = vmul.f32 -2.7261424e-10, %v1736_v0 }
 0x20d   :  { %v412_v45 = vpop.f32.mrf.mxu0  ;;  %v1747_v8 = vmul.f32 %v1738_v52, %v1738_v52  ;;  %v733_v20 = vmul.f32 -1.45660715e-05, %v1736_v0 }
 0x20e   :  { %v481_v30 = vmul.f32 0.70710677, %v1731_v61  ;;  %v1749_v9 = vclamps-f32 %v476_v1, 4.0  ;;  %v1754_v33 = vadd.f32 %v1712_v23, %v412_v45  ;;  %v1758_v19 = vmul.f32 %v1742_v6, %v1742_v6 }
 0x20f   :  { %v557_v46 = vadd.f32 2.7706815e-08, %v541_v7  ;;  %v539_v24 = vmul.f32 -2.7261424e-10, %v1747_v8  ;;  %v749_v34 = vadd.f32 -0.00021337405, %v733_v20  ;;  %v1320_v48 = vpop.f32.mrf.mxu0 }
 0x210   :  { %v1751_v18 = vclamps-f32 %v481_v30, 4.0  ;;  %v1764_v25 = vmul.f32 %v1749_v9, %v1749_v9  ;;  %v479_v29 = vmul.f32 0.70710677, %v1754_v33  ;;  %v542_v47 = vmul.f32 -2.7261424e-10, %v1758_v19 }
 0x211   :  { %v573_v53 = vmul.f32 %v557_v46, %v1736_v0  ;;  %v555_v58 = vadd.f32 2.7706815e-08, %v539_v24  ;;  %v734_v62 = vmul.f32 -1.45660715e-05, %v1758_v19  ;;  %v765_v59 = vmul.f32 %v749_v34, %v1736_v0  ;;  %v415_v30 = vpop.f32.mrf.mxu0 }
 0x212   :  { %v1768_v28 = vmul.f32 %v1751_v18, %v1751_v18  ;;  %v540_v35 = vmul.f32 -2.7261424e-10, %v1764_v25  ;;  %v1776_v39 = vclamps-f32 %v479_v29, 4.0  ;;  %v558_v40 = vadd.f32 2.7706815e-08, %v542_v47 }
 0x213   :  { %v589_v41 = vadd.f32 -2.101024e-06, %v573_v53  ;;  %v571_v10 = vmul.f32 %v555_v58, %v1747_v8  ;;  %v750_v43 = vadd.f32 -0.00021337405, %v734_v62  ;;  %v781_v51 = vadd.f32 -0.001682827, %v765_v59 }
 0x214   :  { %v545_v38 = vmul.f32 -2.7261424e-10, %v1768_v28  ;;  %v556_v44 = vadd.f32 2.7706815e-08, %v540_v35  ;;  %v1782_v49 = vmul.f32 %v1776_v39, %v1776_v39  ;;  %v574_v63 = vmul.f32 %v558_v40, %v1758_v19 }
 0x215   :  { %v605_v42 = vmul.f32 %v589_v41, %v1736_v0  ;;  %v587_v54 = vadd.f32 -2.101024e-06, %v571_v10  ;;  %v766_v57 = vmul.f32 %v750_v43, %v1758_v19  ;;  %v737_v46 = vmul.f32 -1.45660715e-05, %v1768_v28 }
 0x216   :  { %v561_v13 = vadd.f32 2.7706815e-08, %v545_v38  ;;  %v572_v15 = vmul.f32 %v556_v44, %v1764_v25  ;;  %v543_v45 = vmul.f32 -2.7261424e-10, %v1782_v49  ;;  %v590_v7 = vadd.f32 -2.101024e-06, %v574_v63 }
 0x217   :  { %v1792_v20 = vadd.f32 %v1320_v48, %v1712_v23  ;;  %v621_v24 = vadd.f32 -5.6925062e-05, %v605_v42  ;;  %v797_v29 = vmul.f32 %v781_v51, %v1736_v0  ;;  %v603_v47 = vmul.f32 %v587_v54, %v1747_v8 }
 0x218   :  { %v577_v1 = vmul.f32 %v561_v13, %v1768_v28  ;;  %v1797_v53 = vadd.f32 %v1712_v23, %v415_v30  ;;  %v782_v34 = vadd.f32 -0.001682827, %v766_v57  ;;  %v588_v58 = vadd.f32 -2.101024e-06, %v572_v15 }
 0x219   :  { %2290 = vst [vmem:[#allocation18_spill] sm:$0xff] %v1792_v20  ;;  %v559_v35 = vadd.f32 2.7706815e-08, %v543_v45  ;;  %v606_v38 = vmul.f32 %v590_v7, %v1758_v19  ;;  %v753_v40 = vadd.f32 -0.00021337405, %v737_v46  ;;  %v637_v59 = vmul.f32 %v621_v24, %v1736_v0 }
 0x21a   :  { %v593_v62 = vadd.f32 -2.101024e-06, %v577_v1  ;;  %v482_v41 = vmul.f32 0.70710677, %v1792_v20  ;;  %v813_v10 = vadd.f32 -0.0073733293, %v797_v29  ;;  %v798_v13 = vmul.f32 %v782_v34, %v1758_v19 }
 0x21b   :  { %v619_v43 = vadd.f32 -5.6925062e-05, %v603_v47  ;;  %v480_v44 = vmul.f32 0.70710677, %v1797_v53  ;;  %v604_v48 = vmul.f32 %v588_v58, %v1764_v25  ;;  %v575_v42 = vmul.f32 %v559_v35, %v1782_v49 }
 0x21c   :  { %v609_v63 = vmul.f32 %v593_v62, %v1768_v28  ;;  %v735_v51 = vmul.f32 -1.45660715e-05, %v1782_v49  ;;  %v622_v54 = vadd.f32 -5.6925062e-05, %v606_v38  ;;  %v769_v57 = vmul.f32 %v753_v40, %v1768_v28 }
 0x21d   :  { %v1809_v15 = vclamps-f32 %v482_v41, 4.0  ;;  %v653_v1 = vadd.f32 -0.00073499064, %v637_v59  ;;  %v829_v30 = vmul.f32 %v813_v10, %v1736_v0  ;;  %v635_v45 = vmul.f32 %v619_v43, %v1747_v8  ;;  %v1323_v10 = vpop.f32.mrf.mxu0 }
 0x21e   :  { %v1813_v7 = vclamps-f32 %v480_v44, 4.0  ;;  %v814_v46 = vadd.f32 -0.0073733293, %v798_v13  ;;  %v620_v24 = vadd.f32 -5.6925062e-05, %v604_v48  ;;  %v638_v58 = vmul.f32 %v622_v54, %v1758_v19 }
 0x21f   :  { %v625_v29 = vadd.f32 -5.6925062e-05, %v609_v63  ;;  %v591_v47 = vadd.f32 -2.101024e-06, %v575_v42  ;;  %v751_v34 = vadd.f32 -0.00021337405, %v735_v51  ;;  %v1818_v35 = vmul.f32 %v1809_v15, %v1809_v15 }
 0x220   :  { %v785_v62 = vadd.f32 -0.001682827, %v769_v57  ;;  %v669_v38 = vmul.f32 %v653_v1, %v1736_v0  ;;  %v845_v40 = vadd.f32 -0.014264739, %v829_v30  ;;  %v651_v41 = vadd.f32 -0.00073499064, %v635_v45  ;;  %v428_v45 = vpop.f32.mrf.mxu0 }
 0x221   :  { %v1823_v59 = vmul.f32 %v1813_v7, %v1813_v7  ;;  %v830_v43 = vmul.f32 %v814_v46, %v1758_v19  ;;  %v636_v44 = vmul.f32 %v620_v24, %v1764_v25  ;;  %v641_v13 = vmul.f32 %v625_v29, %v1768_v28 }
 0x222   :  { %v607_v48 = vmul.f32 %v591_v47, %v1782_v49  ;;  %v767_v63 = vmul.f32 %v751_v34, %v1782_v49  ;;  %v654_v42 = vadd.f32 -0.00073499064, %v638_v58  ;;  %v801_v51 = vmul.f32 %v785_v62, %v1768_v28 }
 0x223   :  { %v546_v54 = vmul.f32 -2.7261424e-10, %v1818_v35  ;;  %v685_v57 = vadd.f32 -0.0029546, %v669_v38  ;;  %1381 = vrcp.f32 %v845_v40  ;;  %v667_v1 = vmul.f32 %v651_v41, %v1747_v8 }
 0x224   :  { %v544_v30 = vmul.f32 -2.7261424e-10, %v1823_v59  ;;  %v846_v46 = vadd.f32 -0.014264739, %v830_v43  ;;  %v652_v24 = vadd.f32 -0.00073499064, %v636_v44  ;;  %v1835_v29 = vadd.f32 %v1323_v10, %v1712_v23  ;;  %v1324_v10 = vpop.f32.mrf.mxu0 }
 0x225   :  { %v657_v32 = vadd.f32 -0.00073499064, %v641_v13  ;;  %v623_v47 = vadd.f32 -5.6925062e-05, %v607_v48  ;;  %v783_v34 = vadd.f32 -0.001682827, %v767_v63  ;;  %v670_v38 = vmul.f32 %v654_v42, %v1758_v19 }
 0x226   :  { %2291 = vst [vmem:[#allocation19_spill] sm:$0xff] %v1835_v29  ;;  %v738_v58 = vmul.f32 -1.45660715e-05, %v1818_v35  ;;  %v1839_v62 = vmul.f32 0.5, %v1715_v50  ;;  %v817_v40 = vadd.f32 -0.0073733293, %v801_v51  ;;  %v1846_v13 = vadd.f32 %v1712_v23, %v428_v45 }
 0x227   :  { %v562_v41 = vadd.f32 2.7706815e-08, %v546_v54  ;;  %v683_v43 = vadd.f32 -0.0029546, %v667_v1  ;;  %v560_v44 = vadd.f32 2.7706815e-08, %v544_v30  ;;  %v701_v48 = vmul.f32 %v685_v57, %v1736_v0 }
 0x228   :  { %2292 = vst [vmem:[#allocation20_spill] sm:$0xff] %v1846_v13  ;;  %1383 = vrcp.f32 %v846_v46  ;;  %v668_v63 = vmul.f32 %v652_v24, %v1764_v25  ;;  %v485_v50 = vmul.f32 0.70710677, %v1835_v29  ;;  %v673_v42 = vmul.f32 %v657_v32, %v1768_v28  ;;  %v431_v24 = vpop.f32.mrf.mxu0 }
 0x229   :  { %v639_v51 = vmul.f32 %v623_v47, %v1782_v49  ;;  %v799_v14 = vmul.f32 %v783_v34, %v1782_v49  ;;  %v754_v54 = vadd.f32 -0.00021337405, %v738_v58  ;;  %v686_v1 = vadd.f32 -0.0029546, %v670_v38 }
 0x22a   :  { %v833_v30 = vmul.f32 %v817_v40, %v1768_v28  ;;  %v578_v45 = vmul.f32 %v562_v41, %v1818_v35  ;;  %v736_v31 = vmul.f32 -1.45660715e-05, %v1823_v59  ;;  %v699_v0 = vmul.f32 %v683_v43, %v1747_v8 }
 0x22b   :  { %v1859_v57 = vmul.f32 0.5, %v1722_v55  ;;  %v576_v46 = vmul.f32 %v560_v44, %v1823_v59  ;;  %v483_v32 = vmul.f32 0.70710677, %v1846_v13  ;;  %v717_v47 = vadd.f32 -0.016096033, %v701_v48  ;;  %v1875_v48 = vpop.f32.mrf.mxu0 }
 0x22c   :  { %v1864_v34 = vmul.f32 0.5, %v1728_v60  ;;  %v684_v58 = vadd.f32 -0.0029546, %v668_v63  ;;  %v1866_v38 = vclamps-f32 %v485_v50, 4.0  ;;  %v689_v40 = vadd.f32 -0.0029546, %v673_v42 }
 0x22d   :  { %v655_v41 = vadd.f32 -0.00073499064, %v639_v51  ;;  %v815_v36 = vadd.f32 -0.0073733293, %v799_v14  ;;  %v770_v43 = vmul.f32 %v754_v54, %v1818_v35  ;;  %v702_v55 = vmul.f32 %v686_v1, %v1758_v19 }
 0x22e   :  { %2293 = vst [vmem:[#allocation21_spill] sm:$0xff] %v1866_v38  ;;  %v849_v22 = vadd.f32 -0.014264739, %v833_v30  ;;  %v594_v27 = vadd.f32 -2.101024e-06, %v578_v45  ;;  %v1870_v12 = vclamps-f32 %v483_v32, 4.0  ;;  %v1873_v60 = vadd.f32 %v1712_v23, %v431_v24  ;;  %v444_v32 = vpop.f32.mrf.mxu0 }
 0x22f   :  { %v752_v44 = vadd.f32 -0.00021337405, %v736_v31  ;;  %v715_v21 = vadd.f32 -0.016096033, %v699_v0  ;;  %v592_v26 = vadd.f32 -2.101024e-06, %v576_v46  ;;  %v861_v50 = vmul.f32 %v1724_v56, %v717_v47 }
 0x230   :  { %2294 = vst [vmem:[#allocation22_spill] sm:$0xff] %v1873_v60  ;;  %v1382_v63 = vpop.eup %1381  ;;  %v700_v42 = vmul.f32 %v684_v58, %v1764_v25  ;;  %v1880_v51 = vmul.f32 0.5, %v1754_v33  ;;  %v1884_v31 = vmul.f32 %v1866_v38, %v1866_v38  ;;  %v705_v19 = vmul.f32 %v689_v40, %v1768_v28 }
 0x231   :  { %v671_v14 = vmul.f32 %v655_v41, %v1782_v49  ;;  %v831_v54 = vmul.f32 %v815_v36, %v1782_v49  ;;  %v786_v1 = vadd.f32 -0.001682827, %v770_v43  ;;  %v718_v30 = vadd.f32 -0.016096033, %v702_v55 }
 0x232   :  { %1385 = vrcp.f32 %v849_v22  ;;  %v610_v56 = vmul.f32 %v594_v27, %v1818_v35  ;;  %v768_v45 = vmul.f32 %v752_v44, %v1823_v59  ;;  %v1892_v33 = vmul.f32 %v1738_v52, %v715_v21 }
 0x233   :  { %v608_v0 = vmul.f32 %v592_v26, %v1823_v59  ;;  %v1897_v46 = vmul.f32 %v1870_v12, %v1870_v12  ;;  %v484_v28 = vmul.f32 0.70710677, %v1873_v60  ;;  %v880_v36 = vmul.f32 %v1382_v63, %v861_v50 }
 0x234   :  { %v716_v24 = vadd.f32 -0.016096033, %v700_v42  ;;  %v549_v22 = vmul.f32 -2.7261424e-10, %v1884_v31  ;;  %v1902_v27 = vadd.f32 %v1324_v10, %v1712_v23  ;;  %v721_v58 = vadd.f32 -0.016096033, %v705_v19  ;;  %v1328_v42 = vpop.f32.mrf.mxu0 }
 0x235   :  { %v1384_v47 = vpop.eup %1383  ;;  %v687_v21 = vadd.f32 -0.0029546, %v671_v14  ;;  %v847_v52 = vadd.f32 -0.014264739, %v831_v54  ;;  %v802_v26 = vmul.f32 %v786_v1, %v1818_v35  ;;  %v862_v40 = vmul.f32 %v1742_v6, %v718_v30 }
 0x236   :  { %2295 = vst [vmem:[#allocation23_spill] sm:$0xff] %v1902_v27  ;;  %v626_v41 = vadd.f32 -5.6925062e-05, %v610_v56  ;;  %v784_v43 = vadd.f32 -0.001682827, %v768_v45  ;;  %v1908_v44 = vmul.f32 0.5, %v1797_v53  ;;  %v1914_v19 = vmul.f32 %v1749_v9, %v716_v24 }
 0x237   :  { %v741_v55 = vmul.f32 -1.45660715e-05, %v1884_v31  ;;  %v624_v63 = vadd.f32 -5.6925062e-05, %v608_v0  ;;  %v547_v50 = vmul.f32 -2.7261424e-10, %v1897_v46  ;;  %v882_v30 = vmul.f32 %v1384_v47, %v862_v40 }
 0x238   :  { %v1911_v10 = vclamps-f32 %v484_v28, 4.0  ;;  %v565_v14 = vadd.f32 2.7706815e-08, %v549_v22  ;;  %v739_v54 = vmul.f32 -1.45660715e-05, %v1897_v46  ;;  %v909_v1 = vadd.f32 1.0, %v880_v36  ;;  %v447_v36 = vpop.f32.mrf.mxu0 }
 0x239   :  { %v486_v6 = vmul.f32 0.70710677, %v1902_v27  ;;  %v703_v56 = vmul.f32 %v687_v21, %v1782_v49  ;;  %v818_v53 = vadd.f32 -0.0073733293, %v802_v26  ;;  %1387 = vrcp.f32 %v847_v52 }
 0x23a   :  { %v642_v45 = vmul.f32 %v626_v41, %v1818_v35  ;;  %v757_v0 = vadd.f32 -0.00021337405, %v741_v55  ;;  %v1921_v28 = vadd.f32 %v1712_v23, %v444_v32  ;;  %v640_v9 = vmul.f32 %v624_v63, %v1823_v59 }
 0x23b   :  { %v800_v24 = vmul.f32 %v784_v43, %v1823_v59  ;;  %v563_v22 = vadd.f32 2.7706815e-08, %v547_v50  ;;  %v1927_v17 = vmul.f32 %v1911_v10, %v1911_v10  ;;  %v1930_v49 = vmul.f32 %v1751_v18, %v721_v58 }
 0x23c   :  { %2296 = vst [vmem:[#allocation24_spill] sm:$0xff] %v1921_v28  ;;  %v581_v47 = vmul.f32 %v565_v14, %v1884_v31  ;;  %v755_v21 = vadd.f32 -0.00021337405, %v739_v54  ;;  %v1933_v52 = vclamps-f32 %v486_v6, 4.0  ;;  %v1936_v32 = vmul.f32 %v909_v1, %v1839_v62 }
 0x23d   :  { %v1938_v26 = vadd.f32 1.0, %v882_v30  ;;  %v719_v40 = vadd.f32 -0.016096033, %v703_v56  ;;  %v834_v41 = vmul.f32 %v818_v53, %v1818_v35  ;;  %v658_v43 = vadd.f32 -0.00073499064, %v642_v45 }
 0x23e   :  { %2297 = vst [vmem:[#allocation25_spill] sm:$0xff] %v1933_v52  ;;  %v773_v55 = vmul.f32 %v757_v0, %v1884_v31  ;;  %v487_v63 = vmul.f32 0.70710677, %v1921_v28  ;;  %v1944_v18 = vadd.f32 %v1712_v23, %v447_v36  ;;  %v656_v50 = vadd.f32 -0.00073499064, %v640_v9 }
 0x23f   :  { %v1946_v58 = vpop.eup %1385  ;;  %v816_v14 = vadd.f32 -0.0073733293, %v800_v24  ;;  %v579_v62 = vmul.f32 %v563_v22, %v1897_v46  ;;  %v548_v54 = vmul.f32 -2.7261424e-10, %v1927_v17  ;;  %v597_v6 = vadd.f32 -2.101024e-06, %v581_v47 }
 0x240   :  { %2298 = vst [vmem:[#allocation26_spill] sm:$0xff] %v1944_v18  ;;  %v771_v1 = vmul.f32 %v755_v21, %v1897_v46  ;;  %v1953_v30 = vmul.f32 %v1933_v52, %v1933_v52  ;;  %v740_v56 = vmul.f32 -1.45660715e-05, %v1927_v17  ;;  %v863_v53 = vmul.f32 %v1776_v39, %v719_v40 }
 0x241   :  { %v850_v45 = vadd.f32 -0.014264739, %v834_v41  ;;  %v1959_v0 = vadd.f32 %v1875_v48, %v1712_v23  ;;  %v1962_v9 = vadd.f32 %v1328_v42, %v1712_v23  ;;  %v674_v24 = vmul.f32 %v658_v43, %v1818_v35 }
 0x242   :  { %v789_v22 = vadd.f32 -0.001682827, %v773_v55  ;;  %v1965_v36 = vclamps-f32 %v487_v63, 4.0  ;;  %v488_v47 = vmul.f32 0.70710677, %v1944_v18  ;;  %v672_v21 = vmul.f32 %v656_v50, %v1823_v59 }
 0x243   :  { %2299 = vst [vmem:[#allocation27_spill] sm:$0xff] %v1959_v0  ;;  %2300 = vst [vmem:[#allocation28_spill] sm:$0xff] %v1962_v9  ;;  %v832_v11 = vmul.f32 %v816_v14, %v1823_v59  ;;  %v595_v39 = vadd.f32 -2.101024e-06, %v579_v62  ;;  %v564_v40 = vadd.f32 2.7706815e-08, %v548_v54  ;;  %v613_v41 = vmul.f32 %v597_v6, %v1884_v31 }
 0x244   :  { %2301 = vst [vmem:[#allocation29_spill] sm:$0xff] %v1965_v36  ;;  %v787_v48 = vadd.f32 -0.001682827, %v771_v1  ;;  %v550_v16 = vmul.f32 -2.7261424e-10, %v1953_v30  ;;  %1389 = vrcp.f32 %v850_v45  ;;  %v1974_v55 = vclamps-f32 %v488_v47, 4.0 }
 0x245   :  { %v756_v23 = vadd.f32 -0.00021337405, %v740_v56  ;;  %v742_v42 = vmul.f32 -1.45660715e-05, %v1953_v30  ;;  %v490_v43 = vmul.f32 0.70710677, %v1962_v9  ;;  %v805_v50 = vmul.f32 %v789_v22, %v1884_v31 }
 0x246   :  { %2302 = vst [vmem:[#allocation30_spill] sm:$0xff] %v1974_v55  ;;  %v690_v63 = vadd.f32 -0.0029546, %v674_v24  ;;  %v489_v14 = vmul.f32 0.70710677, %v1959_v0  ;;  %v1980_v62 = vmul.f32 %v1965_v36, %v1965_v36  ;;  %v1388_v54 = vpop.eup %1387  ;;  %v611_v1 = vmul.f32 %v595_v39, %v1897_v46 }
 0x247   :  { %v688_v6 = vadd.f32 -0.0029546, %v672_v21  ;;  %v580_v56 = vmul.f32 %v564_v40, %v1927_v17  ;;  %v1986_v45 = vmul.f32 %v1974_v55, %v1974_v55  ;;  %v848_v47 = vadd.f32 -0.014264739, %v832_v11 }
 0x248   :  { %v629_v24 = vadd.f32 -5.6925062e-05, %v613_v41  ;;  %v566_v4 = vadd.f32 2.7706815e-08, %v550_v16  ;;  %v772_v22 = vmul.f32 %v756_v23, %v1927_v17  ;;  %v803_v5 = vmul.f32 %v787_v48, %v1897_v46 }
 0x249   :  { %v758_v2 = vadd.f32 -0.00021337405, %v742_v42  ;;  %v1990_v3 = vclamps-f32 %v490_v43, 4.0  ;;  %v552_v21 = vmul.f32 -2.7261424e-10, %v1986_v45  ;;  %v884_v0 = vmul.f32 %v1388_v54, %v863_v53 }
 0x24a   :  { %v1993_v39 = vadd.f32 -0.0073733293, %v805_v50  ;;  %v1995_v40 = vclamps-f32 %v489_v14, 4.0  ;;  %v551_v9 = vmul.f32 -2.7261424e-10, %v1980_v62  ;;  %v704_v11 = vmul.f32 %v688_v6, %v1823_v59 }
 0x24b   :  { %2303 = vst [vmem:[#allocation31_spill] sm:$0xff] %v1990_v3  ;;  %v627_v41 = vadd.f32 -5.6925062e-05, %v611_v1  ;;  %v596_v16 = vadd.f32 -2.101024e-06, %v580_v56  ;;  %v2001_v48 = vmul.f32 %v690_v63, %v1818_v35  ;;  %v582_v50 = vmul.f32 %v566_v4, %v1953_v30 }
 0x24c   :  { %2304 = vst [vmem:[#allocation32_spill] sm:$0xff] %v1995_v40  ;;  %v744_v23 = vmul.f32 -1.45660715e-05, %v1986_v45  ;;  %v788_v42 = vadd.f32 -0.001682827, %v772_v22  ;;  %v774_v14 = vmul.f32 %v758_v2, %v1953_v30  ;;  %v2008_v54 = vmul.f32 %v1990_v3, %v1990_v3 }
 0x24d   :  { %v743_v43 = vmul.f32 -1.45660715e-05, %v1980_v62  ;;  %v568_v29 = vadd.f32 2.7706815e-08, %v552_v21  ;;  %v819_v53 = vadd.f32 -0.0073733293, %v803_v5  ;;  %v2014_v6 = vmul.f32 %v1995_v40, %v1995_v40 }
 0x24e   :  { %v2010_v59 = vadd.f32 1.0, %v884_v0  ;;  %v567_v35 = vadd.f32 2.7706815e-08, %v551_v9  ;;  %v760_v63 = vadd.f32 -0.00021337405, %v744_v23  ;;  %1391 = vrcp.f32 %v848_v47 }
 0x24f   :  { %v2016_v1 = vadd.f32 -0.016096033, %v704_v11  ;;  %v643_v5 = vmul.f32 %v627_v41, %v1897_v46  ;;  %v612_v4 = vmul.f32 %v596_v16, %v1927_v17  ;;  %v804_v2 = vmul.f32 %v788_v42, %v1927_v17 }
 0x250   :  { %v759_v56 = vadd.f32 -0.00021337405, %v743_v43  ;;  %v584_v22 = vmul.f32 %v568_v29, %v1986_v45  ;;  %v731_v0 = vmul.f32 -1.45660715e-05, %v1747_v8  ;;  %v835_v21 = vmul.f32 %v819_v53, %v1897_v46 }
 0x251   :  { %v598_v40 = vadd.f32 -2.101024e-06, %v582_v50  ;;  %v790_v28 = vadd.f32 -0.001682827, %v774_v14  ;;  %v554_v9 = vmul.f32 -2.7261424e-10, %v2008_v54  ;;  %v2025_v11 = vpop.eup %1389  ;;  %v583_v41 = vmul.f32 %v567_v35, %v1980_v62 }
 0x252   :  { %v553_v47 = vmul.f32 -2.7261424e-10, %v2014_v6  ;;  %v776_v16 = vmul.f32 %v760_v63, %v1986_v45  ;;  %v732_v23 = vmul.f32 -1.45660715e-05, %v1764_v25  ;;  %v2032_v29 = vmul.f32 %v629_v24, %v1884_v31 }
 0x253   :  { %v628_v42 = vadd.f32 -5.6925062e-05, %v612_v4  ;;  %v746_v43 = vmul.f32 -1.45660715e-05, %v2008_v54  ;;  %v747_v53 = vadd.f32 -0.00021337405, %v731_v0  ;;  %v775_v14 = vmul.f32 %v759_v56, %v1980_v62 }
 0x254   :  { %v820_v50 = vadd.f32 -0.0073733293, %v804_v2  ;;  %v600_v3 = vadd.f32 -2.101024e-06, %v584_v22  ;;  %v748_v27 = vadd.f32 -0.00021337405, %v732_v23 }
 0x255   :  { %v659_v18 = vadd.f32 -0.00073499064, %v643_v5  ;;  %v745_v38 = vmul.f32 -1.45660715e-05, %v2014_v6  ;;  %v570_v35 = vadd.f32 2.7706815e-08, %v554_v9  ;;  %v763_v63 = vmul.f32 %v747_v53, %v1747_v8 }
 0x256   :  { %v851_v36 = vadd.f32 -0.014264739, %v835_v21  ;;  %v599_v13 = vadd.f32 -2.101024e-06, %v583_v41  ;;  %v792_v52 = vadd.f32 -0.001682827, %v776_v16  ;;  %v764_v24 = vmul.f32 %v748_v27, %v1764_v25 }
 0x257   :  { %v644_v4 = vmul.f32 %v628_v42, %v1927_v17  ;;  %v569_v20 = vadd.f32 2.7706815e-08, %v553_v47  ;;  %v762_v0 = vadd.f32 -0.00021337405, %v746_v43  ;;  %v779_v2 = vadd.f32 -0.001682827, %v763_v63 }
 0x258   :  { %v836_v56 = vmul.f32 %v820_v50, %v1927_v17  ;;  %v791_v22 = vadd.f32 -0.001682827, %v775_v14  ;;  %v616_v5 = vmul.f32 %v600_v3, %v1986_v45  ;;  %v780_v23 = vadd.f32 -0.001682827, %v764_v24 }
 0x259   :  { %v614_v9 = vmul.f32 %v598_v40, %v1953_v30  ;;  %v761_v55 = vadd.f32 -0.00021337405, %v745_v38  ;;  %v586_v21 = vmul.f32 %v570_v35, %v2008_v54  ;;  %v795_v41 = vmul.f32 %v779_v2, %v1747_v8 }
 0x25a   :  { %v806_v27 = vmul.f32 %v790_v28, %v1953_v30  ;;  %v615_v16 = vmul.f32 %v599_v13, %v1980_v62  ;;  %v808_v47 = vmul.f32 %v792_v52, %v1986_v45  ;;  %v796_v42 = vmul.f32 %v780_v23, %v1764_v25 }
 0x25b   :  { %v660_v43 = vadd.f32 -0.00073499064, %v644_v4  ;;  %v585_v53 = vmul.f32 %v569_v20, %v2014_v6  ;;  %v778_v3 = vmul.f32 %v762_v0, %v2008_v54  ;;  %v811_v50 = vadd.f32 -0.0073733293, %v795_v41  ;;  %v1392_v40 = vpop.eup %1391 }
 0x25c   :  { %v852_v38 = vadd.f32 -0.014264739, %v836_v56  ;;  %v807_v14 = vmul.f32 %v791_v22, %v1980_v62  ;;  %v632_v35 = vadd.f32 -5.6925062e-05, %v616_v5  ;;  %v812_v63 = vadd.f32 -0.0073733293, %v796_v42 }
 0x25d   :  { %v630_v24 = vadd.f32 -5.6925062e-05, %v614_v9  ;;  %v777_v28 = vmul.f32 %v761_v55, %v2014_v6  ;;  %v602_v13 = vadd.f32 -2.101024e-06, %v586_v21  ;;  %v827_v52 = vmul.f32 %v811_v50, %v1747_v8 }
 0x25e   :  { %v822_v2 = vadd.f32 -0.0073733293, %v806_v27  ;;  %v631_v23 = vadd.f32 -5.6925062e-05, %v615_v16  ;;  %v824_v4 = vadd.f32 -0.0073733293, %v808_v47  ;;  %v828_v20 = vmul.f32 %v812_v63, %v1764_v25 }
 0x25f   :  { %v676_v0 = vmul.f32 %v660_v43, %v1927_v17  ;;  %v601_v41 = vadd.f32 -2.101024e-06, %v585_v53  ;;  %v794_v60 = vadd.f32 -0.001682827, %v778_v3  ;;  %v843_v56 = vadd.f32 -0.014264739, %v827_v52 }
 0x260   :  { %1393 = vrcp.f32 %v852_v38  ;;  %v823_v22 = vadd.f32 -0.0073733293, %v807_v14  ;;  %v648_v5 = vmul.f32 %v632_v35, %v1986_v45  ;;  %v844_v9 = vadd.f32 -0.014264739, %v828_v20 }
 0x261   :  { %v646_v55 = vmul.f32 %v630_v24, %v1953_v30  ;;  %v793_v21 = vadd.f32 -0.001682827, %v777_v28  ;;  %v618_v8 = vmul.f32 %v602_v13, %v2008_v54  ;;  %1395 = vrcp.f32 %v843_v56 }
 0x262   :  { %v675_v27 = vmul.f32 %v659_v18, %v1897_v46  ;;  %v647_v25 = vmul.f32 %v631_v23, %v1980_v62  ;;  %v840_v16 = vmul.f32 %v824_v4, %v1986_v45  ;;  %1397 = vrcp.f32 %v844_v9 }
 0x263   :  { %v837_v47 = vmul.f32 %v1993_v39, %v1884_v31  ;;  %v838_v42 = vmul.f32 %v822_v2, %v1953_v30  ;;  %v617_v43 = vmul.f32 %v601_v41, %v2014_v6  ;;  %v810_v53 = vmul.f32 %v794_v60, %v2008_v54 }
 0x264   :  { %1399 = vrcp.f32 %v851_v36  ;;  %v692_v3 = vadd.f32 -0.0029546, %v676_v0  ;;  %v839_v50 = vmul.f32 %v823_v22, %v1980_v62  ;;  %v664_v38 = vadd.f32 -0.00073499064, %v648_v5 }
 0x265   :  { %v661_v18 = vadd.f32 -0.00073499064, %v2032_v29  ;;  %v662_v14 = vadd.f32 -0.00073499064, %v646_v55  ;;  %v809_v35 = vmul.f32 %v793_v21, %v2014_v6  ;;  %v634_v63 = vadd.f32 -5.6925062e-05, %v618_v8 }
 0x266   :  { %v864_v39 = vmul.f32 %v1813_v7, %v2016_v1  ;;  %v691_v24 = vadd.f32 -0.0029546, %v675_v27  ;;  %v663_v28 = vadd.f32 -0.00073499064, %v647_v25  ;;  %v856_v13 = vadd.f32 -0.014264739, %v840_v16 }
 0x267   :  { %v2074_v60 = vmul.f32 %v1938_v26, %v1859_v57  ;;  %v854_v36 = vadd.f32 -0.014264739, %v838_v42  ;;  %v633_v52 = vadd.f32 -5.6925062e-05, %v617_v43  ;;  %v826_v2 = vadd.f32 -0.0073733293, %v810_v53 }
 0x268   :  { %v886_v23 = vmul.f32 %v1392_v40, %v864_v39  ;;  %v708_v29 = vmul.f32 %v692_v3, %v1927_v17  ;;  %v855_v4 = vadd.f32 -0.014264739, %v839_v50  ;;  %v680_v20 = vmul.f32 %v664_v38, %v1986_v45 }
 0x269   :  { %v853_v0 = vadd.f32 -0.014264739, %v837_v47  ;;  %v678_v41 = vmul.f32 %v662_v14, %v1953_v30  ;;  %v825_v7 = vadd.f32 -0.0073733293, %v809_v35  ;;  %v650_v1 = vmul.f32 %v634_v63, %v2008_v54 }
 0x26a   :  { %v722_v56 = vadd.f32 -0.016096033, %v2001_v48  ;;  %v707_v57 = vmul.f32 %v691_v24, %v1897_v46  ;;  %v679_v26 = vmul.f32 %v663_v28, %v1980_v62  ;;  %1401 = vrcp.f32 %v856_v13 }
 0x26b   :  { %v677_v40 = vmul.f32 %v661_v18, %v1884_v31  ;;  %1403 = vrcp.f32 %v854_v36  ;;  %v649_v17 = vmul.f32 %v633_v52, %v2014_v6  ;;  %v842_v22 = vmul.f32 %v826_v2, %v2008_v54 }
 0x26c   :  { %v912_v5 = vadd.f32 1.0, %v886_v23  ;;  %v724_v9 = vadd.f32 -0.016096033, %v708_v29  ;;  %1405 = vrcp.f32 %v855_v4  ;;  %v696_v55 = vadd.f32 -0.0029546, %v680_v20 }
 0x26d   :  { %v1394_v21 = vpop.eup %1393  ;;  %1407 = vrcp.f32 %v853_v0  ;;  %v694_v8 = vadd.f32 -0.0029546, %v678_v41  ;;  %v841_v48 = vmul.f32 %v825_v7, %v2014_v6  ;;  %v666_v46 = vadd.f32 -0.00073499064, %v650_v1 }
 0x26e   :  { %v1396_v27 = vpop.eup %1395  ;;  %v927_v25 = vmul.f32 %v2010_v59, %v1880_v51  ;;  %v866_v16 = vmul.f32 %v1809_v15, %v722_v56  ;;  %v723_v47 = vadd.f32 -0.016096033, %v707_v57  ;;  %v695_v42 = vadd.f32 -0.0029546, %v679_v26  ;;  %v2305_v57 = vld [vmem:[#allocation22_spill] sm:$0xff] }
 0x26f   :  { %v1398_v43 = vpop.eup %1397  ;;  %v693_v53 = vadd.f32 -0.0029546, %v677_v40  ;;  %v665_v3 = vadd.f32 -0.00073499064, %v649_v17  ;;  %v858_v50 = vadd.f32 -0.014264739, %v842_v22  ;;  %v876_v38 = vmul.f32 %v1396_v27, %v1892_v33 }
 0x270   :  { %v928_v18 = vmul.f32 %v912_v5, %v1908_v44  ;;  %v868_v14 = vmul.f32 %v1911_v10, %v724_v9  ;;  %v712_v35 = vmul.f32 %v696_v55, %v1986_v45  ;;  %v878_v63 = vmul.f32 %v1398_v43, %v1914_v19  ;;  %v2307_v22 = vld [vmem:[#allocation18_spill] sm:$0xff]  ;;  %v2308_v9 = vld [vmem:[#allocation25_spill] sm:$0xff] }
 0x271   :  { %v1400_v39 = vpop.eup %1399  ;;  %v710_v51 = vmul.f32 %v694_v8, %v1953_v30  ;;  %v857_v15 = vadd.f32 -0.014264739, %v841_v48  ;;  %v682_v59 = vmul.f32 %v666_v46, %v2008_v54  ;;  %v907_v24 = vadd.f32 1.0, %v876_v38  ;;  %v2310_v48 = vld [vmem:[#allocation29_spill] sm:$0xff] }
 0x272   :  { %v867_v28 = vmul.f32 %v1870_v12, %v723_v47  ;;  %v894_v13 = vmul.f32 %v1394_v21, %v868_v14  ;;  %v711_v33 = vmul.f32 %v695_v42, %v1980_v62  ;;  %v908_v36 = vadd.f32 1.0, %v878_v63  ;;  %v2309_v21 = vld [vmem:[#allocation20_spill] sm:$0xff] }
 0x273   :  { %v890_v44 = vmul.f32 %v2025_v11, %v866_v16  ;;  %v709_v10 = vmul.f32 %v693_v53, %v1884_v31  ;;  %v681_v45 = vmul.f32 %v665_v3, %v2014_v6  ;;  %1409 = vrcp.f32 %v858_v50  ;;  %v2311_v16 = vld [vmem:[#allocation21_spill] sm:$0xff] }
 0x274   :  { %v892_v19 = vmul.f32 %v1400_v39, %v867_v28  ;;  %v728_v52 = vadd.f32 -0.016096033, %v712_v35  ;;  %v923_v30 = vmul.f32 %v907_v24, %v1843_v37  ;;  %v924_v2 = vmul.f32 %v908_v36, %v1864_v34  ;;  %v2314_v36 = vld [vmem:[#allocation31_spill] sm:$0xff] }
 0x275   :  { %v888_v12 = vmul.f32 %v1946_v58, %v1930_v49  ;;  %v726_v23 = vadd.f32 -0.016096033, %v710_v51  ;;  %1411 = vrcp.f32 %v857_v15  ;;  %v698_v62 = vadd.f32 -0.0029546, %v682_v59  ;;  %v2306_v58 = vld [vmem:[#allocation30_spill] sm:$0xff] }
 0x276   :  { %v941_v29 = vpack.c.bf16 %v928_v18, %v927_v25  ;;  %v916_v4 = vadd.f32 1.0, %v894_v13  ;;  %v727_v11 = vadd.f32 -0.016096033, %v711_v33  ;;  %v939_v20 = vpack.c.bf16 %v924_v2, %v923_v30  ;;  %v2312_v59 = vld [vmem:[#allocation26_spill] sm:$0xff]  ;;  %v2313_v13 = vld [vmem:[#allocation23_spill] sm:$0xff] }
 0x277   :  { %v1402_v31 = vpop.eup %1401  ;;  %v940_v0 = vpack.c.bf16 %v2074_v60, %v1936_v32  ;;  %v914_v41 = vadd.f32 1.0, %v890_v44  ;;  %v725_v7 = vadd.f32 -0.016096033, %v709_v10  ;;  %v697_v1 = vadd.f32 -0.0029546, %v681_v45  ;;  %v2315_v10 = vld [vmem:[#allocation24_spill] sm:$0xff] }
 0x278   :  { %v1404_v37 = vpop.eup %1403  ;;  %v465_v34 = vmul.f32 0.5, %v1731_v61  ;;  %v915_v56 = vadd.f32 1.0, %v892_v19  ;;  %v468_v49 = vmul.f32 0.5, %v2305_v57  ;;  %v872_v26 = vmul.f32 %v2306_v58, %v728_v52  ;;  %1331 = vmatprep.mubr.msk.bf16.mxu1 %vm61_vm0, %v939_v20  ;;  %v2316_v52 = vld [vmem:[#allocation19_spill] sm:$0xff]  ;;  %v2137_v58 = vld [vmem:[%s2241_s6] ss:$0 sm:$0xff] }
 0x279   :  { %v1406_v40 = vpop.eup %1405  ;;  %v913_v17 = vadd.f32 1.0, %v888_v12  ;;  %v466_v5 = vmul.f32 0.5, %v2307_v22  ;;  %v870_v55 = vmul.f32 %v2308_v9, %v726_v23  ;;  %v714_v32 = vmul.f32 %v698_v62, %v2008_v54  ;;  %1332 = vmatmul.mubr.msk.bf16.vlgmr.msra.gmra.mxu1 %vm61_vm0, %v940_v0  ;;  %v2317_v12 = vld [vmem:[#allocation32_spill] sm:$0xff]  ;;  %v2320_v22 = vld [vmem:[#allocation3_spill] sm:$0xff] }
 0x27a   :  { %v1408_v60 = vpop.eup %1407  ;;  %v467_v61 = vmul.f32 0.5, %v2309_v21  ;;  %v932_v8 = vmul.f32 %v916_v4, %v468_v49  ;;  %v871_v46 = vmul.f32 %v2310_v48, %v727_v11  ;;  %v902_v27 = vmul.f32 %v1402_v31, %v872_v26  ;;  %1335 = vmatprep.mubr.msk.bf16.mxu1 %vm61_vm0, %v941_v29 }
 0x27b   :  { %v930_v25 = vmul.f32 %v914_v41, %v466_v5  ;;  %v869_v47 = vmul.f32 %v2311_v16, %v725_v7  ;;  %v898_v42 = vmul.f32 %v1404_v37, %v870_v55  ;;  %v713_v43 = vmul.f32 %v697_v1, %v2014_v6  ;;  %v2318_v7 = vld [vmem:[#allocation28_spill] sm:$0xff]  ;;  %v2319_v37 = vld [vmem:[#allocation27_spill] sm:$0xff] }
 0x27c   :  { %v931_v53 = vmul.f32 %v915_v56, %v467_v61  ;;  %v900_v3 = vmul.f32 %v1406_v40, %v871_v46  ;;  %v929_v54 = vmul.f32 %v913_v17, %v465_v34  ;;  %v730_v38 = vadd.f32 -0.016096033, %v714_v32  ;;  %v2322_v46 = vld [vmem:[#allocation5_spill] sm:$0xff] }
 0x27d   :  { %v896_v50 = vmul.f32 %v1408_v60, %v869_v47  ;;  %v920_v14 = vadd.f32 1.0, %v902_v27  ;;  %v918_v63 = vadd.f32 1.0, %v898_v42  ;;  %v729_v39 = vadd.f32 -0.016096033, %v713_v43  ;;  %v2321_v60 = vld [vmem:[#allocation2_spill] sm:$0xff]  ;;  %v2323_v42 = vld [vmem:[#allocation4_spill] sm:$0xff] }
 0x27e   :  { %v943_v18 = vpack.c.bf16 %v932_v8, %v931_v53  ;;  %v942_v35 = vpack.c.bf16 %v930_v25, %v929_v54  ;;  %v919_v15 = vadd.f32 1.0, %v900_v3  ;;  %v472_v24 = vmul.f32 0.5, %v2312_v59 }
 0x27f   :  { %v917_v28 = vadd.f32 1.0, %v896_v50  ;;  %v470_v33 = vmul.f32 0.5, %v2313_v13  ;;  %v874_v44 = vmul.f32 %v2314_v36, %v730_v38  ;;  %v471_v45 = vmul.f32 0.5, %v2315_v10  ;;  %v2324_v50 = vld [vmem:[#allocation8_spill] sm:$0xff] }
 0x280   :  { %v1410_v51 = vpop.eup %1409  ;;  %v936_v19 = vmul.f32 %v920_v14, %v472_v24  ;;  %v469_v30 = vmul.f32 0.5, %v2316_v52  ;;  %v873_v23 = vmul.f32 %v2317_v12, %v729_v39  ;;  %v474_v1 = vmul.f32 0.5, %v2318_v7  ;;  %v2326_v24 = vld [vmem:[#allocation9_spill] sm:$0xff]  ;;  %v2328_v52 = vld [vmem:[#allocation12_spill] sm:$0xff] }
 0x281   :  { %1336 = vmatmul.mubr.msk.bf16.gmra.mxu1 %vm61_vm0, %v942_v35  ;;  %v934_v2 = vmul.f32 %v918_v63, %v470_v33  ;;  %v906_v62 = vmul.f32 %v1410_v51, %v874_v44  ;;  %v935_v29 = vmul.f32 %v919_v15, %v471_v45  ;;  %v473_v34 = vmul.f32 0.5, %v2319_v37  ;;  %v2325_v63 = vld [vmem:[#allocation6_spill] sm:$0xff]  ;;  %v2327_v44 = vld [vmem:[#allocation7_spill] sm:$0xff] }
 0x282   :  { %v1412_v6 = vpop.eup %1411  ;;  %1339 = vmatprep.mubr.msk.bf16.mxu1 %vm61_vm0, %v943_v18  ;;  %v933_v4 = vmul.f32 %v917_v28, %v469_v30  ;;  %v2331_v37 = vld [vmem:[#allocation11_spill] sm:$0xff] }
 0x283   :  { %v904_v11 = vmul.f32 %v1412_v6, %v873_v23  ;;  %v945_v20 = vpack.c.bf16 %v936_v19, %v935_v29  ;;  %v922_v0 = vadd.f32 1.0, %v906_v62  ;;  %v2329_v62 = vld [vmem:[#allocation10_spill] sm:$0xff] }
 0x284   :  { %v944_v31 = vpack.c.bf16 %v934_v2, %v933_v4 }
 0x285   :  { %v921_v41 = vadd.f32 1.0, %v904_v11  ;;  %v938_v56 = vmul.f32 %v922_v0, %v474_v1 }
 0x287   :  { %v937_v57 = vmul.f32 %v921_v41, %v473_v34 }
 0x289   :  { %1340 = vmatmul.mubr.msk.bf16.gmra.mxu1 %vm61_vm0, %v944_v31  ;;  %v946_v49 = vpack.c.bf16 %v938_v56, %v937_v57  ;;  %v2330_v31 = vld [vmem:[#allocation13_spill] sm:$0xff] }
 0x28a   :  { %1343 = vmatprep.mubr.msk.bf16.mxu1 %vm61_vm0, %v945_v20 }
 0x291   :  { %1344 = vmatmul.mubr.msk.bf16.gmra.mxu1 %vm61_vm0, %v946_v49 }
 0x339   :  { %v1333_v26 = vpop.f32.mrf.mxu1 }
 0x33a   :  { %v1029_v40 = vadd.f32 %v1333_v26, %v2137_v58  ;;  %v2332_v26 = vld [vmem:[#allocation16_spill] sm:$0xff] }
 0x33b   :  { %v1020_v17 = vpop.f32.mrf.mxu1 }
 0x33c   :  { %v1085_v5 = vadd.f32 %v2320_v22, %v1029_v40  ;;  %v1021_v9 = vadd.f32 %v2137_v58, %v1020_v17 }
 0x33d   :  { %v1334_v55 = vpop.f32.mrf.mxu1 }
 0x33e   :  { %v1240_v32 = vpack.c.bf16 %v1085_v5, %v1085_v5  ;;  %v1083_v21 = vadd.f32 %v2321_v60, %v1021_v9  ;;  %v1032_v61 = vadd.f32 %v1334_v55, %v2137_v58  ;;  %v2333_v9 = vld [vmem:[#allocation14_spill] sm:$0xff] }
 0x33f   :  { %v1023_v8 = vpop.f32.mrf.mxu1 }
 0x340   :  { %1166 = vst.msk [vmem:[%s2242_s7 + $0x8] sm:$0xf] %vm1163_vm1, %v1240_v32  ;;  %v1238_v48 = vpack.c.bf16 %v1083_v21, %v1083_v21  ;;  %v1086_v27 = vadd.f32 %v2322_v46, %v1032_v61  ;;  %v1024_v25 = vadd.f32 %v2137_v58, %v1023_v8  ;;  %v2334_v61 = vld [vmem:[#allocation17_spill] sm:$0xff] }
 0x341   :  { %v1337_v16 = vpop.f32.mrf.mxu1 }
 0x342   :  { %1164 = vst.msk [vmem:[%s2242_s7] sm:$0xf] %vm1163_vm1, %v1238_v48  ;;  %v1241_v47 = vpack.c.bf16 %v1086_v27, %v1086_v27  ;;  %v1084_v43 = vadd.f32 %v2323_v42, %v1024_v25  ;;  %v1045_v53 = vadd.f32 %v1337_v16, %v2137_v58  ;;  %v2335_v27 = vld [vmem:[#allocation15_spill] sm:$0xff] }
 0x343   :  { %v1036_v3 = vpop.f32.mrf.mxu1 }
 0x344   :  { %1167 = vst.msk [vmem:[%s2242_s7 + $0xc] sm:$0xf] %vm1163_vm1, %v1241_v47  ;;  %v1239_v54 = vpack.c.bf16 %v1084_v43, %v1084_v43  ;;  %v1089_v38 = vadd.f32 %v2324_v50, %v1045_v53  ;;  %v1037_v18 = vadd.f32 %v2137_v58, %v1036_v3 }
 0x345   :  { %v1338_v14 = vpop.f32.mrf.mxu1 }
 0x346   :  { %1165 = vst.msk [vmem:[%s2242_s7 + $0x4] sm:$0xf] %vm1163_vm1, %v1239_v54  ;;  %v1244_v35 = vpack.c.bf16 %v1089_v38, %v1089_v38  ;;  %v1087_v39 = vadd.f32 %v2325_v63, %v1037_v18  ;;  %v1048_v51 = vadd.f32 %v1338_v14, %v2137_v58 }
 0x347   :  { %v1039_v15 = vpop.f32.mrf.mxu1 }
 0x348   :  { %1170 = vst.msk [vmem:[%s2242_s7 + $0x18] sm:$0xf] %vm1163_vm1, %v1244_v35  ;;  %v1242_v59 = vpack.c.bf16 %v1087_v39, %v1087_v39  ;;  %v1090_v28 = vadd.f32 %v2326_v24, %v1048_v51  ;;  %v1040_v13 = vadd.f32 %v2137_v58, %v1039_v15 }
 0x349   :  { %v1341_v33 = vpop.f32.mrf.mxu1 }
 0x34a   :  { %1168 = vst.msk [vmem:[%s2242_s7 + $0x10] sm:$0xf] %vm1163_vm1, %v1242_v59  ;;  %v1245_v36 = vpack.c.bf16 %v1090_v28, %v1090_v28  ;;  %v1088_v6 = vadd.f32 %v2327_v44, %v1040_v13  ;;  %v1061_v10 = vadd.f32 %v1341_v33, %v2137_v58 }
 0x34b   :  { %v1052_v45 = vpop.f32.mrf.mxu1 }
 0x34c   :  { %1171 = vst.msk [vmem:[%s2242_s7 + $0x1c] sm:$0xf] %vm1163_vm1, %v1245_v36  ;;  %v1243_v19 = vpack.c.bf16 %v1088_v6, %v1088_v6  ;;  %v1093_v30 = vadd.f32 %v2328_v52, %v1061_v10  ;;  %v1053_v2 = vadd.f32 %v2137_v58, %v1052_v45 }
 0x34d   :  { %v1342_v12 = vpop.f32.mrf.mxu1 }
 0x34e   :  { %1169 = vst.msk [vmem:[%s2242_s7 + $0x14] sm:$0xf] %vm1163_vm1, %v1243_v19  ;;  %v1248_v23 = vpack.c.bf16 %v1093_v30, %v1093_v30  ;;  %v1091_v29 = vadd.f32 %v2329_v62, %v1053_v2  ;;  %v1064_v4 = vadd.f32 %v1342_v12, %v2137_v58 }
 0x34f   :  { %v1055_v11 = vpop.f32.mrf.mxu1 }
 0x350   :  { %1174 = vst.msk [vmem:[%s2242_s7 + $0x28] sm:$0xf] %vm1163_vm1, %v1248_v23  ;;  %v1246_v20 = vpack.c.bf16 %v1091_v29, %v1091_v29  ;;  %v1094_v0 = vadd.f32 %v2330_v31, %v1064_v4  ;;  %v1056_v41 = vadd.f32 %v2137_v58, %v1055_v11 }
 0x351   :  { %v1345_v7 = vpop.f32.mrf.mxu1 }
 0x352   :  { %1172 = vst.msk [vmem:[%s2242_s7 + $0x20] sm:$0xf] %vm1163_vm1, %v1246_v20  ;;  %v1249_v1 = vpack.c.bf16 %v1094_v0, %v1094_v0  ;;  %v1092_v34 = vadd.f32 %v2331_v37, %v1056_v41  ;;  %v1077_v56 = vadd.f32 %v1345_v7, %v2137_v58 }
 0x353   :  { %v1068_v57 = vpop.f32.mrf.mxu1 }
 0x354   :  { %1175 = vst.msk [vmem:[%s2242_s7 + $0x2c] sm:$0xf] %vm1163_vm1, %v1249_v1  ;;  %v1247_v49 = vpack.c.bf16 %v1092_v34, %v1092_v34  ;;  %v1097_v40 = vadd.f32 %v2332_v26, %v1077_v56  ;;  %v1069_v17 = vadd.f32 %v2137_v58, %v1068_v57 }
 0x355   :  { %v1346_v22 = vpop.f32.mrf.mxu1 }
 0x356   :  { %1173 = vst.msk [vmem:[%s2242_s7 + $0x24] sm:$0xf] %vm1163_vm1, %v1247_v49  ;;  %v1252_v5 = vpack.c.bf16 %v1097_v40, %v1097_v40  ;;  %v1095_v55 = vadd.f32 %v2333_v9, %v1069_v17  ;;  %v1080_v32 = vadd.f32 %v1346_v22, %v2137_v58 }
 0x357   :  { %v1071_v60 = vpop.f32.mrf.mxu1 }
 0x358   :  { %1178 = vst.msk [vmem:[%s2242_s7 + $0x38] sm:$0xf] %vm1163_vm1, %v1252_v5  ;;  %v1250_v21 = vpack.c.bf16 %v1095_v55, %v1095_v55  ;;  %v1098_v8 = vadd.f32 %v2334_v61, %v1080_v32  ;;  %v1072_v48 = vadd.f32 %v2137_v58, %v1071_v60 }
 0x35a   :  { %1176 = vst.msk [vmem:[%s2242_s7 + $0x30] sm:$0xf] %vm1163_vm1, %v1250_v21  ;;  %v1253_v46 = vpack.c.bf16 %v1098_v8, %v1098_v8  ;;  %v1096_v25 = vadd.f32 %v2335_v27, %v1072_v48 }
 0x35c   :  { %1179 = vst.msk [vmem:[%s2242_s7 + $0x3c] sm:$0xf] %vm1163_vm1, %v1253_v46  ;;  %v1251_v16 = vpack.c.bf16 %v1096_v25, %v1096_v25 }
 0x35e   :  { %1177 = vst.msk [vmem:[%s2242_s7 + $0x34] sm:$0xf] %vm1163_vm1, %v1251_v16 }

// kernel: t2t_vit_forward.15
= control target key start
LH: loop header
LB: loop body
LE: loop exit
PB: predicated region body
PF: predicated region fallthrough
CT: control target
= control target key end

     0   :  { %v255_v0 = vmov 0   ;;  %vm116_vm0 = vcmask 130048   ;;  %vm188_vm1 = vcmask 257024   ;;  %s334_s1 = inlined_call_operand.vmem [shape: bf16[144,32], index: 1, kind: input, shape index: {}]   ;;  %s335_s0 = inlined_call_operand.vmem [shape: bf16[32,144], index: 0, kind: input, shape index: {}]   ;;  %s336_s2 = inlined_call_operand.vmem [shape: f32[1,32], index: 2, kind: input, shape index: {}]   ;;  %s337_s3 = inlined_call_operand.vmem [shape: bf16[32,32], index: 3, kind: output, shape index: {}]  }
   0x1   :  { %123 = vmatprep.subr.bf16.mxu0 %v255_v0  ;;  %221 = vmatprep.subr.bf16.mxu1 %v255_v0  ;;  %v240_v1 = vld [vmem:[%s334_s1 + $0x38] sm:$0xff]   ;;  %v241_v2 = vld [vmem:[%s334_s1 + $0x30] sm:$0xff]   ;;  %v242_v3 = vld [vmem:[%s334_s1 + $0x28] sm:$0xff]  }
   0x2   :  { %124 = vmatpush1.bf16.msra.mxu0 %v240_v1  ;;  %230 = vmatpush1.bf16.msra.mxu1 %v240_v1  ;;  %v243_v4 = vld [vmem:[%s334_s1 + $0x20] sm:$0xff]   ;;  %v254_v6 = vld [vmem:[%s335_s0 + $0x14] ss:$8 sps:$4 sm:$0xff]   ;;  %v246_v9 = vld [vmem:[%s334_s1 + $0x8] sm:$0xff]  }
   0x3   :  { %125 = vmatprep.subr.bf16.mxu0 %v255_v0  ;;  %222 = vmatprep.subr.bf16.mxu1 %v255_v0  ;;  %v251_v5 = vld [vmem:[%s335_s0 + $0x4] ss:$8 sps:$4 sm:$0xff]   ;;  %v244_v7 = vld [vmem:[%s334_s1 + $0x18] sm:$0xff]   ;;  %v245_v8 = vld [vmem:[%s334_s1 + $0x10] sm:$0xff]  }
   0x4   :  { %211 = vmatprep.mubr.msk.bf16.mxu0 %vm116_vm0, %v251_v5  ;;  %212 = vmatprep.mubr.msk.bf16.mxu1 %vm116_vm0, %v254_v6  ;;  %v247_v10 = vld [vmem:[%s334_s1] sm:$0xff]   ;;  %v252_v13 = vld [vmem:[%s335_s0 + $0x10] ss:$8 sps:$4 sm:$0xff]  }
   0x5   :  { %v248_v11 = vld [vmem:[%s334_s1 + $0x40] sm:$0xff]  }
   0x6   :  { %126 = vmatpush1.bf16.msra.mxu0 %v241_v2  ;;  %231 = vmatpush1.bf16.msra.mxu1 %v241_v2  ;;  %v249_v12 = vld [vmem:[%s335_s0] ss:$8 sps:$4 sm:$0xff]  }
   0x7   :  { %127 = vmatprep.subr.bf16.mxu0 %v255_v0  ;;  %223 = vmatprep.subr.bf16.mxu1 %v255_v0  ;;  %v197_v14 = vld [vmem:[%s336_s2] ss:$0 sm:$0xff] }
   0xa   :  { %128 = vmatpush1.bf16.msra.mxu0 %v242_v3  ;;  %232 = vmatpush1.bf16.msra.mxu1 %v242_v3 }
   0xb   :  { %129 = vmatprep.subr.bf16.mxu0 %v255_v0  ;;  %224 = vmatprep.subr.bf16.mxu1 %v255_v0 }
   0xe   :  { %130 = vmatpush1.bf16.msra.mxu0 %v243_v4  ;;  %233 = vmatpush1.bf16.msra.mxu1 %v243_v4 }
   0xf   :  { %131 = vmatprep.subr.bf16.mxu0 %v255_v0  ;;  %225 = vmatprep.subr.bf16.mxu1 %v255_v0 }
  0x12   :  { %132 = vmatpush1.bf16.msra.mxu0 %v244_v7  ;;  %234 = vmatpush1.bf16.msra.mxu1 %v244_v7 }
  0x13   :  { %133 = vmatprep.subr.bf16.mxu0 %v255_v0  ;;  %226 = vmatprep.subr.bf16.mxu1 %v255_v0 }
  0x16   :  { %134 = vmatpush1.bf16.msra.mxu0 %v245_v8  ;;  %235 = vmatpush1.bf16.msra.mxu1 %v245_v8 }
  0x17   :  { %135 = vmatprep.subr.bf16.mxu0 %v255_v0  ;;  %227 = vmatprep.subr.bf16.mxu1 %v255_v0 }
  0x1a   :  { %136 = vmatpush1.bf16.msra.mxu0 %v246_v9  ;;  %236 = vmatpush1.bf16.msra.mxu1 %v246_v9 }
  0x1b   :  { %137 = vmatprep.subr.bf16.mxu0 %v255_v0  ;;  %228 = vmatprep.subr.bf16.mxu1 %v255_v0 }
  0x1e   :  { %138 = vmatpush1.bf16.msra.mxu0 %v247_v10  ;;  %237 = vmatpush1.bf16.msra.mxu1 %v247_v10 }
  0x1f   :  { %153 = vmatprep.subr.bf16.mxu0 %v255_v0  ;;  %229 = vmatprep.subr.bf16.mxu1 %v255_v0 }
  0x22   :  { %154 = vmatpush2.bf16.msra.mxu0 %v248_v11  ;;  %238 = vmatpush2.bf16.msra.mxu1 %v248_v11 }
  0x25   :  { %156 = vmatmul.mubr.bf16.vlgmr.msra.gmra.mxu0 %v249_v12  ;;  %164 = vmatmul.mubr.bf16.vlgmr.msra.gmra.mxu1 %v252_v13 }
  0xe5   :  { %v157_v15 = vpop.f32.mrf.mxu0  ;;  %v165_v16 = vpop.f32.mrf.mxu1 }
  0xe6   :  { %v158_v17 = vadd.f32 %v197_v14, %v157_v15  ;;  %v166_v18 = vadd.f32 %v197_v14, %v165_v16 }
  0xe7   :  { %v159_v19 = vpop.f32.mrf.mxu0  ;;  %v167_v20 = vpop.f32.mrf.mxu1 }
  0xe8   :  { %v217_v21 = vpack.c.bf16 %v158_v17, %v158_v17  ;;  %v219_v22 = vpack.c.bf16 %v166_v18, %v166_v18 }
  0xe9   :  { %v160_v23 = vpop.f32.mrf.mxu0  ;;  %v168_v24 = vpop.f32.mrf.mxu1 }
  0xea   :  { %189 = vst.msk [vmem:[%s337_s3] sm:$0xf] %vm188_vm1, %v217_v21  ;;  %191 = vst.msk [vmem:[%s337_s3 + $0x8] sm:$0xf] %vm188_vm1, %v219_v22  ;;  %v161_v25 = vadd.f32 %v197_v14, %v160_v23  ;;  %v169_v26 = vadd.f32 %v197_v14, %v168_v24 }
  0xeb   :  { %v162_v27 = vpop.f32.mrf.mxu0  ;;  %v170_v28 = vpop.f32.mrf.mxu1 }
  0xec   :  { %v218_v29 = vpack.c.bf16 %v161_v25, %v161_v25  ;;  %v220_v30 = vpack.c.bf16 %v169_v26, %v169_v26 }
  0xee   :  { %190 = vst.msk [vmem:[%s337_s3 + $0x4] sm:$0xf] %vm188_vm1, %v218_v29  ;;  %192 = vst.msk [vmem:[%s337_s3 + $0xc] sm:$0xf] %vm188_vm1, %v220_v30 }

// kernel: t2t_vit_forward.16
= control target key start
LH: loop header
LB: loop body
LE: loop exit
PB: predicated region body
PF: predicated region fallthrough
CT: control target
= control target key end

     0   :  { %vm36_vm0 = vcmask 261120   ;;  %vm49_vm1 = vcmask 254976   ;;  %v365_v38 = vmov 0.0   ;;  %vm366_vm2 = vmmov 0   ;;  %s367_s15 = smov 96   ;;  %s368_s19 = smov 64   ;;  %s524_s0 = inlined_call_operand.vmem [shape: bf16[34,32], index: 0, kind: input, shape index: {}]   ;;  %s525_s3 = inlined_call_operand.vmem [shape: bf16[32,96], index: 3, kind: input, shape index: {}]   ;;  %s526_s1 = inlined_call_operand.vmem [shape: f32[1,32], index: 1, kind: input, shape index: {}]   ;;  %s527_s2 = inlined_call_operand.vmem [shape: f32[1,32], index: 2, kind: input, shape index: {}]   ;;  %s528_s4 = inlined_call_operand.vmem [shape: f32[1,96], index: 4, kind: input, shape index: {}]   ;;  %s529_s5 = inlined_call_operand.vmem [shape: bf16[1,34,32], index: 5, kind: output, shape index: {0}]   ;;  %s530_s6 = inlined_call_operand.vmem [shape: bf16[1,34,32], index: 6, kind: output, shape index: {1}]   ;;  %s531_s7 = inlined_call_operand.vmem [shape: bf16[1,34,32], index: 7, kind: output, shape index: {2}]  }
   0x1   :  { %v323_v0 = vld [vmem:[%s524_s0 + $0x8] sm:$0xff]   ;;  %v316_v1 = vld [vmem:[%s524_s0] sm:$0xff]   ;;  %v28_v5 = vld [vmem:[%s524_s0 + $0x10] sm:$0x1]  ;;  %345 = vmatprep.subr.bf16.mxu1 %v365_v38  ;;  %329 = vmatprep.subr.bf16.mxu0 %v365_v38  ;;  %vm238_vm3 = vcmask 257024   ;;  %vm243_vm4 = vcmask 253952  }
   0x2   :  { %v321_v2 = vunpack.c.l.bf16 %v323_v0  ;;  %v322_v3 = vunpack.c.h.bf16 %v323_v0  ;;  %v317_v4 = vunpack.c.l.bf16 %v316_v1  ;;  %v318_v6 = vunpack.c.h.bf16 %v316_v1  ;;  %v353_v39 = vld [vmem:[%s525_s3 + $0x8] sm:$0xff]   ;;  %337 = vmatprep.mubr.msk.bf16.mxu1 %vm366_vm2, %v365_v38  ;;  %333 = vmatprep.mubr.msk.bf16.mxu0 %vm366_vm2, %v365_v38  ;;  %v354_v40 = vld [vmem:[%s525_s3] sm:$0xff]  }
   0x3   :  { %v33_v10 = vunpack.c.l.bf16 %v28_v5  ;;  %347 = vmatpush3.bf16.msra.mxu1 %v353_v39  ;;  %330 = vmatpush3.bf16.msra.mxu0 %v353_v39  ;;  %v297_v58 = vld [vmem:[%s526_s1] ss:$0 sm:$0xff] }
   0x4   :  { %v43_v7 = vsel %vm36_vm0, %v321_v2, 0.0  ;;  %v37_v8 = vsel %vm36_vm0, %v317_v4, 0.0  ;;  %v46_v9 = vsel %vm36_vm0, %v322_v3, 0.0  ;;  %v40_v11 = vsel %vm36_vm0, %v318_v6, 0.0  ;;  %346 = vmatprep.subr.bf16.mxu1 %v365_v38  ;;  %331 = vmatprep.subr.bf16.mxu0 %v365_v38  ;;  %v298_v63 = vld [vmem:[%s527_s2] ss:$0 sm:$0xff] }
   0x5   :  { %44 = vadd.xlane.f32.xlu0 %v43_v7  ;;  %38 = vadd.xlane.f32.xlu1 %v37_v8  ;;  %v50_v12 = vsel %vm49_vm1, %v33_v10, 0.0 }
   0x7   :  { %348 = vmatpush3.bf16.msra.mxu1 %v354_v40  ;;  %332 = vmatpush3.bf16.msra.mxu0 %v354_v40 }
   0x9   :  { %47 = vadd.xlane.f32.xlu0 %v46_v9  ;;  %41 = vadd.xlane.f32.xlu1 %v40_v11 }
   0xd   :  { %51 = vadd.xlane.f32.xlu0 %v50_v12 }
  0x8e   :  { %v45_v13 = vpop.xlane.xlu0 %44  ;;  %v39_v14 = vpop.xlane.xlu1 %38 }
  0x8f   :  { %v56_v15 = vmul.f32 0.03125, %v45_v13  ;;  %v54_v16 = vmul.f32 0.03125, %v39_v14 }
  0x91   :  { %v423_v17 = vsub.f32 %v321_v2, %v56_v15  ;;  %v425_v18 = vsub.f32 %v317_v4, %v54_v16 }
  0x92   :  { %v48_v19 = vpop.xlane.xlu0 %47  ;;  %v42_v20 = vpop.xlane.xlu1 %41 }
  0x93   :  { %v57_v21 = vmul.f32 0.03125, %v48_v19  ;;  %v66_v22 = vmul.f32 %v423_v17, %v423_v17  ;;  %v55_v23 = vmul.f32 0.03125, %v42_v20  ;;  %v64_v24 = vmul.f32 %v425_v18, %v425_v18 }
  0x95   :  { %v62_v25 = vsub.f32 %v322_v3, %v57_v21  ;;  %v75_v26 = vsel %vm36_vm0, %v66_v22, 0.0  ;;  %v432_v27 = vsub.f32 %v318_v6, %v55_v23  ;;  %v69_v31 = vsel %vm36_vm0, %v64_v24, 0.0 }
  0x96   :  { %v52_v28 = vpop.xlane.xlu0 %51  ;;  %76 = vadd.xlane.f32.xlu1 %v75_v26 }
  0x97   :  { %v58_v29 = vmul.f32 0.03125, %v52_v28  ;;  %v67_v30 = vmul.f32 %v62_v25, %v62_v25  ;;  %v65_v32 = vmul.f32 %v432_v27, %v432_v27 }
  0x99   :  { %v63_v33 = vsub.f32 %v33_v10, %v58_v29  ;;  %v78_v34 = vsel %vm36_vm0, %v67_v30, 0.0  ;;  %v72_v36 = vsel %vm36_vm0, %v65_v32, 0.0 }
  0x9a   :  { %79 = vadd.xlane.f32.xlu0 %v78_v34  ;;  %70 = vadd.xlane.f32.xlu1 %v69_v31 }
  0x9b   :  { %v68_v35 = vmul.f32 %v63_v33, %v63_v33 }
  0x9d   :  { %v81_v37 = vsel %vm49_vm1, %v68_v35, 0.0 }
  0x9e   :  { %82 = vadd.xlane.f32.xlu1 %v81_v37  ;;  %73 = vadd.xlane.f32.xlu0 %v72_v36 }
 0x11f   :  { %v77_v41 = vpop.xlane.xlu1 %76 }
 0x120   :  { %v86_v42 = vmul.f32 0.03125, %v77_v41 }
 0x122   :  { %v91_v43 = vadd.f32 1e-05, %v86_v42 }
 0x123   :  { %v80_v44 = vpop.xlane.xlu0 %79  ;;  %v71_v45 = vpop.xlane.xlu1 %70 }
 0x124   :  { %355 = vrsqrt.f32 %v91_v43  ;;  %v87_v46 = vmul.f32 0.03125, %v80_v44  ;;  %v84_v47 = vmul.f32 0.03125, %v71_v45 }
 0x126   :  { %v92_v48 = vadd.f32 1e-05, %v87_v46  ;;  %v89_v49 = vadd.f32 1e-05, %v84_v47 }
 0x127   :  { %v74_v50 = vpop.xlane.xlu0 %73  ;;  %v83_v51 = vpop.xlane.xlu1 %82 }
 0x128   :  { %357 = vrsqrt.f32 %v92_v48  ;;  %v85_v52 = vmul.f32 0.03125, %v74_v50  ;;  %v88_v53 = vmul.f32 0.03125, %v83_v51 }
 0x129   :  { %359 = vrsqrt.f32 %v89_v49 }
 0x12a   :  { %v90_v54 = vadd.f32 1e-05, %v85_v52  ;;  %v93_v55 = vadd.f32 1e-05, %v88_v53 }
 0x12c   :  { %361 = vrsqrt.f32 %v90_v54 }
 0x12d   :  { %363 = vrsqrt.f32 %v93_v55 }
 0x131   :  { %v356_v56 = vpop.eup %355 }
 0x132   :  { %v101_v57 = vmul.f32 %v356_v56, %v423_v17  ;;  %v299_v17 = vld [vmem:[%s528_s4] ss:$0 sm:$0xff] }
 0x134   :  { %v112_v62 = vmul.f32 %v297_v58, %v101_v57 }
 0x135   :  { %v358_v59 = vpop.eup %357 }
 0x136   :  { %v360_v60 = vpop.eup %359  ;;  %v102_v61 = vmul.f32 %v358_v59, %v62_v25  ;;  %v123_v4 = vadd.f32 %v298_v63, %v112_v62 }
 0x137   :  { %v99_v0 = vmul.f32 %v360_v60, %v425_v18 }
 0x138   :  { %v113_v1 = vmul.f32 %v297_v58, %v102_v61 }
 0x139   :  { %v362_v2 = vpop.eup %361  ;;  %v110_v7 = vmul.f32 %v297_v58, %v99_v0 }
 0x13a   :  { %v364_v3 = vpop.eup %363  ;;  %v124_v5 = vadd.f32 %v298_v63, %v113_v1  ;;  %v100_v6 = vmul.f32 %v362_v2, %v432_v27 }
 0x13b   :  { %v103_v8 = vmul.f32 %v364_v3, %v63_v33  ;;  %v121_v12 = vadd.f32 %v298_v63, %v110_v7 }
 0x13c   :  { %v127_v9 = vpack.c.bf16 %v124_v5, %v123_v4  ;;  %v111_v10 = vmul.f32 %v297_v58, %v100_v6 }
 0x13d   :  { %v114_v11 = vmul.f32 %v297_v58, %v103_v8 }
 0x13e   :  { %338 = vmatmul.mubr.msk.bf16.vlgmr.msra.gmra.mxu1 %vm36_vm0, %v127_v9  ;;  %v122_v13 = vadd.f32 %v298_v63, %v111_v10 }
 0x13f   :  { %341 = vmatprep.mubr.msk.bf16.mxu1 %vm366_vm2, %v365_v38  ;;  %v125_v15 = vadd.f32 %v298_v63, %v114_v11 }
 0x140   :  { %v126_v14 = vpack.c.bf16 %v122_v13, %v121_v12 }
 0x141   :  { %v128_v16 = vpack.c.bf16 %v125_v15, %v125_v15 }
 0x142   :  { %334 = vmatmul.mubr.msk.bf16.vlgmr.msra.gmra.mxu0 %vm36_vm0, %v126_v14 }
 0x146   :  { %342 = vmatmul.mubr.msk.bf16.gmra.mxu1 %vm36_vm0, %v128_v16 }
 0x1fe   :  { %v203_v18 = vpop.f32.mrf.mxu1 }
 0x1ff   :  { %v204_v19 = vadd.f32 %v299_v17, %v203_v18 }
 0x200   :  { %v339_v20 = vpop.f32.mrf.mxu1 }
 0x201   :  { %v312_v21 = vpack.c.bf16 %v204_v19, %v204_v19 }
 0x202   :  { %v195_v22 = vpop.f32.mrf.mxu0  ;;  %v206_v23 = vpop.f32.mrf.mxu1 }
 0x203   :  { %241 = vst.msk [vmem:[%s529_s5 + $0x8] sm:$0xf] %vm238_vm3, %v312_v21  ;;  %v196_v24 = vadd.f32 %v299_v17, %v195_v22  ;;  %v207_v25 = vadd.f32 %v299_v17, %v206_v23  ;;  %249 = vrot.lane.b32.xlu1 %v312_v21, %s367_s15 }
 0x204   :  { %v335_v26 = vpop.f32.mrf.mxu0  ;;  %v340_v27 = vpop.f32.mrf.mxu1 }
 0x205   :  { %v310_v28 = vpack.c.bf16 %v196_v24, %v196_v24  ;;  %v313_v29 = vpack.c.bf16 %v207_v25, %v207_v25 }
 0x206   :  { %v198_v30 = vpop.f32.mrf.mxu0  ;;  %v211_v31 = vpop.f32.mrf.mxu1 }
 0x207   :  { %239 = vst.msk [vmem:[%s529_s5] sm:$0xf] %vm238_vm3, %v310_v28  ;;  %242 = vst.msk [vmem:[%s529_s5 + $0xc] sm:$0xf] %vm238_vm3, %v313_v29  ;;  %v199_v32 = vadd.f32 %v299_v17, %v198_v30  ;;  %v212_v33 = vadd.f32 %v299_v17, %v211_v31  ;;  %265 = vrot.lane.b32.xlu1 %v310_v28, %s368_s19  ;;  %245 = vrot.lane.b32.xlu0 %v310_v28, %s367_s15 }
 0x208   :  { %v336_v34 = vpop.f32.mrf.mxu0  ;;  %v343_v35 = vpop.f32.mrf.mxu1 }
 0x209   :  { %v311_v36 = vpack.c.bf16 %v199_v32, %v199_v32  ;;  %v314_v37 = vpack.c.bf16 %v212_v33, %v212_v33 }
 0x20a   :  { %v214_v38 = vpop.f32.mrf.mxu1 }
 0x20b   :  { %240 = vst.msk [vmem:[%s529_s5 + $0x4] sm:$0xf] %vm238_vm3, %v311_v36  ;;  %269 = vrot.lane.b32.xlu1 %v312_v21, %s368_s19  ;;  %267 = vrot.lane.b32.xlu0 %v311_v36, %s368_s19 }
 0x20c   :  { %244 = vst.msk [vmem:[%s529_s5 + $0x10] sm:$0x1] %vm243_vm4, %v314_v37  ;;  %v344_v39 = vpop.f32.mrf.mxu1 }
 0x20f   :  { %247 = vrot.lane.b32.xlu1 %v311_v36, %s367_s15  ;;  %253 = vrot.lane.b32.xlu0 %v314_v37, %s367_s15 }
 0x213   :  { %251 = vrot.lane.b32.xlu1 %v313_v29, %s367_s15  ;;  %271 = vrot.lane.b32.xlu0 %v313_v29, %s368_s19 }
 0x217   :  { %273 = vrot.lane.b32.xlu1 %v314_v37, %s368_s19 }
 0x275   :  { %v250_v40 = vpop.permute.xlu1 %249 }
 0x276   :  { %262 = vst.msk [vmem:[%s530_s6 + $0x8] sm:$0xf] %vm238_vm3, %v250_v40 }
 0x279   :  { %v246_v41 = vpop.permute.xlu0 %245  ;;  %v266_v42 = vpop.permute.xlu1 %265 }
 0x27a   :  { %260 = vst.msk [vmem:[%s530_s6] sm:$0xf] %vm238_vm3, %v246_v41  ;;  %280 = vst.msk [vmem:[%s531_s7] sm:$0xf] %vm238_vm3, %v266_v42 }
 0x27d   :  { %v268_v43 = vpop.permute.xlu0 %267  ;;  %v270_v44 = vpop.permute.xlu1 %269 }
 0x27e   :  { %281 = vst.msk [vmem:[%s531_s7 + $0x4] sm:$0xf] %vm238_vm3, %v268_v43  ;;  %282 = vst.msk [vmem:[%s531_s7 + $0x8] sm:$0xf] %vm238_vm3, %v270_v44 }
 0x281   :  { %v254_v45 = vpop.permute.xlu0 %253  ;;  %v248_v46 = vpop.permute.xlu1 %247 }
 0x282   :  { %264 = vst.msk [vmem:[%s530_s6 + $0x10] sm:$0x1] %vm243_vm4, %v254_v45 }
 0x283   :  { %261 = vst.msk [vmem:[%s530_s6 + $0x4] sm:$0xf] %vm238_vm3, %v248_v46 }
 0x285   :  { %v272_v47 = vpop.permute.xlu0 %271  ;;  %v252_v48 = vpop.permute.xlu1 %251 }
 0x286   :  { %283 = vst.msk [vmem:[%s531_s7 + $0xc] sm:$0xf] %vm238_vm3, %v272_v47  ;;  %263 = vst.msk [vmem:[%s530_s6 + $0xc] sm:$0xf] %vm238_vm3, %v252_v48 }
 0x289   :  { %v274_v49 = vpop.permute.xlu1 %273 }
 0x28a   :  { %284 = vst.msk [vmem:[%s531_s7 + $0x10] sm:$0x1] %vm243_vm4, %v274_v49 }

// kernel: t2t_vit_forward.18
= control target key start
LH: loop header
LB: loop body
LE: loop exit
PB: predicated region body
PF: predicated region fallthrough
CT: control target
= control target key end

     0   :  { %v232_v0 = vmov 0.0   ;;  %vm233_vm0 = vmmov 0   ;;  %vm59_vm1 = vcmask 261120   ;;  %vm161_vm2 = vcmask 257024   ;;  %s308_s1 = inlined_call_operand.vmem [shape: bf16[32,32], index: 1, kind: input, shape index: {}]   ;;  %s309_s0 = inlined_call_operand.vmem [shape: bf16[34,32], index: 0, kind: input, shape index: {}]   ;;  %s310_s3 = inlined_call_operand.vmem [shape: bf16[34,32], index: 3, kind: input, shape index: {}]   ;;  %s311_s2 = inlined_call_operand.vmem [shape: f32[1,32], index: 2, kind: input, shape index: {}]   ;;  %s312_s4 = inlined_call_operand.vmem [shape: bf16[34,32], index: 4, kind: output, shape index: {}]  }
   0x1   :  { %205 = vmatprep.subr.bf16.mxu0 %v232_v0  ;;  %221 = vmatprep.subr.bf16.mxu1 %v232_v0  ;;  %v227_v1 = vld [vmem:[%s308_s1 + $0x8] sm:$0xff]   ;;  %v228_v2 = vld [vmem:[%s308_s1] sm:$0xff]   ;;  %v231_v5 = vld [vmem:[%s309_s0 + $0x10] ss:$0 sps:$4 sm:$0x11]   ;;  %vm166_vm3 = vcmask 253952  }
   0x2   :  { %209 = vmatprep.mubr.msk.bf16.mxu0 %vm233_vm0, %v232_v0  ;;  %213 = vmatprep.mubr.msk.bf16.mxu1 %vm233_vm0, %v232_v0  ;;  %v229_v3 = vld [vmem:[%s309_s0] sm:$0xff]   ;;  %v230_v4 = vld [vmem:[%s309_s0 + $0x8] sm:$0xff]   ;;  %v129_v23 = vld [vmem:[%s310_s3 + $0x10] sm:$0x1] }
   0x3   :  { %206 = vmatpush3.bf16.msra.mxu0 %v227_v1  ;;  %223 = vmatpush3.bf16.msra.mxu1 %v227_v1  ;;  %v192_v6 = vld [vmem:[%s310_s3] sm:$0xff]   ;;  %v199_v7 = vld [vmem:[%s310_s3 + $0x8] sm:$0xff]   ;;  %v134_v32 = vunpack.c.l.bf16 %v129_v23 }
   0x4   :  { %207 = vmatprep.subr.bf16.mxu0 %v232_v0  ;;  %222 = vmatprep.subr.bf16.mxu1 %v232_v0  ;;  %v172_v8 = vld [vmem:[%s311_s2] ss:$0 sm:$0xff]  ;;  %v193_v9 = vunpack.c.l.bf16 %v192_v6  ;;  %v197_v10 = vunpack.c.l.bf16 %v199_v7  ;;  %v194_v19 = vunpack.c.h.bf16 %v192_v6  ;;  %v198_v20 = vunpack.c.h.bf16 %v199_v7 }
   0x7   :  { %208 = vmatpush3.bf16.msra.mxu0 %v228_v2  ;;  %224 = vmatpush3.bf16.msra.mxu1 %v228_v2 }
   0xa   :  { %210 = vmatmul.mubr.msk.bf16.vlgmr.msra.gmra.mxu0 %vm59_vm1, %v229_v3  ;;  %214 = vmatmul.mubr.msk.bf16.vlgmr.msra.gmra.mxu1 %vm59_vm1, %v230_v4 }
   0xb   :  { %217 = vmatprep.mubr.msk.bf16.mxu1 %vm233_vm0, %v232_v0 }
  0x12   :  { %218 = vmatmul.mubr.msk.bf16.gmra.mxu1 %vm59_vm1, %v231_v5 }
  0xca   :  { %v103_v11 = vpop.f32.mrf.mxu0  ;;  %v111_v12 = vpop.f32.mrf.mxu1 }
  0xcb   :  { %v104_v13 = vadd.f32 %v172_v8, %v103_v11  ;;  %v112_v14 = vadd.f32 %v172_v8, %v111_v12 }
  0xcc   :  { %v211_v15 = vpop.f32.mrf.mxu0  ;;  %v215_v16 = vpop.f32.mrf.mxu1 }
  0xcd   :  { %v135_v17 = vadd.f32 %v193_v9, %v104_v13  ;;  %v137_v18 = vadd.f32 %v197_v10, %v112_v14 }
  0xce   :  { %v106_v21 = vpop.f32.mrf.mxu0  ;;  %v114_v22 = vpop.f32.mrf.mxu1 }
  0xcf   :  { %v186_v24 = vpack.c.bf16 %v135_v17, %v135_v17  ;;  %v188_v25 = vpack.c.bf16 %v137_v18, %v137_v18  ;;  %v107_v26 = vadd.f32 %v172_v8, %v106_v21  ;;  %v115_v27 = vadd.f32 %v172_v8, %v114_v22 }
  0xd0   :  { %v212_v28 = vpop.f32.mrf.mxu0  ;;  %v216_v29 = vpop.f32.mrf.mxu1 }
  0xd1   :  { %162 = vst.msk [vmem:[%s312_s4] sm:$0xf] %vm161_vm2, %v186_v24  ;;  %164 = vst.msk [vmem:[%s312_s4 + $0x8] sm:$0xf] %vm161_vm2, %v188_v25  ;;  %v136_v30 = vadd.f32 %v194_v19, %v107_v26  ;;  %v138_v31 = vadd.f32 %v198_v20, %v115_v27 }
  0xd2   :  { %v119_v33 = vpop.f32.mrf.mxu1 }
  0xd3   :  { %v187_v34 = vpack.c.bf16 %v136_v30, %v136_v30  ;;  %v189_v35 = vpack.c.bf16 %v138_v31, %v138_v31  ;;  %v120_v36 = vadd.f32 %v172_v8, %v119_v33 }
  0xd4   :  { %v219_v37 = vpop.f32.mrf.mxu1 }
  0xd5   :  { %163 = vst.msk [vmem:[%s312_s4 + $0x4] sm:$0xf] %vm161_vm2, %v187_v34  ;;  %165 = vst.msk [vmem:[%s312_s4 + $0xc] sm:$0xf] %vm161_vm2, %v189_v35  ;;  %v139_v38 = vadd.f32 %v134_v32, %v120_v36 }
  0xd6   :  { %v122_v39 = vpop.f32.mrf.mxu1 }
  0xd7   :  { %v190_v40 = vpack.c.bf16 %v139_v38, %v139_v38 }
  0xd8   :  { %v220_v41 = vpop.f32.mrf.mxu1 }
  0xd9   :  { %167 = vst.msk [vmem:[%s312_s4 + $0x10] sm:$0x1] %vm166_vm3, %v190_v40 }

// kernel: t2t_vit_forward.17
= control target key start
LH: loop header
LB: loop body
LE: loop exit
PB: predicated region body
PF: predicated region fallthrough
CT: control target
= control target key end

     0   :  { %s1490_s12 = smov 0   ;;  %s1492_s13 = smov 0   ;;  %s1692_s0 = inlined_call_operand.vmem [shape: bf16[1,2,17,32], index: 0, kind: input, shape index: {}]   ;;  %s1693_s1 = inlined_call_operand.vmem [shape: bf16[1,2,17,32], index: 1, kind: input, shape index: {}]   ;;  %s1694_s2 = inlined_call_operand.vmem [shape: bf16[1,2,17,32], index: 2, kind: input, shape index: {}]   ;;  %s1695_s3 = inlined_call_operand.vmem [shape: bf16[2,17,32], index: 3, kind: output, shape index: {}]  }
   0x1   :  { %s1494_s14 = smov 0  }
   0x2 LB: > { %s25_s15 = sadd.s32 1, %s1457_s13  ;;  %p1196_p0 = scmp.ge.s32.totalorder %s1461_s14, 1  ;;  %s1461_s14 = sphi %s1494_s14, %s13_s14   ;;  %s1457_s13 = sphi %s1492_s13, %s1697_s13   ;;  %s1453_s12 = sphi %s1490_s12, %s1696_s12  }
   0x3   : > { %p27_p1 = scmp.ge.s32.totalorder %s25_s15, 2  ;;  %p189_p2 = scmp.lt.s32.totalorder %s1461_s14, 3 }
   0x5   : > { %s1699_s15 = smov (%p27_p1, %s25_s15), 0  ;;  %p190_p3 = pnand %p1196_p0, %p189_p2 }
   0x6   : > { %p240_p4 = scmp.lt.s32.totalorder (!%p190_p3), %s1453_s12, 1  ;;  %s1464_s26 = smov (!%p190_p3), 120  }
   0x7   : > { %193 = sbr.rel (%p190_p3) target bundleno = 2458 (0x99a), region = 32  ;;  %s1465_s30 = smov (!%p190_p3), 112  }
   0x8   : > { %s1466_s4 = smov (!%p190_p3), 104   ;;  %s1467_s5 = smov (!%p190_p3), 8  }
   0x9   : > { %s1468_s6 = smov (!%p190_p3), 16   ;;  %s1469_s7 = smov (!%p190_p3), 24  }
   0xc   : > { %s1701_s12 = smov (!%p240_p4, %s1453_s12), 1  ;;  %vm299_vm0 = vcmask 64512   ;;  %vm367_vm1 = vcmask 131072   ;;  %vm360_vm2 = vcmask 138240   ;;  %vm412_vm3 = vcmask 1040384  }
   0xd   : > { %s1508_s16 = smul.u32 12, %s1701_s12  ;;  %v1463_v29 = vmov 0   ;;  %vm482_vm4 = vcmask 57344   ;;  %vm483_vm5 = vsmask.f32 256  ;;  %vm479_vm7 = vcmask 60416  }
   0xe   : > { %v1550_v30 = vsel %vm412_vm3, 65535, %v1463_v29  ;;  %vm484_vm6 = vmand %vm482_vm4, %vm483_vm5  ;;  %vm675_vm8 = vcmask 122944   ;;  %vm672_vm10 = vcmask 126016   ;;  %vm864_vm11 = vcmask 191616  }
   0xf   : > { %s255_s19 = scalar_lea.vmem %s1693_s1, %s1508_s16  ;;  %s246_s22 = scalar_lea.vmem %s1692_s0, %s1508_s16  ;;  %vm676_vm9 = vmand %vm675_vm8, %vm483_vm5  ;;  %vm867_vm12 = vcmask 188544   ;;  %vm1059_vm14 = vcmask 254144  }
  0x10   : > { %v1514_v0 = vld [vmem:[%s255_s19 + $0x8] ss:$0 sps:$4 sm:$0x11]   ;;  %v1516_v1 = vld [vmem:[%s255_s19] sm:$0xff]   ;;  %s264_s25 = scalar_lea.vmem %s1694_s2, %s1508_s16  ;;  %s1578_s29 = scalar_lea.vmem %s1695_s3, %s1508_s16  ;;  %vm868_vm13 = vmand %vm867_vm12, %vm483_vm5 }
  0x11   : > { %1345 = vmatprep.subr.msk.bf16.mxu0 %vm299_vm0, %v1514_v0  ;;  %v310_v2 = vsel %vm299_vm0, %v1514_v0, 0  ;;  %v1526_v3 = vld [vmem:[%s246_s22] sm:$0xff]   ;;  %v307_v4 = vsel %vm299_vm0, %v1516_v1, 0  ;;  %v1534_v5 = vld [vmem:[%s246_s22 + $0x8] ss:$0 sps:$4 sm:$0x11]   ;;  %vm1060_vm15 = vmand %vm1059_vm14, %vm483_vm5 }
  0x12   : > { %1282 = vmatpush3.bf16.xpose.msra.mxu0 %v310_v2  ;;  %1285 = vmatprep.mubr.msk.bf16.mxu0 %vm299_vm0, %v1526_v3  ;;  %v1548_v28 = vld [vmem:[%s264_s25 + $0x8] ss:$0 sps:$4 sm:$0x11]   ;;  %v1554_v32 = vld [vmem:[%s264_s25] sm:$0xff]  }
  0x13   : > { %1346 = vmatprep.subr.msk.bf16.mxu0 %vm299_vm0, %v1516_v1  ;;  %v416_v31 = vand.u32 %v1548_v28, %v1550_v30  ;;  %v485_v51 = vld [vmem:[%s1578_s29 + $0x8] sm:$0x1] }
  0x15   : > { %1289 = vmatprep.subr.bf16.mxu1 %v416_v31 }
  0x16   : > { %1290 = vmatpush3.bf16.msra.mxu1 %v416_v31 }
  0x17   : > { %1291 = vmatprep.subr.bf16.mxu1 %v1554_v32 }
  0x1a   : > { %1284 = vmatpush3.bf16.xpose.msra.mxu0 %v307_v4  ;;  %1292 = vmatpush3.bf16.msra.mxu1 %v1554_v32 }
  0x21   : > { %1286 = vmatmul.mubr.msk.bf16.vlgmr.msra.gmra.mxu0 %vm299_vm0, %v1534_v5 }
  0xe1   : > { %v1287_v6 = vpop.f32.mrf.mxu0 }
  0xe2   : > { %v368_v7 = vsel %vm367_vm1, %v1287_v6, -inf }
  0xe3   : > { %369 = vmax.xlane.f32.xlu1 %v368_v7  ;;  %v346_v8 = vpop.f32.mrf.mxu0 }
  0xe4   : > { %v361_v9 = vsel %vm360_vm2, %v346_v8, -inf }
  0xe5   : > { %362 = vmax.xlane.f32.xlu0 %v361_v9  ;;  %v1288_v10 = vpop.f32.mrf.mxu0 }
  0xe7   : > { %v349_v11 = vpop.f32.mrf.mxu0 }
  0xe8   : > { %v364_v12 = vsel %vm360_vm2, %v349_v11, -inf }
  0xe9   : > { %365 = vmax.xlane.f32.xlu0 %v364_v12 }
 0x16c   : > { %v370_v13 = vpop.xlane.xlu1 %369 }
 0x16d   : > { %v373_v14 = vsub.f32 %v1287_v6, %v370_v13 }
 0x16e   : > { %v363_v15 = vpop.xlane.xlu0 %362 }
 0x16f   : > { %v371_v16 = vsub.f32 %v346_v8, %v363_v15  ;;  %v378_v17 = vmul.f32 1.442695, %v373_v14 }
 0x171   : > { %v374_v18 = vmul.f32 1.442695, %v371_v16 }
 0x172   : > { %v366_v19 = vpop.xlane.xlu0 %365 }
 0x173   : > { %1391 = vpow2.f32 %v374_v18  ;;  %v372_v20 = vsub.f32 %v349_v11, %v366_v19 }
 0x174   : > { %1393 = vpow2.f32 %v378_v17 }
 0x175   : > { %v376_v21 = vmul.f32 1.442695, %v372_v20 }
 0x177   : > { %1395 = vpow2.f32 %v376_v21 }
 0x180   : > { %v1392_v22 = vpop.eup %1391 }
 0x181   : > { %v380_v23 = vsel %vm360_vm2, %v1392_v22, 0.0  ;;  %v1394_v24 = vpop.eup %1393 }
 0x182   : > { %381 = vadd.xlane.f32.xlu1 %v380_v23  ;;  %v386_v26 = vsel %vm367_vm1, %v1394_v24, 0.0 }
 0x184   : > { %v1396_v25 = vpop.eup %1395 }
 0x185   : > { %v383_v27 = vsel %vm360_vm2, %v1396_v25, 0.0 }
 0x186   : > { %387 = vadd.xlane.f32.xlu1 %v386_v26  ;;  %384 = vadd.xlane.f32.xlu0 %v383_v27 }
 0x197   : > { %492 = vrot.lane.b32.xlu1 %v1516_v1, %s1464_s26 }
 0x19b   : > { %488 = vrot.lane.b32.xlu1 %v1526_v3, %s1464_s26 }
 0x19c   : > { %494 = vrot.lane.b32.xlu0 %v1514_v0, %s1464_s26 }
 0x19f   : > { %490 = vrot.lane.b32.xlu1 %v1534_v5, %s1464_s26 }
 0x20b   : > { %v382_v33 = vpop.xlane.xlu1 %381 }
 0x20c   : > { %1397 = vrcp.f32 %v382_v33 }
 0x20f   : > { %v388_v34 = vpop.xlane.xlu1 %387  ;;  %v385_v35 = vpop.xlane.xlu0 %384 }
 0x210   : > { %1399 = vrcp.f32 %v388_v34 }
 0x211   : > { %1401 = vrcp.f32 %v385_v35 }
 0x213   : > { %v495_v36 = vpop.permute.xlu0 %494  ;;  %v493_v38 = vpop.permute.xlu1 %492 }
 0x214   : > { %1347 = vmatprep.subr.msk.bf16.mxu1 %vm299_vm0, %v495_v36  ;;  %v506_v46 = vsel %vm299_vm0, %v495_v36, 0  ;;  %v503_v48 = vsel %vm299_vm0, %v493_v38, 0 }
 0x217   : > { %v489_v47 = vpop.permute.xlu1 %488 }
 0x219   : > { %v1398_v37 = vpop.eup %1397 }
 0x21a   : > { %v392_v42 = vmul.f32 %v1398_v37, %v1392_v22 }
 0x21b   : > { %v491_v49 = vpop.permute.xlu1 %490 }
 0x21d   : > { %v1400_v39 = vpop.eup %1399 }
 0x21e   : > { %v1402_v40 = vpop.eup %1401  ;;  %v394_v41 = vmul.f32 %v1400_v39, %v1394_v24 }
 0x21f   : > { %v393_v43 = vmul.f32 %v1402_v40, %v1396_v25 }
 0x220   : > { %v396_v44 = vpack.c.bf16 %v394_v41, %v394_v41 }
 0x221   : > { %v395_v45 = vpack.c.bf16 %v393_v43, %v392_v42 }
 0x223   : > { %1293 = vmatprep.mubr.msk.bf16.mxu1 %vm360_vm2, %v395_v45 }
 0x224   : > { %1294 = vmatmul.mubr.msk.bf16.vlgmr.msra.gmra.mxu1 %vm360_vm2, %v396_v44 }
 0x225   : > { %1298 = vmatpush3.bf16.xpose.msra.mxu1 %v506_v46  ;;  %1301 = vmatprep.mubr.msk.bf16.mxu1 %vm299_vm0, %v489_v47 }
 0x226   : > { %1348 = vmatprep.subr.msk.bf16.mxu1 %vm299_vm0, %v493_v38 }
 0x22d   : > { %1300 = vmatpush3.bf16.xpose.msra.mxu1 %v503_v48 }
 0x234   : > { %1302 = vmatmul.mubr.msk.bf16.vlgmr.msra.gmra.mxu1 %vm299_vm0, %v491_v49 }
 0x2e4   : > { %v1295_v50 = vpop.f32.mrf.mxu1 }
 0x2e5   : > { %v1239_v52 = vpack.c.bf16 %v1295_v50, %v1295_v50 }
 0x2e6   : > { %v452_v53 = vpop.f32.mrf.mxu1 }
 0x2e7   : > { %v486_v54 = vsel %vm484_vm6, %v1239_v52, %v485_v51  ;;  %v1237_v55 = vpack.c.bf16 %v452_v53, %v452_v53 }
 0x2e8   : > { %487 = vst [vmem:[%s1578_s29 + $0x8] sm:$0x1] %v486_v54  ;;  %v1296_v56 = vpop.f32.mrf.mxu1 }
 0x2e9   : > { %480 = vst.msk [vmem:[%s1578_s29] sm:$0xf] %vm479_vm7, %v1237_v55 }
 0x2ea   : > { %v455_v57 = vpop.f32.mrf.mxu1 }
 0x2eb   : > { %v1238_v58 = vpack.c.bf16 %v455_v57, %v455_v57 }
 0x2ed   : > { %481 = vst.msk [vmem:[%s1578_s29 + $0x4] sm:$0xf] %vm479_vm7, %v1238_v58 }
 0x2f4   : > { %v1303_v59 = vpop.f32.mrf.mxu1 }
 0x2f5   : > { %v562_v2 = vsel %vm367_vm1, %v1303_v59, -inf }
 0x2f6   : > { %v542_v60 = vpop.f32.mrf.mxu1 }
 0x2f7   : > { %v556_v61 = vsel %vm360_vm2, %v542_v60, -inf }
 0x2f8   : > { %557 = vmax.xlane.f32.xlu0 %v556_v61  ;;  %v1304_v62 = vpop.f32.mrf.mxu1 }
 0x2fa   : > { %v545_v63 = vpop.f32.mrf.mxu1 }
 0x2fb   : > { %v559_v4 = vsel %vm360_vm2, %v545_v63, -inf }
 0x2fc   : > { %563 = vmax.xlane.f32.xlu0 %v562_v2  ;;  %560 = vmax.xlane.f32.xlu1 %v559_v4 }
 0x381   : > { %v558_v6 = vpop.xlane.xlu0 %557 }
 0x382   : > { %v565_v7 = vsub.f32 %v542_v60, %v558_v6 }
 0x384   : > { %v568_v8 = vmul.f32 1.442695, %v565_v7 }
 0x385   : > { %v564_v9 = vpop.xlane.xlu0 %563  ;;  %v561_v10 = vpop.xlane.xlu1 %560 }
 0x386   : > { %1403 = vpow2.f32 %v568_v8  ;;  %v567_v11 = vsub.f32 %v1303_v59, %v564_v9  ;;  %v566_v12 = vsub.f32 %v545_v63, %v561_v10 }
 0x388   : > { %v572_v13 = vmul.f32 1.442695, %v567_v11  ;;  %v570_v14 = vmul.f32 1.442695, %v566_v12 }
 0x38a   : > { %1405 = vpow2.f32 %v572_v13 }
 0x38b   : > { %1407 = vpow2.f32 %v570_v14 }
 0x393   : > { %v1404_v15 = vpop.eup %1403 }
 0x394   : > { %v574_v16 = vsel %vm360_vm2, %v1404_v15, 0.0 }
 0x395   : > { %575 = vadd.xlane.f32.xlu0 %v574_v16 }
 0x397   : > { %v1406_v17 = vpop.eup %1405 }
 0x398   : > { %v1408_v18 = vpop.eup %1407  ;;  %v580_v19 = vsel %vm367_vm1, %v1406_v17, 0.0 }
 0x399   : > { %581 = vadd.xlane.f32.xlu1 %v580_v19  ;;  %v577_v20 = vsel %vm360_vm2, %v1408_v18, 0.0 }
 0x39a   : > { %578 = vadd.xlane.f32.xlu0 %v577_v20 }
 0x3aa   : > { %591 = vrot.lane.b32.xlu1 %v1554_v32, %s1464_s26 }
 0x3ae   : > { %686 = vrot.lane.b32.xlu1 %v1514_v0, %s1465_s30 }
 0x3b0   : > { %593 = vrot.lane.b32.xlu0 %v1548_v28, %s1464_s26 }
 0x3b2   : > { %684 = vrot.lane.b32.xlu1 %v1516_v1, %s1465_s30 }
 0x3b4   : > { %680 = vrot.lane.b32.xlu0 %v1526_v3, %s1465_s30 }
 0x3b6   : > { %682 = vrot.lane.b32.xlu1 %v1534_v5, %s1465_s30 }
 0x41e   : > { %v576_v21 = vpop.xlane.xlu0 %575 }
 0x41f   : > { %1409 = vrcp.f32 %v576_v21 }
 0x422   : > { %v582_v22 = vpop.xlane.xlu1 %581 }
 0x423   : > { %v579_v23 = vpop.xlane.xlu0 %578  ;;  %1411 = vrcp.f32 %v582_v22 }
 0x424   : > { %1413 = vrcp.f32 %v579_v23 }
 0x426   : > { %v592_v25 = vpop.permute.xlu1 %591 }
 0x427   : > { %v594_v24 = vpop.permute.xlu0 %593 }
 0x428   : > { %v603_v26 = vand.u32 %v594_v24, %v1550_v30 }
 0x42a   : > { %1305 = vmatprep.subr.bf16.mxu0 %v603_v26  ;;  %v687_v27 = vpop.permute.xlu1 %686 }
 0x42b   : > { %1306 = vmatpush3.bf16.msra.mxu0 %v603_v26  ;;  %v698_v39 = vsel %vm299_vm0, %v687_v27, 0  ;;  %v681_v40 = vpop.permute.xlu0 %680 }
 0x42c   : > { %1307 = vmatprep.subr.bf16.mxu0 %v592_v25  ;;  %v1410_v29 = vpop.eup %1409 }
 0x42d   : > { %v586_v35 = vmul.f32 %v1410_v29, %v1404_v15 }
 0x42e   : > { %v685_v41 = vpop.permute.xlu1 %684 }
 0x42f   : > { %1308 = vmatpush3.bf16.msra.mxu0 %v592_v25  ;;  %v695_v42 = vsel %vm299_vm0, %v685_v41, 0 }
 0x430   : > { %v1412_v31 = vpop.eup %1411  ;;  %1349 = vmatprep.subr.msk.bf16.mxu0 %vm299_vm0, %v687_v27 }
 0x431   : > { %v1414_v33 = vpop.eup %1413  ;;  %v588_v34 = vmul.f32 %v1412_v31, %v1406_v17 }
 0x432   : > { %v587_v36 = vmul.f32 %v1414_v33, %v1408_v18  ;;  %v683_v43 = vpop.permute.xlu1 %682 }
 0x433   : > { %v590_v37 = vpack.c.bf16 %v588_v34, %v588_v34 }
 0x434   : > { %v589_v38 = vpack.c.bf16 %v587_v36, %v586_v35 }
 0x436   : > { %1309 = vmatprep.mubr.msk.bf16.mxu0 %vm360_vm2, %v589_v38 }
 0x437   : > { %1310 = vmatmul.mubr.msk.bf16.vlgmr.msra.gmra.mxu0 %vm360_vm2, %v590_v37 }
 0x438   : > { %1314 = vmatpush3.bf16.xpose.msra.mxu0 %v698_v39  ;;  %1317 = vmatprep.mubr.msk.bf16.mxu0 %vm299_vm0, %v681_v40 }
 0x439   : > { %1350 = vmatprep.subr.msk.bf16.mxu0 %vm299_vm0, %v685_v41 }
 0x440   : > { %1316 = vmatpush3.bf16.xpose.msra.mxu0 %v695_v42 }
 0x447   : > { %1318 = vmatmul.mubr.msk.bf16.vlgmr.msra.gmra.mxu0 %vm299_vm0, %v683_v43 }
 0x4f7   : > { %v1612_v44 = vpop.f32.mrf.mxu0 }
 0x4f9   : > { %v1614_v45 = vpop.f32.mrf.mxu0 }
 0x4fb   : > { %v1312_v46 = vpop.f32.mrf.mxu0 }
 0x4fd   : > { %v1616_v47 = vpop.f32.mrf.mxu0 }
 0x507   : > { %v1319_v48 = vpop.f32.mrf.mxu0 }
 0x508   : > { %v754_v53 = vsel %vm367_vm1, %v1319_v48, -inf }
 0x509   : > { %v734_v49 = vpop.f32.mrf.mxu0 }
 0x50a   : > { %v748_v50 = vsel %vm360_vm2, %v734_v49, -inf }
 0x50b   : > { %749 = vmax.xlane.f32.xlu0 %v748_v50  ;;  %v1320_v51 = vpop.f32.mrf.mxu0 }
 0x50d   : > { %v737_v52 = vpop.f32.mrf.mxu0 }
 0x50e   : > { %v751_v54 = vsel %vm360_vm2, %v737_v52, -inf }
 0x50f   : > { %755 = vmax.xlane.f32.xlu0 %v754_v53  ;;  %752 = vmax.xlane.f32.xlu1 %v751_v54 }
 0x594   : > { %v750_v55 = vpop.xlane.xlu0 %749 }
 0x595   : > { %v757_v56 = vsub.f32 %v734_v49, %v750_v55 }
 0x597   : > { %v760_v57 = vmul.f32 1.442695, %v757_v56 }
 0x598   : > { %v756_v58 = vpop.xlane.xlu0 %755  ;;  %v753_v59 = vpop.xlane.xlu1 %752 }
 0x599   : > { %1415 = vpow2.f32 %v760_v57  ;;  %v759_v60 = vsub.f32 %v1319_v48, %v756_v58  ;;  %v758_v61 = vsub.f32 %v737_v52, %v753_v59  ;;  %v1242_v58 = vpack.c.bf16 %v1612_v44, %v1612_v44 }
 0x59b   : > { %v764_v62 = vmul.f32 1.442695, %v759_v60  ;;  %v762_v63 = vmul.f32 1.442695, %v758_v61  ;;  %v1240_v60 = vpack.c.bf16 %v1614_v45, %v1614_v45  ;;  %v1241_v61 = vpack.c.bf16 %v1616_v47, %v1616_v47 }
 0x59d   : > { %1417 = vpow2.f32 %v764_v62 }
 0x59e   : > { %1419 = vpow2.f32 %v762_v63 }
 0x5a6   : > { %v1416_v2 = vpop.eup %1415 }
 0x5a7   : > { %v766_v4 = vsel %vm360_vm2, %v1416_v2, 0.0 }
 0x5a8   : > { %767 = vadd.xlane.f32.xlu0 %v766_v4  ;;  %v677_v4 = vld [vmem:[%s1578_s29 + $0x8] sm:$0x1] }
 0x5aa   : > { %v1418_v6 = vpop.eup %1417 }
 0x5ab   : > { %v1420_v7 = vpop.eup %1419  ;;  %v772_v8 = vsel %vm367_vm1, %v1418_v6, 0.0 }
 0x5ac   : > { %773 = vadd.xlane.f32.xlu1 %v772_v8  ;;  %v769_v9 = vsel %vm360_vm2, %v1420_v7, 0.0 }
 0x5ad   : > { %770 = vadd.xlane.f32.xlu0 %v769_v9 }
 0x5bd   : > { %783 = vrot.lane.b32.xlu1 %v1554_v32, %s1465_s30 }
 0x5c1   : > { %878 = vrot.lane.b32.xlu1 %v1514_v0, %s1466_s4 }
 0x5c3   : > { %785 = vrot.lane.b32.xlu0 %v1548_v28, %s1465_s30 }
 0x5c5   : > { %876 = vrot.lane.b32.xlu1 %v1516_v1, %s1466_s4 }
 0x5c7   : > { %872 = vrot.lane.b32.xlu0 %v1526_v3, %s1466_s4 }
 0x5c9   : > { %874 = vrot.lane.b32.xlu1 %v1534_v5, %s1466_s4 }
 0x631   : > { %v768_v10 = vpop.xlane.xlu0 %767 }
 0x632   : > { %1421 = vrcp.f32 %v768_v10 }
 0x635   : > { %v774_v11 = vpop.xlane.xlu1 %773 }
 0x636   : > { %v771_v12 = vpop.xlane.xlu0 %770  ;;  %1423 = vrcp.f32 %v774_v11 }
 0x637   : > { %1425 = vrcp.f32 %v771_v12 }
 0x639   : > { %v784_v0 = vpop.permute.xlu1 %783 }
 0x63a   : > { %v786_v13 = vpop.permute.xlu0 %785 }
 0x63b   : > { %v795_v14 = vand.u32 %v786_v13, %v1550_v30 }
 0x63d   : > { %1321 = vmatprep.subr.bf16.mxu1 %v795_v14  ;;  %v879_v1 = vpop.permute.xlu1 %878 }
 0x63e   : > { %1322 = vmatpush3.bf16.msra.mxu1 %v795_v14  ;;  %v890_v21 = vsel %vm299_vm0, %v879_v1, 0  ;;  %v873_v22 = vpop.permute.xlu0 %872 }
 0x63f   : > { %1323 = vmatprep.subr.bf16.mxu1 %v784_v0  ;;  %v1422_v15 = vpop.eup %1421 }
 0x640   : > { %v778_v17 = vmul.f32 %v1422_v15, %v1416_v2 }
 0x641   : > { %v877_v23 = vpop.permute.xlu1 %876 }
 0x642   : > { %1324 = vmatpush3.bf16.msra.mxu1 %v784_v0  ;;  %v887_v24 = vsel %vm299_vm0, %v877_v23, 0 }
 0x643   : > { %v1424_v3 = vpop.eup %1423  ;;  %1351 = vmatprep.subr.msk.bf16.mxu1 %vm299_vm0, %v879_v1 }
 0x644   : > { %v1426_v5 = vpop.eup %1425  ;;  %v780_v16 = vmul.f32 %v1424_v3, %v1418_v6 }
 0x645   : > { %v779_v18 = vmul.f32 %v1426_v5, %v1420_v7  ;;  %v875_v25 = vpop.permute.xlu1 %874 }
 0x646   : > { %v782_v19 = vpack.c.bf16 %v780_v16, %v780_v16 }
 0x647   : > { %v781_v20 = vpack.c.bf16 %v779_v18, %v778_v17 }
 0x649   : > { %1325 = vmatprep.mubr.msk.bf16.mxu1 %vm360_vm2, %v781_v20 }
 0x64a   : > { %1326 = vmatmul.mubr.msk.bf16.vlgmr.msra.gmra.mxu1 %vm360_vm2, %v782_v19 }
 0x64b   : > { %1330 = vmatpush3.bf16.xpose.msra.mxu1 %v890_v21  ;;  %1333 = vmatprep.mubr.msk.bf16.mxu1 %vm299_vm0, %v873_v22 }
 0x64c   : > { %1352 = vmatprep.subr.msk.bf16.mxu1 %vm299_vm0, %v877_v23 }
 0x653   : > { %1332 = vmatpush3.bf16.xpose.msra.mxu1 %v887_v24 }
 0x65a   : > { %1334 = vmatmul.mubr.msk.bf16.vlgmr.msra.gmra.mxu1 %vm299_vm0, %v875_v25  ;;  %vm1056_vm0 = vcmask 257216  }
 0x70a   : > { %v1327_v26 = vpop.f32.mrf.mxu1 }
 0x70b   : > { %v1245_v59 = vpack.c.bf16 %v1327_v26, %v1327_v26 }
 0x70c   : > { %v831_v27 = vpop.f32.mrf.mxu1 }
 0x70d   : > { %v1243_v62 = vpack.c.bf16 %v831_v27, %v831_v27 }
 0x70e   : > { %v1328_v29 = vpop.f32.mrf.mxu1 }
 0x710   : > { %v834_v31 = vpop.f32.mrf.mxu1 }
 0x71a   : > { %v1335_v33 = vpop.f32.mrf.mxu1 }
 0x71b   : > { %v946_v38 = vsel %vm367_vm1, %v1335_v33, -inf }
 0x71c   : > { %v926_v34 = vpop.f32.mrf.mxu1 }
 0x71d   : > { %v940_v35 = vsel %vm360_vm2, %v926_v34, -inf }
 0x71e   : > { %941 = vmax.xlane.f32.xlu0 %v940_v35  ;;  %v1336_v36 = vpop.f32.mrf.mxu1 }
 0x720   : > { %v929_v37 = vpop.f32.mrf.mxu1 }
 0x721   : > { %v943_v39 = vsel %vm360_vm2, %v929_v37, -inf }
 0x722   : > { %947 = vmax.xlane.f32.xlu0 %v946_v38  ;;  %944 = vmax.xlane.f32.xlu1 %v943_v39 }
 0x7a7   : > { %v942_v40 = vpop.xlane.xlu0 %941 }
 0x7a8   : > { %v949_v41 = vsub.f32 %v926_v34, %v942_v40 }
 0x7aa   : > { %v952_v42 = vmul.f32 1.442695, %v949_v41 }
 0x7ab   : > { %v948_v43 = vpop.xlane.xlu0 %947  ;;  %v945_v46 = vpop.xlane.xlu1 %944 }
 0x7ac   : > { %1427 = vpow2.f32 %v952_v42  ;;  %v951_v48 = vsub.f32 %v1335_v33, %v948_v43  ;;  %v950_v49 = vsub.f32 %v929_v37, %v945_v46 }
 0x7ae   : > { %v956_v50 = vmul.f32 1.442695, %v951_v48  ;;  %v954_v51 = vmul.f32 1.442695, %v950_v49 }
 0x7b0   : > { %1429 = vpow2.f32 %v956_v50 }
 0x7b1   : > { %1431 = vpow2.f32 %v954_v51 }
 0x7b9   : > { %v1428_v52 = vpop.eup %1427 }
 0x7ba   : > { %v958_v53 = vsel %vm360_vm2, %v1428_v52, 0.0 }
 0x7bb   : > { %959 = vadd.xlane.f32.xlu0 %v958_v53 }
 0x7bd   : > { %v1430_v54 = vpop.eup %1429 }
 0x7be   : > { %v1432_v55 = vpop.eup %1431  ;;  %v964_v56 = vsel %vm367_vm1, %v1430_v54, 0.0 }
 0x7bf   : > { %965 = vadd.xlane.f32.xlu1 %v964_v56  ;;  %v961_v57 = vsel %vm360_vm2, %v1432_v55, 0.0 }
 0x7c0   : > { %962 = vadd.xlane.f32.xlu0 %v961_v57 }
 0x7d0   : > { %975 = vrot.lane.b32.xlu1 %v1554_v32, %s1466_s4  ;;  %v1244_v32 = vpack.c.bf16 %v834_v31, %v834_v31 }
 0x7d4   : > { %667 = vrot.lane.b32.xlu1 %v1242_v58, %s1467_s5 }
 0x7d6   : > { %977 = vrot.lane.b32.xlu0 %v1548_v28, %s1466_s4 }
 0x7d8   : > { %859 = vrot.lane.b32.xlu1 %v1245_v59, %s1468_s6 }
 0x7da   : > { %663 = vrot.lane.b32.xlu0 %v1240_v60, %s1467_s5 }
 0x7dc   : > { %665 = vrot.lane.b32.xlu1 %v1241_v61, %s1467_s5 }
 0x7de   : > { %855 = vrot.lane.b32.xlu0 %v1243_v62, %s1468_s6 }
 0x7e0   : > { %857 = vrot.lane.b32.xlu1 %v1244_v32, %s1468_s6 }
 0x844   : > { %v960_v44 = vpop.xlane.xlu0 %959 }
 0x845   : > { %1433 = vrcp.f32 %v960_v44 }
 0x848   : > { %v966_v63 = vpop.xlane.xlu1 %965 }
 0x849   : > { %v963_v28 = vpop.xlane.xlu0 %962  ;;  %1435 = vrcp.f32 %v966_v63 }
 0x84a   : > { %1437 = vrcp.f32 %v963_v28 }
 0x84c   : > { %v976_v45 = vpop.permute.xlu1 %975 }
 0x84d   : > { %v978_v2 = vpop.permute.xlu0 %977 }
 0x84e   : > { %v987_v47 = vand.u32 %v978_v2, %v1550_v30 }
 0x850   : > { %v668_v6 = vpop.permute.xlu1 %667  ;;  %1337 = vmatprep.subr.bf16.mxu0 %v987_v47 }
 0x851   : > { %v664_v7 = vpop.permute.xlu0 %663  ;;  %v678_v8 = vsel %vm676_vm9, %v668_v6, %v677_v4  ;;  %1338 = vmatpush3.bf16.msra.mxu0 %v987_v47 }
 0x852   : > { %673 = vst.msk [vmem:[%s1578_s29] sm:$0xf] %vm672_vm10, %v664_v7  ;;  %679 = vst [vmem:[%s1578_s29 + $0x8] sm:$0x1] %v678_v8  ;;  %1339 = vmatprep.subr.bf16.mxu0 %v976_v45  ;;  %v1434_v30 = vpop.eup %1433 }
 0x853   : > { %v970_v14 = vmul.f32 %v1434_v30, %v1428_v52 }
 0x854   : > { %v860_v9 = vpop.permute.xlu1 %859 }
 0x855   : > { %v856_v10 = vpop.permute.xlu0 %855  ;;  %1340 = vmatpush3.bf16.msra.mxu0 %v976_v45 }
 0x856   : > { %v1436_v11 = vpop.eup %1435  ;;  %865 = vst.msk [vmem:[%s1578_s29] sm:$0xf] %vm864_vm11, %v856_v10 }
 0x857   : > { %v1438_v12 = vpop.eup %1437  ;;  %v972_v13 = vmul.f32 %v1436_v11, %v1430_v54 }
 0x858   : > { %v666_v0 = vpop.permute.xlu1 %665  ;;  %v971_v1 = vmul.f32 %v1438_v12, %v1432_v55 }
 0x859   : > { %v869_v15 = vld [vmem:[%s1578_s29 + $0x8] sm:$0x1]  ;;  %674 = vst.msk [vmem:[%s1578_s29 + $0x4] sm:$0xf] %vm672_vm10, %v666_v0  ;;  %v974_v3 = vpack.c.bf16 %v972_v13, %v972_v13 }
 0x85a   : > { %v870_v5 = vsel %vm868_vm13, %v860_v9, %v869_v15  ;;  %v973_v16 = vpack.c.bf16 %v971_v1, %v970_v14 }
 0x85b   : > { %871 = vst [vmem:[%s1578_s29 + $0x8] sm:$0x1] %v870_v5 }
 0x85c   : > { %1341 = vmatprep.mubr.msk.bf16.mxu0 %vm360_vm2, %v973_v16  ;;  %v858_v17 = vpop.permute.xlu1 %857 }
 0x85d   : > { %1342 = vmatmul.mubr.msk.bf16.vlgmr.msra.gmra.mxu0 %vm360_vm2, %v974_v3  ;;  %866 = vst.msk [vmem:[%s1578_s29 + $0x4] sm:$0xf] %vm864_vm11, %v858_v17 }
 0x862   : > { %v1061_v26 = vld [vmem:[%s1578_s29 + $0x8] sm:$0x1] }
 0x91d   : > { %v1343_v18 = vpop.f32.mrf.mxu0 }
 0x91e   : > { %v1248_v19 = vpack.c.bf16 %v1343_v18, %v1343_v18 }
 0x91f   : > { %v1023_v20 = vpop.f32.mrf.mxu0 }
 0x920   : > { %v1246_v21 = vpack.c.bf16 %v1023_v20, %v1023_v20  ;;  %1051 = vrot.lane.b32.xlu0 %v1248_v19, %s1469_s7 }
 0x921   : > { %v1344_v22 = vpop.f32.mrf.mxu0 }
 0x922   : > { %1047 = vrot.lane.b32.xlu1 %v1246_v21, %s1469_s7 }
 0x923   : > { %v1026_v23 = vpop.f32.mrf.mxu0 }
 0x924   : > { %v1247_v24 = vpack.c.bf16 %v1026_v23, %v1026_v23 }
 0x926   : > { %1049 = vrot.lane.b32.xlu0 %v1247_v24, %s1469_s7 }
 0x992   : > { %v1052_v25 = vpop.permute.xlu0 %1051 }
 0x993   : > { %v1062_v27 = vsel %vm1060_vm15, %v1052_v25, %v1061_v26 }
 0x994   : > { %1063 = vst [vmem:[%s1578_s29 + $0x8] sm:$0x1] %v1062_v27  ;;  %v1048_v29 = vpop.permute.xlu1 %1047 }
 0x995   : > { %1057 = vst.msk [vmem:[%s1578_s29] sm:$0xf] %vm1056_vm0, %v1048_v29 }
 0x998   : > { %v1050_v31 = vpop.permute.xlu0 %1049 }
 0x999   : > { %1058 = vst.msk [vmem:[%s1578_s29 + $0x4] sm:$0xf] %vm1056_vm0, %v1050_v31 }
 0x99a PF: > { %s13_s14 = sadd.s32 1, %s1461_s14   ;;  %s1696_s12 = smov %s1457_s13 }
 0x99b   : > { %p10_p5 = scmp.ge.s32.totalorder %s13_s14, 4   ;;  %s1697_s13 = smov %s1699_s15 }
 0x99d   :  { %12 = sbr.rel (!%p10_p5) target bundleno = 2 (0x2), region = 68 }

// kernel: t2t_vit_forward.19
= control target key start
LH: loop header
LB: loop body
LE: loop exit
PB: predicated region body
PF: predicated region fallthrough
CT: control target
= control target key end

     0   :  { %vm39_vm0 = vcmask 261120   ;;  %vm52_vm1 = vcmask 254976   ;;  %v686_v38 = vmov 0.0   ;;  %vm687_vm2 = vmmov 0   ;;  %s981_s0 = inlined_call_operand.vmem [shape: bf16[34,32], index: 0, kind: input, shape index: {}]   ;;  %s982_s3 = inlined_call_operand.vmem [shape: bf16[32,128], index: 3, kind: input, shape index: {}]   ;;  %s983_s1 = inlined_call_operand.vmem [shape: f32[1,32], index: 1, kind: input, shape index: {}]   ;;  %s984_s2 = inlined_call_operand.vmem [shape: f32[1,32], index: 2, kind: input, shape index: {}]   ;;  %s985_s5 = inlined_call_operand.vmem [shape: bf16[128,32], index: 5, kind: input, shape index: {}]   ;;  %s986_s4 = inlined_call_operand.vmem [shape: f32[1,128], index: 4, kind: input, shape index: {}]   ;;  %s987_s6 = inlined_call_operand.vmem [shape: f32[1,32], index: 6, kind: input, shape index: {}]   ;;  %s988_s7 = inlined_call_operand.vmem [shape: bf16[34,32], index: 7, kind: output, shape index: {}]  }
   0x1   :  { %v570_v0 = vld [vmem:[%s981_s0] sm:$0xff]   ;;  %v577_v1 = vld [vmem:[%s981_s0 + $0x8] sm:$0xff]   ;;  %v31_v6 = vld [vmem:[%s981_s0 + $0x10] sm:$0x1]  ;;  %594 = vmatprep.subr.bf16.mxu0 %v686_v38  ;;  %598 = vmatprep.mubr.msk.bf16.mxu0 %vm687_vm2, %v686_v38  ;;  %vm526_vm3 = vcmask 257024   ;;  %vm531_vm4 = vcmask 253952  }
   0x2   :  { %v734_v2 = vunpack.c.l.bf16 %v570_v0  ;;  %v736_v3 = vunpack.c.l.bf16 %v577_v1  ;;  %v738_v4 = vunpack.c.h.bf16 %v570_v0  ;;  %v740_v5 = vunpack.c.h.bf16 %v577_v1  ;;  %v656_v39 = vld [vmem:[%s982_s3 + $0x8] sm:$0xff]   ;;  %638 = vmatprep.subr.bf16.mxu1 %v686_v38  ;;  %630 = vmatprep.mubr.msk.bf16.mxu1 %vm687_vm2, %v686_v38  ;;  %v657_v40 = vld [vmem:[%s982_s3] sm:$0xff]  }
   0x3   :  { %v753_v11 = vunpack.c.l.bf16 %v31_v6  ;;  %595 = vmatpush3.bf16.msra.mxu0 %v656_v39  ;;  %v537_v58 = vld [vmem:[%s983_s1] ss:$0 sm:$0xff] }
   0x4   :  { %v40_v7 = vsel %vm39_vm0, %v734_v2, 0.0  ;;  %v46_v8 = vsel %vm39_vm0, %v736_v3, 0.0  ;;  %v43_v9 = vsel %vm39_vm0, %v738_v4, 0.0  ;;  %v49_v10 = vsel %vm39_vm0, %v740_v5, 0.0  ;;  %596 = vmatprep.subr.bf16.mxu0 %v686_v38  ;;  %v538_v63 = vld [vmem:[%s984_s2] ss:$0 sm:$0xff] }
   0x5   :  { %41 = vadd.xlane.f32.xlu0 %v40_v7  ;;  %47 = vadd.xlane.f32.xlu1 %v46_v8  ;;  %v53_v12 = vsel %vm52_vm1, %v753_v11, 0.0 }
   0x7   :  { %597 = vmatpush3.bf16.msra.mxu0 %v657_v40 }
   0x8   :  { %610 = vmatprep.subr.bf16.mxu0 %v686_v38 }
   0x9   :  { %44 = vadd.xlane.f32.xlu0 %v43_v9  ;;  %50 = vadd.xlane.f32.xlu1 %v49_v10 }
   0xd   :  { %54 = vadd.xlane.f32.xlu0 %v53_v12 }
  0x8e   :  { %v42_v13 = vpop.xlane.xlu0 %41  ;;  %v48_v14 = vpop.xlane.xlu1 %47 }
  0x8f   :  { %v57_v15 = vmul.f32 0.03125, %v42_v13  ;;  %v59_v16 = vmul.f32 0.03125, %v48_v14 }
  0x91   :  { %v62_v17 = vsub.f32 %v734_v2, %v57_v15  ;;  %v759_v18 = vsub.f32 %v736_v3, %v59_v16 }
  0x92   :  { %v45_v19 = vpop.xlane.xlu0 %44  ;;  %v51_v20 = vpop.xlane.xlu1 %50 }
  0x93   :  { %v58_v21 = vmul.f32 0.03125, %v45_v19  ;;  %v60_v22 = vmul.f32 0.03125, %v51_v20  ;;  %v67_v23 = vmul.f32 %v62_v17, %v62_v17  ;;  %v69_v24 = vmul.f32 %v759_v18, %v759_v18 }
  0x95   :  { %v63_v25 = vsub.f32 %v738_v4, %v58_v21  ;;  %v765_v26 = vsub.f32 %v740_v5, %v60_v22  ;;  %v72_v27 = vsel %vm39_vm0, %v67_v23, 0.0  ;;  %v78_v30 = vsel %vm39_vm0, %v69_v24, 0.0  ;;  %v658_v22 = vld [vmem:[%s985_s5 + $0x38] sm:$0xff]   ;;  %v659_v23 = vld [vmem:[%s985_s5 + $0x30] sm:$0xff]   ;;  %v660_v24 = vld [vmem:[%s985_s5 + $0x28] sm:$0xff]  }
  0x96   :  { %73 = vadd.xlane.f32.xlu1 %v72_v27  ;;  %v55_v28 = vpop.xlane.xlu0 %54  ;;  %646 = vmatpush3.bf16.msra.mxu1 %v658_v22  ;;  %v663_v27 = vld [vmem:[%s985_s5 + $0x10] sm:$0xff]  }
  0x97   :  { %v61_v29 = vmul.f32 0.03125, %v55_v28  ;;  %v68_v31 = vmul.f32 %v63_v25, %v63_v25  ;;  %v70_v32 = vmul.f32 %v765_v26, %v765_v26  ;;  %639 = vmatprep.subr.bf16.mxu1 %v686_v38  ;;  %v664_v28 = vld [vmem:[%s985_s5 + $0x8] sm:$0xff]  }
  0x99   :  { %v772_v33 = vsub.f32 %v753_v11, %v61_v29  ;;  %v75_v34 = vsel %vm39_vm0, %v68_v31, 0.0  ;;  %v81_v35 = vsel %vm39_vm0, %v70_v32, 0.0  ;;  %v665_v29 = vld [vmem:[%s985_s5] sm:$0xff]  }
  0x9a   :  { %79 = vadd.xlane.f32.xlu1 %v78_v30  ;;  %76 = vadd.xlane.f32.xlu0 %v75_v34  ;;  %v852_v30 = vld [vmem:[%s986_s4] ss:$0 sm:$0xff] }
  0x9b   :  { %v71_v36 = vmul.f32 %v772_v33, %v772_v33  ;;  %647 = vmatpush3.bf16.msra.mxu1 %v659_v23 }
  0x9c   :  { %640 = vmatprep.subr.bf16.mxu1 %v686_v38 }
  0x9d   :  { %v84_v37 = vsel %vm52_vm1, %v71_v36, 0.0 }
  0x9e   :  { %82 = vadd.xlane.f32.xlu0 %v81_v35  ;;  %85 = vadd.xlane.f32.xlu1 %v84_v37 }
  0x9f   :  { %648 = vmatpush3.bf16.msra.mxu1 %v660_v24 }
  0xa0   :  { %641 = vmatprep.subr.bf16.mxu1 %v686_v38 }
 0x11f   :  { %v74_v41 = vpop.xlane.xlu1 %73 }
 0x120   :  { %v87_v42 = vmul.f32 0.03125, %v74_v41 }
 0x122   :  { %v92_v43 = vadd.f32 1e-05, %v87_v42 }
 0x123   :  { %v80_v44 = vpop.xlane.xlu1 %79  ;;  %v77_v45 = vpop.xlane.xlu0 %76 }
 0x124   :  { %666 = vrsqrt.f32 %v92_v43  ;;  %v89_v46 = vmul.f32 0.03125, %v80_v44  ;;  %v88_v47 = vmul.f32 0.03125, %v77_v45 }
 0x126   :  { %v93_v48 = vadd.f32 1e-05, %v88_v47  ;;  %v94_v49 = vadd.f32 1e-05, %v89_v46 }
 0x127   :  { %v86_v50 = vpop.xlane.xlu1 %85  ;;  %v83_v51 = vpop.xlane.xlu0 %82 }
 0x128   :  { %v90_v52 = vmul.f32 0.03125, %v83_v51  ;;  %668 = vrsqrt.f32 %v93_v48  ;;  %v91_v53 = vmul.f32 0.03125, %v86_v50 }
 0x129   :  { %670 = vrsqrt.f32 %v94_v49 }
 0x12a   :  { %v95_v54 = vadd.f32 1e-05, %v90_v52  ;;  %v96_v55 = vadd.f32 1e-05, %v91_v53 }
 0x12c   :  { %672 = vrsqrt.f32 %v95_v54 }
 0x12d   :  { %674 = vrsqrt.f32 %v96_v55 }
 0x131   :  { %v667_v56 = vpop.eup %666 }
 0x132   :  { %v102_v57 = vmul.f32 %v667_v56, %v62_v17 }
 0x134   :  { %v113_v61 = vmul.f32 %v537_v58, %v102_v57 }
 0x135   :  { %v669_v59 = vpop.eup %668 }
 0x136   :  { %v103_v60 = vmul.f32 %v669_v59, %v63_v25  ;;  %v671_v62 = vpop.eup %670  ;;  %v124_v6 = vadd.f32 %v538_v63, %v113_v61  ;;  %v661_v25 = vld [vmem:[%s985_s5 + $0x20] sm:$0xff]  }
 0x137   :  { %v104_v8 = vmul.f32 %v671_v62, %v759_v18  ;;  %649 = vmatpush3.bf16.msra.mxu1 %v661_v25 }
 0x138   :  { %v114_v0 = vmul.f32 %v537_v58, %v103_v60  ;;  %642 = vmatprep.subr.bf16.mxu1 %v686_v38 }
 0x139   :  { %v673_v1 = vpop.eup %672  ;;  %v115_v14 = vmul.f32 %v537_v58, %v104_v8 }
 0x13a   :  { %v125_v7 = vadd.f32 %v538_v63, %v114_v0  ;;  %v105_v9 = vmul.f32 %v673_v1, %v765_v26  ;;  %v675_v13 = vpop.eup %674  ;;  %v662_v26 = vld [vmem:[%s985_s5 + $0x18] sm:$0xff]  }
 0x13b   :  { %v106_v16 = vmul.f32 %v675_v13, %v772_v33  ;;  %v126_v17 = vadd.f32 %v538_v63, %v115_v14  ;;  %650 = vmatpush3.bf16.msra.mxu1 %v662_v26 }
 0x13c   :  { %v129_v10 = vpack.c.bf16 %v125_v7, %v124_v6  ;;  %v116_v12 = vmul.f32 %v537_v58, %v105_v9  ;;  %643 = vmatprep.subr.bf16.mxu1 %v686_v38 }
 0x13d   :  { %v117_v20 = vmul.f32 %v537_v58, %v106_v16 }
 0x13e   :  { %599 = vmatmul.mubr.msk.bf16.vlgmr.msra.gmra.mxu0 %vm39_vm0, %v129_v10  ;;  %v127_v15 = vadd.f32 %v538_v63, %v116_v12 }
 0x13f   :  { %602 = vmatprep.mubr.msk.bf16.mxu0 %vm687_vm2, %v686_v38  ;;  %v128_v18 = vadd.f32 %v538_v63, %v117_v20  ;;  %611 = vmatpush3.bf16.msra.mxu0 %v658_v22 }
 0x140   :  { %v130_v19 = vpack.c.bf16 %v127_v15, %v126_v17  ;;  %612 = vmatprep.subr.bf16.mxu0 %v686_v38  ;;  %651 = vmatpush3.bf16.msra.mxu1 %v663_v27 }
 0x141   :  { %v131_v21 = vpack.c.bf16 %v128_v18, %v128_v18  ;;  %644 = vmatprep.subr.bf16.mxu1 %v686_v38 }
 0x143   :  { %613 = vmatpush3.bf16.msra.mxu0 %v659_v23 }
 0x144   :  { %614 = vmatprep.subr.bf16.mxu0 %v686_v38  ;;  %652 = vmatpush3.bf16.msra.mxu1 %v664_v28 }
 0x145   :  { %645 = vmatprep.subr.bf16.mxu1 %v686_v38 }
 0x146   :  { %603 = vmatmul.mubr.msk.bf16.gmra.mxu0 %vm39_vm0, %v130_v19 }
 0x147   :  { %606 = vmatprep.mubr.msk.bf16.mxu0 %vm687_vm2, %v686_v38  ;;  %615 = vmatpush3.bf16.msra.mxu0 %v660_v24 }
 0x148   :  { %616 = vmatprep.subr.bf16.mxu0 %v686_v38  ;;  %653 = vmatpush3.bf16.msra.mxu1 %v665_v29 }
 0x14b   :  { %617 = vmatpush3.bf16.msra.mxu0 %v661_v25 }
 0x14c   :  { %618 = vmatprep.subr.bf16.mxu0 %v686_v38 }
 0x14e   :  { %607 = vmatmul.mubr.msk.bf16.gmra.mxu0 %vm39_vm0, %v131_v21 }
 0x14f   :  { %626 = vmatprep.mubr.msk.bf16.mxu0 %vm687_vm2, %v686_v38  ;;  %619 = vmatpush3.bf16.msra.mxu0 %v662_v26 }
 0x150   :  { %620 = vmatprep.subr.bf16.mxu0 %v686_v38 }
 0x153   :  { %621 = vmatpush3.bf16.msra.mxu0 %v663_v27 }
 0x154   :  { %622 = vmatprep.subr.bf16.mxu0 %v686_v38 }
 0x157   :  { %623 = vmatpush3.bf16.msra.mxu0 %v664_v28 }
 0x158   :  { %624 = vmatprep.subr.bf16.mxu0 %v686_v38 }
 0x15b   :  { %625 = vmatpush3.bf16.msra.mxu0 %v665_v29 }
 0x1fe   :  { %v198_v31 = vpop.f32.mrf.mxu0 }
 0x1ff   :  { %v855_v32 = vadd.f32 %v852_v30, %v198_v31 }
 0x200   :  { %v600_v33 = vpop.f32.mrf.mxu0 }
 0x201   :  { %v225_v34 = vmul.f32 0.70710677, %v855_v32 }
 0x202   :  { %v201_v35 = vpop.f32.mrf.mxu0 }
 0x203   :  { %v858_v36 = vclamps-f32 %v225_v34, 4.0  ;;  %v861_v37 = vadd.f32 %v852_v30, %v201_v35 }
 0x204   :  { %v601_v39 = vpop.f32.mrf.mxu0 }
 0x205   :  { %v865_v40 = vmul.f32 %v858_v36, %v858_v36  ;;  %v226_v41 = vmul.f32 0.70710677, %v861_v37 }
 0x206   :  { %v206_v42 = vpop.f32.mrf.mxu0 }
 0x207   :  { %v245_v43 = vmul.f32 -2.7261424e-10, %v865_v40  ;;  %v305_v44 = vmul.f32 -1.45660715e-05, %v865_v40  ;;  %v870_v45 = vclamps-f32 %v226_v41, 4.0  ;;  %v873_v46 = vadd.f32 %v852_v30, %v206_v42 }
 0x208   :  { %v604_v47 = vpop.f32.mrf.mxu0 }
 0x209   :  { %v250_v48 = vadd.f32 2.7706815e-08, %v245_v43  ;;  %v310_v49 = vadd.f32 -0.00021337405, %v305_v44  ;;  %v877_v50 = vmul.f32 %v870_v45, %v870_v45  ;;  %v227_v51 = vmul.f32 0.70710677, %v873_v46 }
 0x20a   :  { %v209_v52 = vpop.f32.mrf.mxu0 }
 0x20b   :  { %v255_v53 = vmul.f32 %v250_v48, %v865_v40  ;;  %v315_v54 = vmul.f32 %v310_v49, %v865_v40  ;;  %v246_v55 = vmul.f32 -2.7261424e-10, %v877_v50  ;;  %v306_v56 = vmul.f32 -1.45660715e-05, %v877_v50 }
 0x20c   :  { %v884_v57 = vclamps-f32 %v227_v51, 4.0  ;;  %v887_v58 = vadd.f32 %v852_v30, %v209_v52  ;;  %v605_v59 = vpop.f32.mrf.mxu0 }
 0x20d   :  { %v260_v60 = vadd.f32 -2.101024e-06, %v255_v53  ;;  %v320_v61 = vadd.f32 -0.001682827, %v315_v54  ;;  %v251_v62 = vadd.f32 2.7706815e-08, %v246_v55 }
 0x20e   :  { %v311_v63 = vadd.f32 -0.00021337405, %v306_v56  ;;  %v891_v0 = vmul.f32 %v884_v57, %v884_v57  ;;  %v228_v1 = vmul.f32 0.70710677, %v887_v58  ;;  %v214_v6 = vpop.f32.mrf.mxu0 }
 0x20f   :  { %v265_v7 = vmul.f32 %v260_v60, %v865_v40  ;;  %v325_v8 = vmul.f32 %v320_v61, %v865_v40  ;;  %v256_v9 = vmul.f32 %v251_v62, %v877_v50  ;;  %v914_v41 = vadd.f32 %v852_v30, %v214_v6 }
 0x210   :  { %v316_v10 = vmul.f32 %v311_v63, %v877_v50  ;;  %v247_v12 = vmul.f32 -2.7261424e-10, %v891_v0  ;;  %v307_v13 = vmul.f32 -1.45660715e-05, %v891_v0  ;;  %v900_v14 = vclamps-f32 %v228_v1, 4.0  ;;  %v608_v15 = vpop.f32.mrf.mxu0 }
 0x211   :  { %v270_v16 = vadd.f32 -5.6925062e-05, %v265_v7  ;;  %v330_v17 = vadd.f32 -0.0073733293, %v325_v8  ;;  %v261_v19 = vadd.f32 -2.101024e-06, %v256_v9 }
 0x212   :  { %v321_v20 = vadd.f32 -0.001682827, %v316_v10  ;;  %v252_v18 = vadd.f32 2.7706815e-08, %v247_v12  ;;  %v312_v21 = vadd.f32 -0.00021337405, %v307_v13  ;;  %v904_v22 = vmul.f32 %v900_v14, %v900_v14  ;;  %v217_v23 = vpop.f32.mrf.mxu0 }
 0x213   :  { %v275_v24 = vmul.f32 %v270_v16, %v865_v40  ;;  %v335_v25 = vmul.f32 %v330_v17, %v865_v40  ;;  %v266_v26 = vmul.f32 %v261_v19, %v877_v50  ;;  %v229_v59 = vmul.f32 0.70710677, %v914_v41 }
 0x214   :  { %v326_v27 = vmul.f32 %v321_v20, %v877_v50  ;;  %v257_v28 = vmul.f32 %v252_v18, %v891_v0  ;;  %v317_v29 = vmul.f32 %v312_v21, %v891_v0  ;;  %v248_v31 = vmul.f32 -2.7261424e-10, %v904_v22  ;;  %v609_v33 = vpop.f32.mrf.mxu0 }
 0x215   :  { %v280_v34 = vadd.f32 -0.00073499064, %v275_v24  ;;  %v340_v35 = vadd.f32 -0.014264739, %v335_v25  ;;  %v271_v39 = vadd.f32 -5.6925062e-05, %v266_v26 }
 0x216   :  { %v331_v42 = vadd.f32 -0.0073733293, %v326_v27  ;;  %v262_v43 = vadd.f32 -2.101024e-06, %v257_v28  ;;  %v322_v44 = vadd.f32 -0.001682827, %v317_v29 }
 0x217   :  { %v285_v47 = vmul.f32 %v280_v34, %v865_v40  ;;  %676 = vrcp.f32 %v340_v35  ;;  %v276_v48 = vmul.f32 %v271_v39, %v877_v50  ;;  %v253_v49 = vadd.f32 2.7706815e-08, %v248_v31 }
 0x218   :  { %v336_v51 = vmul.f32 %v331_v42, %v877_v50  ;;  %v267_v52 = vmul.f32 %v262_v43, %v891_v0  ;;  %v327_v53 = vmul.f32 %v322_v44, %v891_v0  ;;  %v308_v54 = vmul.f32 -1.45660715e-05, %v904_v22 }
 0x219   :  { %v290_v55 = vadd.f32 -0.0029546, %v285_v47  ;;  %v281_v30 = vadd.f32 -0.00073499064, %v276_v48  ;;  %v258_v56 = vmul.f32 %v253_v49, %v904_v22  ;;  %v928_v10 = vclamps-f32 %v229_v59, 4.0 }
 0x21a   :  { %v341_v60 = vadd.f32 -0.014264739, %v336_v51  ;;  %v272_v61 = vadd.f32 -5.6925062e-05, %v267_v52  ;;  %v332_v62 = vadd.f32 -0.0073733293, %v327_v53 }
 0x21b   :  { %v295_v63 = vmul.f32 %v290_v55, %v865_v40  ;;  %v286_v1 = vmul.f32 %v281_v30, %v877_v50  ;;  %v263_v6 = vadd.f32 -2.101024e-06, %v258_v56  ;;  %v313_v7 = vadd.f32 -0.00021337405, %v308_v54 }
 0x21c   :  { %678 = vrcp.f32 %v341_v60  ;;  %v277_v8 = vmul.f32 %v272_v61, %v891_v0  ;;  %v337_v9 = vmul.f32 %v332_v62, %v891_v0  ;;  %v244_v40 = vmul.f32 %v928_v10, %v928_v10 }
 0x21d   :  { %v291_v12 = vadd.f32 -0.0029546, %v286_v1  ;;  %v268_v13 = vmul.f32 %v263_v6, %v904_v22  ;;  %v318_v15 = vmul.f32 %v313_v7, %v904_v22  ;;  %v300_v18 = vadd.f32 -0.016096033, %v295_v63 }
 0x21e   :  { %v282_v16 = vadd.f32 -0.00073499064, %v277_v8  ;;  %v342_v17 = vadd.f32 -0.014264739, %v337_v9  ;;  %v249_v23 = vmul.f32 -2.7261424e-10, %v244_v40 }
 0x21f   :  { %v273_v19 = vadd.f32 -5.6925062e-05, %v268_v13  ;;  %v323_v20 = vadd.f32 -0.001682827, %v318_v15  ;;  %v296_v21 = vmul.f32 %v291_v12, %v877_v50  ;;  %v309_v24 = vmul.f32 -1.45660715e-05, %v244_v40 }
 0x220   :  { %v287_v25 = vmul.f32 %v282_v16, %v891_v0  ;;  %v254_v28 = vadd.f32 2.7706815e-08, %v249_v23  ;;  %680 = vrcp.f32 %v342_v17  ;;  %v345_v35 = vmul.f32 %v858_v36, %v300_v18 }
 0x221   :  { %v278_v26 = vmul.f32 %v273_v19, %v904_v22  ;;  %v328_v27 = vmul.f32 %v323_v20, %v904_v22  ;;  %v314_v29 = vadd.f32 -0.00021337405, %v309_v24  ;;  %v301_v39 = vadd.f32 -0.016096033, %v296_v21 }
 0x222   :  { %v259_v42 = vmul.f32 %v254_v28, %v244_v40  ;;  %v292_v50 = vadd.f32 -0.0029546, %v287_v25  ;;  %v220_v63 = vmul.f32 0.5, %v855_v32  ;;  %v221_v1 = vmul.f32 0.5, %v861_v37 }
 0x223   :  { %v283_v31 = vadd.f32 -0.00073499064, %v278_v26  ;;  %v333_v33 = vadd.f32 -0.0073733293, %v328_v27  ;;  %v319_v43 = vmul.f32 %v314_v29, %v244_v40  ;;  %v346_v53 = vmul.f32 %v870_v45, %v301_v39 }
 0x224   :  { %v677_v34 = vpop.eup %676  ;;  %v264_v49 = vadd.f32 -2.101024e-06, %v259_v42  ;;  %v297_v56 = vmul.f32 %v292_v50, %v891_v0  ;;  %v222_v27 = vmul.f32 0.5, %v873_v46  ;;  %v223_v28 = vmul.f32 0.5, %v887_v58  ;;  %v550_v46 = vld [vmem:[%s987_s6] ss:$0 sm:$0xff] }
 0x225   :  { %v288_v44 = vmul.f32 %v283_v31, %v904_v22  ;;  %v338_v47 = vmul.f32 %v333_v33, %v904_v22  ;;  %v351_v48 = vmul.f32 %v677_v34, %v345_v35  ;;  %v324_v51 = vadd.f32 -0.001682827, %v319_v43 }
 0x226   :  { %v269_v54 = vmul.f32 %v264_v49, %v244_v40  ;;  %v302_v9 = vadd.f32 -0.016096033, %v297_v56 }
 0x227   :  { %v343_v52 = vadd.f32 -0.014264739, %v338_v47  ;;  %v329_v55 = vmul.f32 %v324_v51, %v244_v40  ;;  %v293_v36 = vadd.f32 -0.0029546, %v288_v44  ;;  %v360_v59 = vadd.f32 1.0, %v351_v48 }
 0x228   :  { %v274_v61 = vadd.f32 -5.6925062e-05, %v269_v54  ;;  %v347_v20 = vmul.f32 %v884_v57, %v302_v9 }
 0x229   :  { %v679_v30 = vpop.eup %678  ;;  %682 = vrcp.f32 %v343_v52  ;;  %v334_v62 = vadd.f32 -0.0073733293, %v329_v55  ;;  %v298_v45 = vmul.f32 %v293_v36, %v904_v22  ;;  %v365_v12 = vmul.f32 %v360_v59, %v220_v63 }
 0x22a   :  { %v353_v60 = vmul.f32 %v679_v30, %v346_v53  ;;  %v279_v7 = vmul.f32 %v274_v61, %v244_v40 }
 0x22b   :  { %v339_v8 = vmul.f32 %v334_v62, %v244_v40  ;;  %v303_v18 = vadd.f32 -0.016096033, %v298_v45 }
 0x22c   :  { %v361_v6 = vadd.f32 1.0, %v353_v60  ;;  %v284_v15 = vadd.f32 -0.00073499064, %v279_v7 }
 0x22d   :  { %v344_v0 = vadd.f32 -0.014264739, %v339_v8  ;;  %v681_v16 = vpop.eup %680  ;;  %v348_v23 = vmul.f32 %v900_v14, %v303_v18 }
 0x22e   :  { %v366_v13 = vmul.f32 %v361_v6, %v221_v1  ;;  %v289_v19 = vmul.f32 %v284_v15, %v244_v40  ;;  %v355_v37 = vmul.f32 %v681_v16, %v347_v20 }
 0x22f   :  { %684 = vrcp.f32 %v344_v0 }
 0x230   :  { %v370_v17 = vpack.c.bf16 %v366_v13, %v365_v12  ;;  %v294_v32 = vadd.f32 -0.0029546, %v289_v19  ;;  %v362_v25 = vadd.f32 1.0, %v355_v37 }
 0x232   :  { %627 = vmatmul.mubr.bf16.vlgmr.msra.gmra.mxu0 %v370_v17  ;;  %v299_v21 = vmul.f32 %v294_v32, %v244_v40  ;;  %v367_v31 = vmul.f32 %v362_v25, %v222_v27  ;;  %v224_v40 = vmul.f32 0.5, %v914_v41 }
 0x234   :  { %v304_v26 = vadd.f32 -0.016096033, %v299_v21 }
 0x236   :  { %v683_v24 = vpop.eup %682  ;;  %v349_v57 = vmul.f32 %v928_v10, %v304_v26 }
 0x237   :  { %v357_v22 = vmul.f32 %v683_v24, %v348_v23 }
 0x239   :  { %v363_v29 = vadd.f32 1.0, %v357_v22 }
 0x23b   :  { %v368_v33 = vmul.f32 %v363_v29, %v223_v28 }
 0x23c   :  { %v685_v34 = vpop.eup %684 }
 0x23d   :  { %v371_v35 = vpack.c.bf16 %v368_v33, %v367_v31  ;;  %v359_v39 = vmul.f32 %v685_v34, %v349_v57 }
 0x23f   :  { %631 = vmatmul.mubr.bf16.vlgmr.msra.gmra.mxu1 %v371_v35  ;;  %v364_v14 = vadd.f32 1.0, %v359_v39 }
 0x240   :  { %634 = vmatprep.mubr.msk.bf16.mxu1 %vm687_vm2, %v686_v38 }
 0x241   :  { %v369_v42 = vmul.f32 %v364_v14, %v224_v40 }
 0x243   :  { %v372_v43 = vpack.c.bf16 %v369_v42, %v369_v42 }
 0x247   :  { %635 = vmatmul.mubr.bf16.gmra.mxu1 %v372_v43 }
 0x2f2   :  { %v478_v58 = vpop.f32.mrf.mxu0 }
 0x2f3   :  { %v479_v50 = vadd.f32 %v550_v46, %v478_v58 }
 0x2f4   :  { %v628_v10 = vpop.f32.mrf.mxu0 }
 0x2f5   :  { %v500_v44 = vadd.f32 %v734_v2, %v479_v50 }
 0x2f6   :  { %v481_v47 = vpop.f32.mrf.mxu0 }
 0x2f7   :  { %v564_v48 = vpack.c.bf16 %v500_v44, %v500_v44  ;;  %v482_v41 = vadd.f32 %v550_v46, %v481_v47 }
 0x2f8   :  { %v629_v49 = vpop.f32.mrf.mxu0 }
 0x2f9   :  { %527 = vst.msk [vmem:[%s988_s7] sm:$0xf] %vm526_vm3, %v564_v48  ;;  %v501_v38 = vadd.f32 %v738_v4, %v482_v41 }
 0x2fb   :  { %v565_v51 = vpack.c.bf16 %v501_v38, %v501_v38 }
 0x2fd   :  { %528 = vst.msk [vmem:[%s988_s7 + $0x4] sm:$0xf] %vm526_vm3, %v565_v51 }
 0x2ff   :  { %v486_v52 = vpop.f32.mrf.mxu1 }
 0x300   :  { %v487_v2 = vadd.f32 %v550_v46, %v486_v52 }
 0x301   :  { %v632_v53 = vpop.f32.mrf.mxu1 }
 0x302   :  { %v502_v54 = vadd.f32 %v736_v3, %v487_v2 }
 0x303   :  { %v489_v55 = vpop.f32.mrf.mxu1 }
 0x304   :  { %v566_v30 = vpack.c.bf16 %v502_v54, %v502_v54  ;;  %v490_v56 = vadd.f32 %v550_v46, %v489_v55 }
 0x305   :  { %v633_v36 = vpop.f32.mrf.mxu1 }
 0x306   :  { %529 = vst.msk [vmem:[%s988_s7 + $0x8] sm:$0xf] %vm526_vm3, %v566_v30  ;;  %v503_v4 = vadd.f32 %v740_v5, %v490_v56 }
 0x307   :  { %v494_v59 = vpop.f32.mrf.mxu1 }
 0x308   :  { %v567_v60 = vpack.c.bf16 %v503_v4, %v503_v4  ;;  %v495_v61 = vadd.f32 %v550_v46, %v494_v59 }
 0x309   :  { %v636_v62 = vpop.f32.mrf.mxu1 }
 0x30a   :  { %530 = vst.msk [vmem:[%s988_s7 + $0xc] sm:$0xf] %vm526_vm3, %v567_v60  ;;  %v504_v3 = vadd.f32 %v495_v61, %v753_v11 }
 0x30b   :  { %v497_v63 = vpop.f32.mrf.mxu1 }
 0x30c   :  { %v568_v1 = vpack.c.bf16 %v504_v3, %v504_v3 }
 0x30d   :  { %v637_v6 = vpop.f32.mrf.mxu1 }
 0x30e   :  { %532 = vst.msk [vmem:[%s988_s7 + $0x10] sm:$0x1] %vm531_vm4, %v568_v1 }

</bundles_post_ra>
